<compile_context>
chip_gen: v5e
topology: v5e:2x2
jax: 0.10.0
libtpu: 0.0.40
codegen_flags: <defaults>
</compile_context>

<pallas_src>
import functools

import jax
import jax.numpy as jnp
from jax import lax
from jax.experimental import pallas as pl
from jax.experimental.pallas import tpu as pltpu


# ---------------------------------------------------------------------------
# Kernels
# ---------------------------------------------------------------------------
def _conv_stack(x_ref, w_ref, b_ref, *, H, W):
    """3x3 conv (stride 1, pad 1) for all capsules as 9 shifted-slice matmuls.

    x_ref: (1, H+2, W+2, C) padded NHWC slab for one batch element.
    w_ref: (9, C, OC*NC) packed weights, columns ordered oc*NC + c.
    b_ref: (1, OC*NC)    packed biases, same column order.
    Returns (OC*NC, H*W) -- exactly the per-batch torch.stack(dim=2) flat layout.
    """
    C = x_ref.shape[-1]
    acc = None
    for kh in range(3):
        for kw in range(3):
            xs = x_ref[0, kh:kh + H, kw:kw + W, :].reshape(H * W, C)
            p = jnp.dot(xs, w_ref[kh * 3 + kw], preferred_element_type=jnp.float32)
            acc = p if acc is None else acc + p
    y = acc + b_ref[...]                      # (H*W, OC*NC)
    return jnp.transpose(y)                   # (OC*NC, H*W)


def _caps_squash_kernel(x_ref, w_ref, b_ref, s_ref, st_ref, o_ref, *, H, W):
    """Fully fused: conv + stack layout + squash (requires H*W % OC == 0)."""
    t = _conv_stack(x_ref, w_ref, b_ref, H=H, W=W)                      # (COUT, HW)
    # per-route squared norms: each route is OC consecutive lanes of a row
    sq = jnp.dot(t * t, s_ref[...], preferred_element_type=jnp.float32)  # (COUT, HW//OC)
    scale = sq / ((1.0 + sq) * jnp.sqrt(sq))                             # squash factor
    # broadcast the per-route factor back to every lane of its route (0/1 matmul)
    o_ref[0] = t * jnp.dot(scale, st_ref[...], preferred_element_type=jnp.float32)


def _caps_kernel(x_ref, w_ref, b_ref, o_ref, *, H, W):
    """Fallback: conv + stack layout only (squash done in a second kernel)."""
    o_ref[0] = _conv_stack(x_ref, w_ref, b_ref, H=H, W=W)


def _squash_rows_kernel(z_ref, o_ref):
    z = z_ref[0]                                            # (num_routes, OC)
    s = jnp.sum(z * z, axis=-1, keepdims=True)
    o_ref[0] = z * (s / ((1.0 + s) * jnp.sqrt(s)))


# ---------------------------------------------------------------------------
# Wrapper
# ---------------------------------------------------------------------------
def primarycaps_forward(x, weights, biases, *, out_channels):
    """x: (N, C_in, H, W) f32.  weights: (NC, OC, C_in, 3, 3).  biases: (NC, OC)."""
    N, C, H, W = x.shape
    OC = out_channels
    assert C % OC == 0                     # module invariant (same assert as PyTorch)
    NC = C // OC
    COUT = OC * NC                         # == C
    HW = H * W

    # ---- small one-time glue in XLA ----------------------------------------
    # NCHW -> NHWC + halo pad: keeps channels on the 128-lane axis (no im2col blowup).
    xp = jnp.pad(jnp.transpose(x, (0, 2, 3, 1)), ((0, 0), (1, 1), (1, 1), (0, 0)))
    # Pack all capsule weights; column order oc*NC + c so the in-kernel transpose
    # directly produces torch.stack(dim=2)'s memory layout.
    wt = jnp.transpose(weights, (3, 4, 2, 1, 0)).reshape(9, C, COUT)     # (9, C, COUT)
    bt = jnp.transpose(biases, (1, 0)).reshape(1, COUT)                  # (1, COUT)

    cparams = pltpu.CompilerParams(
        dimension_semantics=("parallel",),          # batch axis splits across TCs (v7x)
        vmem_limit_bytes=64 * 1024 * 1024,
    )

    if HW % OC == 0:
        # ---- fully fused single pass (default configs land here) -----------
        G = HW // OC
        seg = (jnp.arange(HW)[:, None] // OC
               == jnp.arange(G)[None, :]).astype(jnp.float32)            # (HW, G)
        stacked = pl.pallas_call(
            functools.partial(_caps_squash_kernel, H=H, W=W),
            out_shape=jax.ShapeDtypeStruct((N, COUT, HW), jnp.float32),
            grid_spec=pltpu.PrefetchScalarGridSpec(
                num_scalar_prefetch=0,
                grid=(N,),
                in_specs=[
                    pl.BlockSpec((1, H + 2, W + 2, C), lambda n: (n, 0, 0, 0)),
                    pl.BlockSpec((9, C, COUT), lambda n: (0, 0, 0)),
                    pl.BlockSpec((1, COUT), lambda n: (0, 0)),
                    pl.BlockSpec((HW, G), lambda n: (0, 0)),
                    pl.BlockSpec((G, HW), lambda n: (0, 0)),
                ],
                out_specs=pl.BlockSpec((1, COUT, HW), lambda n: (n, 0, 0)),
            ),
            compiler_params=cparams,
        )(xp, wt, bt, seg, seg.T)
        # row-major reshape == torch .view(N, num_routes, OC); no transpose pass needed.
        return stacked.reshape(N, NC * HW, OC)

    # ---- general fallback: conv kernel + separate squash kernel -------------
    stacked = pl.pallas_call(
        functools.partial(_caps_kernel, H=H, W=W),
        out_shape=jax.ShapeDtypeStruct((N, COUT, HW), jnp.float32),
        grid_spec=pltpu.PrefetchScalarGridSpec(
            num_scalar_prefetch=0,
            grid=(N,),
            in_specs=[
                pl.BlockSpec((1, H + 2, W + 2, C), lambda n: (n, 0, 0, 0)),
                pl.BlockSpec((9, C, COUT), lambda n: (0, 0, 0)),
                pl.BlockSpec((1, COUT), lambda n: (0, 0)),
            ],
            out_specs=pl.BlockSpec((1, COUT, HW), lambda n: (n, 0, 0)),
        ),
        compiler_params=cparams,
    )(xp, wt, bt)
    z = stacked.reshape(N, NC * HW, OC)
    return pl.pallas_call(
        _squash_rows_kernel,
        out_shape=jax.ShapeDtypeStruct(z.shape, jnp.float32),
        grid_spec=pltpu.PrefetchScalarGridSpec(
            num_scalar_prefetch=0,
            grid=(N,),
            in_specs=[pl.BlockSpec((1, NC * HW, OC), lambda n: (n, 0, 0))],
            out_specs=pl.BlockSpec((1, NC * HW, OC), lambda n: (n, 0, 0)),
        ),
        compiler_params=pltpu.CompilerParams(dimension_semantics=("parallel",)),
    )(z)


# ---------------------------------------------------------------------------
# Reference (plain JAX port of the PyTorch module) for verification
# ---------------------------------------------------------------------------
def _reference(x, weights, biases):
    N = x.shape[0]
    NC, OC = weights.shape[0], weights.shape[1]
    outs = []
    for c in range(NC):
        y = lax.conv_general_dilated(
            x, weights[c], window_strides=(1, 1), padding=((1, 1), (1, 1)),
            dimension_numbers=("NCHW", "OIHW", "NCHW"),
            precision=lax.Precision.HIGHEST)
        outs.append(y + biases[c].reshape(1, OC, 1, 1))
    out = jnp.stack(outs, axis=2)                               # (N, OC, NC, H, W)
    num_routes = out.shape[2] * out.shape[3] * out.shape[4]
    out = out.reshape(N, num_routes, -1)
    s = jnp.sum(out ** 2, axis=-1, keepdims=True)
    return s * out / ((1.0 + s) * jnp.sqrt(s))


# ---------------------------------------------------------------------------
if __name__ == "__main__":
    N, C_in, H, W = 2, 128, 16, 16        # small, lane-friendly (C_in % OC == 0)
    OC = 16                               # module default out_channels
    NC = C_in // OC

    key = jax.random.PRNGKey(0)
    kx, kw, kb = jax.random.split(key, 3)
    x = jax.random.normal(kx, (N, C_in, H, W), dtype=jnp.float32)
    weights = 0.05 * jax.random.normal(kw, (NC, OC, C_in, 3, 3), dtype=jnp.float32)
    biases = 0.01 * jax.random.normal(kb, (NC, OC), dtype=jnp.float32)

    out = primarycaps_forward(x, weights, biases, out_channels=OC)
    out = jax.block_until_ready(out)

    ref = _reference(x, weights, biases)
    assert out.shape == (N, NC * H * W, OC), out.shape
    assert jnp.allclose(out, ref, atol=2e-3, rtol=2e-3), (
        "mismatch vs reference, max abs err = %e" % float(jnp.max(jnp.abs(out - ref))))

    print("KERNEL_OK")
</pallas_src>

<mosaic_0001>
module attributes {stable_mosaic.version = 11 : i64} {
  func.func @_caps_squash_kernel(%arg0: i32, %arg1: memref<1x18x18x128xf32, #tpu.memory_space<vmem>>, %arg2: memref<9x128x128xf32, #tpu.memory_space<vmem>>, %arg3: memref<1x128xf32, #tpu.memory_space<vmem>>, %arg4: memref<256x16xf32, #tpu.memory_space<vmem>>, %arg5: memref<16x256xf32, #tpu.memory_space<vmem>>, %arg6: memref<1x128x256xf32, #tpu.memory_space<vmem>>) attributes {dimension_semantics = [#tpu.dimension_semantics<parallel>], iteration_bounds = array<i64: 2>, scalar_prefetch = 0 : i64, scratch_operands = 0 : i64, tpu.core_type = #tpu.core_type<tc>, window_params = [{transform_indices = @transform_0, window_bounds = array<i64: 1, 18, 18, 128>}, {pipeline_mode = #tpu.pipeline_mode<synchronous>, transform_indices = @transform_1, window_bounds = array<i64: 9, 128, 128>}, {pipeline_mode = #tpu.pipeline_mode<synchronous>, transform_indices = @transform_2, window_bounds = array<i64: 1, 128>}, {pipeline_mode = #tpu.pipeline_mode<synchronous>, transform_indices = @transform_3, window_bounds = array<i64: 256, 16>}, {pipeline_mode = #tpu.pipeline_mode<synchronous>, transform_indices = @transform_4, window_bounds = array<i64: 16, 256>}, {transform_indices = @transform_5, window_bounds = array<i64: 1, 128, 256>}]} {
    %c0 = arith.constant 0 : index
    %c0_0 = arith.constant 0 : index
    %c0_1 = arith.constant 0 : index
    %c0_2 = arith.constant 0 : index
    %0 = vector.load %arg1[%c0, %c0_0, %c0_1, %c0_2] : memref<1x18x18x128xf32, #tpu.memory_space<vmem>>, vector<1x16x16x128xf32>
    %1 = vector.shape_cast %0 : vector<1x16x16x128xf32> to vector<16x16x128xf32>
    %2 = vector.shape_cast %1 : vector<16x16x128xf32> to vector<256x128xf32>
    %c0_3 = arith.constant 0 : index
    %c0_4 = arith.constant 0 : index
    %c0_5 = arith.constant 0 : index
    %3 = vector.load %arg2[%c0_3, %c0_4, %c0_5] : memref<9x128x128xf32, #tpu.memory_space<vmem>>, vector<1x128x128xf32>
    %4 = vector.shape_cast %3 : vector<1x128x128xf32> to vector<128x128xf32>
    %cst = arith.constant dense<0.000000e+00> : vector<256x128xf32>
    %5 = tpu.matmul %2, %4, %cst {dimension_numbers = #tpu.dot_dimension_numbers<[1], [0], [0], [1], [0, 0, 1, 1], [], []>} : vector<256x128xf32>, vector<128x128xf32>, vector<256x128xf32> -> vector<256x128xf32>
    %c0_6 = arith.constant 0 : index
    %c0_7 = arith.constant 0 : index
    %c1 = arith.constant 1 : index
    %c0_8 = arith.constant 0 : index
    %6 = vector.load %arg1[%c0_6, %c0_7, %c1, %c0_8] : memref<1x18x18x128xf32, #tpu.memory_space<vmem>>, vector<1x16x16x128xf32>
    %7 = vector.shape_cast %6 : vector<1x16x16x128xf32> to vector<16x16x128xf32>
    %8 = vector.shape_cast %7 : vector<16x16x128xf32> to vector<256x128xf32>
    %c1_9 = arith.constant 1 : index
    %c0_10 = arith.constant 0 : index
    %c0_11 = arith.constant 0 : index
    %9 = vector.load %arg2[%c1_9, %c0_10, %c0_11] : memref<9x128x128xf32, #tpu.memory_space<vmem>>, vector<1x128x128xf32>
    %10 = vector.shape_cast %9 : vector<1x128x128xf32> to vector<128x128xf32>
    %cst_12 = arith.constant dense<0.000000e+00> : vector<256x128xf32>
    %11 = tpu.matmul %8, %10, %cst_12 {dimension_numbers = #tpu.dot_dimension_numbers<[1], [0], [0], [1], [0, 0, 1, 1], [], []>} : vector<256x128xf32>, vector<128x128xf32>, vector<256x128xf32> -> vector<256x128xf32>
    %12 = arith.addf %5, %11 : vector<256x128xf32>
    %c0_13 = arith.constant 0 : index
    %c0_14 = arith.constant 0 : index
    %c2 = arith.constant 2 : index
    %c0_15 = arith.constant 0 : index
    %13 = vector.load %arg1[%c0_13, %c0_14, %c2, %c0_15] : memref<1x18x18x128xf32, #tpu.memory_space<vmem>>, vector<1x16x16x128xf32>
    %14 = vector.shape_cast %13 : vector<1x16x16x128xf32> to vector<16x16x128xf32>
    %15 = vector.shape_cast %14 : vector<16x16x128xf32> to vector<256x128xf32>
    %c2_16 = arith.constant 2 : index
    %c0_17 = arith.constant 0 : index
    %c0_18 = arith.constant 0 : index
    %16 = vector.load %arg2[%c2_16, %c0_17, %c0_18] : memref<9x128x128xf32, #tpu.memory_space<vmem>>, vector<1x128x128xf32>
    %17 = vector.shape_cast %16 : vector<1x128x128xf32> to vector<128x128xf32>
    %cst_19 = arith.constant dense<0.000000e+00> : vector<256x128xf32>
    %18 = tpu.matmul %15, %17, %cst_19 {dimension_numbers = #tpu.dot_dimension_numbers<[1], [0], [0], [1], [0, 0, 1, 1], [], []>} : vector<256x128xf32>, vector<128x128xf32>, vector<256x128xf32> -> vector<256x128xf32>
    %19 = arith.addf %12, %18 : vector<256x128xf32>
    %c0_20 = arith.constant 0 : index
    %c1_21 = arith.constant 1 : index
    %c0_22 = arith.constant 0 : index
    %c0_23 = arith.constant 0 : index
    %20 = vector.load %arg1[%c0_20, %c1_21, %c0_22, %c0_23] : memref<1x18x18x128xf32, #tpu.memory_space<vmem>>, vector<1x16x16x128xf32>
    %21 = vector.shape_cast %20 : vector<1x16x16x128xf32> to vector<16x16x128xf32>
    %22 = vector.shape_cast %21 : vector<16x16x128xf32> to vector<256x128xf32>
    %c3 = arith.constant 3 : index
    %c0_24 = arith.constant 0 : index
    %c0_25 = arith.constant 0 : index
    %23 = vector.load %arg2[%c3, %c0_24, %c0_25] : memref<9x128x128xf32, #tpu.memory_space<vmem>>, vector<1x128x128xf32>
    %24 = vector.shape_cast %23 : vector<1x128x128xf32> to vector<128x128xf32>
    %cst_26 = arith.constant dense<0.000000e+00> : vector<256x128xf32>
    %25 = tpu.matmul %22, %24, %cst_26 {dimension_numbers = #tpu.dot_dimension_numbers<[1], [0], [0], [1], [0, 0, 1, 1], [], []>} : vector<256x128xf32>, vector<128x128xf32>, vector<256x128xf32> -> vector<256x128xf32>
    %26 = arith.addf %19, %25 : vector<256x128xf32>
    %c0_27 = arith.constant 0 : index
    %c1_28 = arith.constant 1 : index
    %c1_29 = arith.constant 1 : index
    %c0_30 = arith.constant 0 : index
    %27 = vector.load %arg1[%c0_27, %c1_28, %c1_29, %c0_30] : memref<1x18x18x128xf32, #tpu.memory_space<vmem>>, vector<1x16x16x128xf32>
    %28 = vector.shape_cast %27 : vector<1x16x16x128xf32> to vector<16x16x128xf32>
    %29 = vector.shape_cast %28 : vector<16x16x128xf32> to vector<256x128xf32>
    %c4 = arith.constant 4 : index
    %c0_31 = arith.constant 0 : index
    %c0_32 = arith.constant 0 : index
    %30 = vector.load %arg2[%c4, %c0_31, %c0_32] : memref<9x128x128xf32, #tpu.memory_space<vmem>>, vector<1x128x128xf32>
    %31 = vector.shape_cast %30 : vector<1x128x128xf32> to vector<128x128xf32>
    %cst_33 = arith.constant dense<0.000000e+00> : vector<256x128xf32>
    %32 = tpu.matmul %29, %31, %cst_33 {dimension_numbers = #tpu.dot_dimension_numbers<[1], [0], [0], [1], [0, 0, 1, 1], [], []>} : vector<256x128xf32>, vector<128x128xf32>, vector<256x128xf32> -> vector<256x128xf32>
    %33 = arith.addf %26, %32 : vector<256x128xf32>
    %c0_34 = arith.constant 0 : index
    %c1_35 = arith.constant 1 : index
    %c2_36 = arith.constant 2 : index
    %c0_37 = arith.constant 0 : index
    %34 = vector.load %arg1[%c0_34, %c1_35, %c2_36, %c0_37] : memref<1x18x18x128xf32, #tpu.memory_space<vmem>>, vector<1x16x16x128xf32>
    %35 = vector.shape_cast %34 : vector<1x16x16x128xf32> to vector<16x16x128xf32>
    %36 = vector.shape_cast %35 : vector<16x16x128xf32> to vector<256x128xf32>
    %c5 = arith.constant 5 : index
    %c0_38 = arith.constant 0 : index
    %c0_39 = arith.constant 0 : index
    %37 = vector.load %arg2[%c5, %c0_38, %c0_39] : memref<9x128x128xf32, #tpu.memory_space<vmem>>, vector<1x128x128xf32>
    %38 = vector.shape_cast %37 : vector<1x128x128xf32> to vector<128x128xf32>
    %cst_40 = arith.constant dense<0.000000e+00> : vector<256x128xf32>
    %39 = tpu.matmul %36, %38, %cst_40 {dimension_numbers = #tpu.dot_dimension_numbers<[1], [0], [0], [1], [0, 0, 1, 1], [], []>} : vector<256x128xf32>, vector<128x128xf32>, vector<256x128xf32> -> vector<256x128xf32>
    %40 = arith.addf %33, %39 : vector<256x128xf32>
    %c0_41 = arith.constant 0 : index
    %c2_42 = arith.constant 2 : index
    %c0_43 = arith.constant 0 : index
    %c0_44 = arith.constant 0 : index
    %41 = vector.load %arg1[%c0_41, %c2_42, %c0_43, %c0_44] : memref<1x18x18x128xf32, #tpu.memory_space<vmem>>, vector<1x16x16x128xf32>
    %42 = vector.shape_cast %41 : vector<1x16x16x128xf32> to vector<16x16x128xf32>
    %43 = vector.shape_cast %42 : vector<16x16x128xf32> to vector<256x128xf32>
    %c6 = arith.constant 6 : index
    %c0_45 = arith.constant 0 : index
    %c0_46 = arith.constant 0 : index
    %44 = vector.load %arg2[%c6, %c0_45, %c0_46] : memref<9x128x128xf32, #tpu.memory_space<vmem>>, vector<1x128x128xf32>
    %45 = vector.shape_cast %44 : vector<1x128x128xf32> to vector<128x128xf32>
    %cst_47 = arith.constant dense<0.000000e+00> : vector<256x128xf32>
    %46 = tpu.matmul %43, %45, %cst_47 {dimension_numbers = #tpu.dot_dimension_numbers<[1], [0], [0], [1], [0, 0, 1, 1], [], []>} : vector<256x128xf32>, vector<128x128xf32>, vector<256x128xf32> -> vector<256x128xf32>
    %47 = arith.addf %40, %46 : vector<256x128xf32>
    %c0_48 = arith.constant 0 : index
    %c2_49 = arith.constant 2 : index
    %c1_50 = arith.constant 1 : index
    %c0_51 = arith.constant 0 : index
    %48 = vector.load %arg1[%c0_48, %c2_49, %c1_50, %c0_51] : memref<1x18x18x128xf32, #tpu.memory_space<vmem>>, vector<1x16x16x128xf32>
    %49 = vector.shape_cast %48 : vector<1x16x16x128xf32> to vector<16x16x128xf32>
    %50 = vector.shape_cast %49 : vector<16x16x128xf32> to vector<256x128xf32>
    %c7 = arith.constant 7 : index
    %c0_52 = arith.constant 0 : index
    %c0_53 = arith.constant 0 : index
    %51 = vector.load %arg2[%c7, %c0_52, %c0_53] : memref<9x128x128xf32, #tpu.memory_space<vmem>>, vector<1x128x128xf32>
    %52 = vector.shape_cast %51 : vector<1x128x128xf32> to vector<128x128xf32>
    %cst_54 = arith.constant dense<0.000000e+00> : vector<256x128xf32>
    %53 = tpu.matmul %50, %52, %cst_54 {dimension_numbers = #tpu.dot_dimension_numbers<[1], [0], [0], [1], [0, 0, 1, 1], [], []>} : vector<256x128xf32>, vector<128x128xf32>, vector<256x128xf32> -> vector<256x128xf32>
    %54 = arith.addf %47, %53 : vector<256x128xf32>
    %c0_55 = arith.constant 0 : index
    %c2_56 = arith.constant 2 : index
    %c2_57 = arith.constant 2 : index
    %c0_58 = arith.constant 0 : index
    %55 = vector.load %arg1[%c0_55, %c2_56, %c2_57, %c0_58] : memref<1x18x18x128xf32, #tpu.memory_space<vmem>>, vector<1x16x16x128xf32>
    %56 = vector.shape_cast %55 : vector<1x16x16x128xf32> to vector<16x16x128xf32>
    %57 = vector.shape_cast %56 : vector<16x16x128xf32> to vector<256x128xf32>
    %c8 = arith.constant 8 : index
    %c0_59 = arith.constant 0 : index
    %c0_60 = arith.constant 0 : index
    %58 = vector.load %arg2[%c8, %c0_59, %c0_60] : memref<9x128x128xf32, #tpu.memory_space<vmem>>, vector<1x128x128xf32>
    %59 = vector.shape_cast %58 : vector<1x128x128xf32> to vector<128x128xf32>
    %cst_61 = arith.constant dense<0.000000e+00> : vector<256x128xf32>
    %60 = tpu.matmul %57, %59, %cst_61 {dimension_numbers = #tpu.dot_dimension_numbers<[1], [0], [0], [1], [0, 0, 1, 1], [], []>} : vector<256x128xf32>, vector<128x128xf32>, vector<256x128xf32> -> vector<256x128xf32>
    %61 = arith.addf %54, %60 : vector<256x128xf32>
    %c0_62 = arith.constant 0 : index
    %c0_63 = arith.constant 0 : index
    %62 = vector.load %arg3[%c0_62, %c0_63] : memref<1x128xf32, #tpu.memory_space<vmem>>, vector<1x128xf32>
    %63 = vector.broadcast %62 : vector<1x128xf32> to vector<256x128xf32>
    %64 = arith.addf %61, %63 : vector<256x128xf32>
    %65 = tpu.transpose %64, [1, 0] : vector<256x128xf32> -> vector<128x256xf32>
    %66 = arith.mulf %65, %65 : vector<128x256xf32>
    %c0_64 = arith.constant 0 : index
    %c0_65 = arith.constant 0 : index
    %67 = vector.load %arg4[%c0_64, %c0_65] : memref<256x16xf32, #tpu.memory_space<vmem>>, vector<256x16xf32>
    %cst_66 = arith.constant dense<0.000000e+00> : vector<128x16xf32>
    %68 = tpu.matmul %66, %67, %cst_66 {dimension_numbers = #tpu.dot_dimension_numbers<[1], [0], [0], [1], [0, 0, 1, 1], [], []>} : vector<128x256xf32>, vector<256x16xf32>, vector<128x16xf32> -> vector<128x16xf32>
    %cst_67 = arith.constant 1.000000e+00 : f32
    %69 = vector.broadcast %cst_67 : f32 to vector<128x16xf32>
    %70 = arith.addf %69, %68 : vector<128x16xf32>
    %71 = math.sqrt %68 : vector<128x16xf32>
    %72 = arith.mulf %70, %71 : vector<128x16xf32>
    %73 = arith.divf %68, %72 : vector<128x16xf32>
    %c0_68 = arith.constant 0 : index
    %c0_69 = arith.constant 0 : index
    %74 = vector.load %arg5[%c0_68, %c0_69] : memref<16x256xf32, #tpu.memory_space<vmem>>, vector<16x256xf32>
    %cst_70 = arith.constant dense<0.000000e+00> : vector<128x256xf32>
    %75 = tpu.matmul %73, %74, %cst_70 {dimension_numbers = #tpu.dot_dimension_numbers<[1], [0], [0], [1], [0, 0, 1, 1], [], []>} : vector<128x16xf32>, vector<16x256xf32>, vector<128x256xf32> -> vector<128x256xf32>
    %76 = arith.mulf %65, %75 : vector<128x256xf32>
    %c0_71 = arith.constant 0 : index
    %c0_72 = arith.constant 0 : index
    %c0_73 = arith.constant 0 : index
    %77 = vector.load %arg6[%c0_71, %c0_72, %c0_73] : memref<1x128x256xf32, #tpu.memory_space<vmem>>, vector<1x128x256xf32>
    %78 = vector.shape_cast %77 : vector<1x128x256xf32> to vector<128x256xf32>
    %79 = vector.shape_cast %76 : vector<128x256xf32> to vector<1x128x256xf32>
    tpu.vector_store %arg6[%c0_71, %c0_72, %c0_73], %79 {strides = array<i32>} : memref<1x128x256xf32, #tpu.memory_space<vmem>>, vector<1x128x256xf32>,
    return
  }
  func.func @transform_0(%arg0: i32) -> (i32, i32, i32, i32) {
    %c0_i32 = arith.constant 0 : i32
    %c0_i32_0 = arith.constant 0 : i32
    %c0_i32_1 = arith.constant 0 : i32
    %c0_i32_2 = arith.constant 0 : i32
    return %arg0, %c0_i32, %c0_i32_0, %c0_i32_1 : i32, i32, i32, i32
  }
  func.func @transform_1(%arg0: i32) -> (i32, i32, i32) {
    %c0_i32 = arith.constant 0 : i32
    %c0_i32_0 = arith.constant 0 : i32
    %c0_i32_1 = arith.constant 0 : i32
    %c0_i32_2 = arith.constant 0 : i32
    return %c0_i32, %c0_i32_0, %c0_i32_1 : i32, i32, i32
  }
  func.func @transform_2(%arg0: i32) -> (i32, i32) {
    %c0_i32 = arith.constant 0 : i32
    %c0_i32_0 = arith.constant 0 : i32
    %c0_i32_1 = arith.constant 0 : i32
    return %c0_i32, %c0_i32_0 : i32, i32
  }
  func.func @transform_3(%arg0: i32) -> (i32, i32) {
    %c0_i32 = arith.constant 0 : i32
    %c0_i32_0 = arith.constant 0 : i32
    %c0_i32_1 = arith.constant 0 : i32
    return %c0_i32, %c0_i32_0 : i32, i32
  }
  func.func @transform_4(%arg0: i32) -> (i32, i32) {
    %c0_i32 = arith.constant 0 : i32
    %c0_i32_0 = arith.constant 0 : i32
    %c0_i32_1 = arith.constant 0 : i32
    return %c0_i32, %c0_i32_0 : i32, i32
  }
  func.func @transform_5(%arg0: i32) -> (i32, i32, i32) {
    %c0_i32 = arith.constant 0 : i32
    %c0_i32_0 = arith.constant 0 : i32
    %c0_i32_1 = arith.constant 0 : i32
    return %arg0, %c0_i32, %c0_i32_0 : i32, i32, i32
  }
}

</mosaic_0001>

<bundles_post_ra>
// kernel: tpu_custom_call.1
= control target key start
LH: loop header
LB: loop body
LE: loop exit
PB: predicated region body
PF: predicated region fallthrough
CT: control target
= control target key end

     0   :  { %10 = vsyncpa [#allocation3], 0  ;;  %s5786_s0 = inlined_call_operand.vmem [shape: f32[2,18,18,128], index: 0, kind: input, shape index: {}]   ;;  %s5787_s1 = inlined_call_operand.vmem [shape: f32[9,128,128], index: 1, kind: input, shape index: {}]   ;;  %s5788_s2 = inlined_call_operand.vmem [shape: f32[1,128], index: 2, kind: input, shape index: {}]   ;;  %s5789_s3 = inlined_call_operand.vmem [shape: f32[256,16], index: 3, kind: input, shape index: {}]   ;;  %s5790_s4 = inlined_call_operand.vmem [shape: f32[16,256], index: 4, kind: input, shape index: {}]   ;;  %s5791_s5 = inlined_call_operand.hbm [shape: f32[2,128,256], index: 5, kind: output, shape index: {}]  }
   0x1   :  { %12 = vsyncpa [#allocation3 + $0x1], 0  ;;  %s3588_s18 = smov 0   ;;  %s3590_s19 = smov 0  }
   0x2   :  { %s3592_s20 = smov 0   ;;  %s3594_s21 = smov 0  }
   0x3 LB: > { %s3609_s22 = sadd.s32 4294967295, %s3554_s21   ;;  %s2989_s23 = sadd.s32 4294967294, %s3554_s21   ;;  %s3554_s21 = sphi %s3594_s21, %s5909_s21   ;;  %s3550_s20 = sphi %s3592_s20, %s5908_s20   ;;  %s3546_s19 = sphi %s3590_s19, %s5907_s19   ;;  %s3542_s18 = sphi %s3588_s18, %s5906_s18  }
   0x4   : > { %s3613_s24 = sadd.s32 1, %s3554_s21   ;;  %s135_s25 = sadd.s32 1, %s3550_s20 }
   0x5   : > { %s132_s26 = ssub.s32 %s3554_s21, %s3613_s24  ;;  %p145_p0 = scmp.ne.s32.totalorder %s3550_s20, %s3546_s19 }
   0x6   : > { %p133_p1 = scmp.eq.s32.totalorder %s132_s26, 0  ;;  %p146_p2 = scmp.eq.s32.totalorder %s3609_s22, 1 }
   0x7   : > { %p151_p3 = scmp.ne.s32.totalorder %s3546_s19, %s3542_s18  ;;  %p152_p4 = scmp.eq.s32.totalorder %s2989_s23, 1 }
   0x8   : > { %s3624_s27 = scalar_select %p133_p1, %s3550_s20, %s135_s25  }
   0x9   : > { %p3626_p5 = por %p146_p2, %p145_p0  ;;  %p3630_p6 = por %p152_p4, %p151_p3 }
   0xa   : > { %p2992_p7 = scmp.ge.s32.totalorder %s3554_s21, 1  ;;  %p190_p8 = scmp.lt.s32.totalorder %s3554_s21, 3 }
   0xc   : > { %p191_p9 = pnand %p2992_p7, %p190_p8 }
   0xe   : > { %194 = sbr.rel (%p191_p9) target bundleno = 1360 (0x550), region = 40 }
  0x13   : > { %v3010_v0 = vld [vmem:[%s5787_s1 + $0xf8] sm:$0xff]  ;;  %v3009_v2 = vld [vmem:[%s5787_s1 + $0xf0] sm:$0xff]  ;;  %v3008_v4 = vld [vmem:[%s5787_s1 + $0xe8] sm:$0xff]  ;;  %p218_p10 = scmp.lt.s32.totalorder %s3609_s22, 1  ;;  %vm2668_vm5 = vcmask 130048   ;;  %s215_s30 = sand.u32 1, %s3546_s19  }
  0x14   : > { %v270_v1 = vld [vmem:[%s5787_s1 + $0x78] sm:$0xff]  ;;  %320 = vmatpush.msra.mxu0 %v3010_v0  ;;  %3353 = vmatpush.msra.mxu2 %v3010_v0  ;;  %v269_v3 = vld [vmem:[%s5787_s1 + $0x70] sm:$0xff]  ;;  %v268_v5 = vld [vmem:[%s5787_s1 + $0x68] sm:$0xff]  ;;  %s2993_s6 = sshll.u32 %s215_s30, 8  ;;  %s3512_s17 = scalar_lea.hbm %s5791_s5, 512 }
  0x15   : > { %433 = vmatpush.msra.mxu1 %v270_v1  ;;  %3369 = vmatpush.msra.mxu3 %v270_v1  ;;  %v3007_v6 = vld [vmem:[%s5787_s1 + $0xe0] sm:$0xff]  ;;  %v3006_v8 = vld [vmem:[%s5787_s1 + $0xd8] sm:$0xff]  ;;  %v3005_v10 = vld [vmem:[%s5787_s1 + $0xd0] sm:$0xff]  ;;  %s219_s15 = scalar_select %p218_p10, %s3609_s22, 1 }
  0x16   : > { %321 = vmatpush.msra.mxu0 %v3009_v2  ;;  %3354 = vmatpush.msra.mxu2 %v3009_v2  ;;  %v267_v7 = vld [vmem:[%s5787_s1 + $0x60] sm:$0xff]  ;;  %v266_v9 = vld [vmem:[%s5787_s1 + $0x58] sm:$0xff]  ;;  %v265_v11 = vld [vmem:[%s5787_s1 + $0x50] sm:$0xff]  ;;  %s5687_s7 = scalar_lea.vmem [#allocation2], %s2993_s6 }
  0x17   : > { %434 = vmatpush.msra.mxu1 %v269_v3  ;;  %3370 = vmatpush.msra.mxu3 %v269_v3  ;;  %v3004_v12 = vld [vmem:[%s5787_s1 + $0xc8] sm:$0xff]  ;;  %v3003_v14 = vld [vmem:[%s5787_s1 + $0xc0] sm:$0xff]  ;;  %v3002_v16 = vld [vmem:[%s5787_s1 + $0xb8] sm:$0xff]  ;;  %s3385_s8 = smul.u32 432, %s219_s15  ;;  %s2924_s11 = sshll.u32 %s5687_s7, 4  ;;  %s2925_s11 = int_to_ptr.vmem [resolvable:$true] %s2924_s11 }
  0x18   : > { %322 = vmatpush.msra.mxu0 %v3008_v4  ;;  %3355 = vmatpush.msra.mxu2 %v3008_v4  ;;  %v264_v13 = vld [vmem:[%s5787_s1 + $0x48] sm:$0xff]  ;;  %v263_v15 = vld [vmem:[%s5787_s1 + $0x40] sm:$0xff]  ;;  %v262_v17 = vld [vmem:[%s5787_s1 + $0x38] sm:$0xff] }
  0x19   : > { %435 = vmatpush.msra.mxu1 %v268_v5  ;;  %3371 = vmatpush.msra.mxu3 %v268_v5  ;;  %v3001_v18 = vld [vmem:[%s5787_s1 + $0xb0] sm:$0xff]  ;;  %v3000_v20 = vld [vmem:[%s5787_s1 + $0xa8] sm:$0xff]  ;;  %v2999_v22 = vld [vmem:[%s5787_s1 + $0xa0] sm:$0xff]  ;;  %s3728_s25 = scalar_lea.vmem %s5786_s0, %s3385_s8  ;;  %s3352_s8 = sshll.u32 %s3609_s22, 8 }
  0x1a   : > { %323 = vmatpush.msra.mxu0 %v3007_v6  ;;  %3356 = vmatpush.msra.mxu2 %v3007_v6  ;;  %v261_v19 = vld [vmem:[%s5787_s1 + $0x30] sm:$0xff]  ;;  %v260_v21 = vld [vmem:[%s5787_s1 + $0x28] sm:$0xff]  ;;  %v259_v23 = vld [vmem:[%s5787_s1 + $0x20] sm:$0xff]  ;;  %s2912_s22 = scalar_lea.sflag [#allocation3], %s215_s30 }
  0x1b   : > { %436 = vmatpush.msra.mxu1 %v267_v7  ;;  %3372 = vmatpush.msra.mxu3 %v267_v7  ;;  %v2998_v24 = vld [vmem:[%s5787_s1 + $0x98] sm:$0xff]  ;;  %v2997_v26 = vld [vmem:[%s5787_s1 + $0x90] sm:$0xff]  ;;  %v2996_v28 = vld [vmem:[%s5787_s1 + $0x88] sm:$0xff] }
  0x1c   : > { %324 = vmatpush.msra.mxu0 %v3006_v8  ;;  %3357 = vmatpush.msra.mxu2 %v3006_v8  ;;  %v258_v25 = vld [vmem:[%s5787_s1 + $0x18] sm:$0xff]  ;;  %v257_v27 = vld [vmem:[%s5787_s1 + $0x10] sm:$0xff]  ;;  %v256_v29 = vld [vmem:[%s5787_s1 + $0x8] sm:$0xff] }
  0x1d   : > { %437 = vmatpush.msra.mxu1 %v266_v9  ;;  %3373 = vmatpush.msra.mxu3 %v266_v9  ;;  %v2995_v30 = vld [vmem:[%s5787_s1 + $0x80] sm:$0xff]  ;;  %v3122_v35 = vld [vmem:[%s5787_s1 + $0x278] sm:$0xff]  ;;  %v3121_v37 = vld [vmem:[%s5787_s1 + $0x270] sm:$0xff] }
  0x1e   : > { %325 = vmatpush.msra.mxu0 %v3005_v10  ;;  %3358 = vmatpush.msra.mxu2 %v3005_v10  ;;  %v255_v31 = vld [vmem:[%s5787_s1] sm:$0xff]  ;;  %v3026_v38 = vld [vmem:[%s5787_s1 + $0x178] sm:$0xff]  ;;  %v3120_v39 = vld [vmem:[%s5787_s1 + $0x268] sm:$0xff] }
  0x1f   : > { %438 = vmatpush.msra.mxu1 %v265_v11  ;;  %3374 = vmatpush.msra.mxu3 %v265_v11  ;;  %v271_v32 = vld [vmem:[%s3728_s25 + $0x1] sm:$0xff]  ;;  %v3025_v40 = vld [vmem:[%s5787_s1 + $0x170] sm:$0xff]  ;;  %v3074_v41 = vld [vmem:[%s5787_s1 + $0x1f8] sm:$0xff] }
  0x20   : > { %326 = vmatpush.msra.mxu0 %v3004_v12  ;;  %3359 = vmatpush.msra.mxu2 %v3004_v12  ;;  %v295_v33 = vld [vmem:[%s3728_s25 + $0x121] sm:$0xff]  ;;  %v3073_v43 = vld [vmem:[%s5787_s1 + $0x1f0] sm:$0xff]  ;;  %v3022_v51 = vld [vmem:[%s5787_s1 + $0x158] sm:$0xff] }
  0x21   : > { %439 = vmatpush.msra.mxu1 %v264_v13  ;;  %3375 = vmatpush.msra.mxu3 %v264_v13  ;;  %v223_v34 = vld [vmem:[%s3728_s25] sm:$0xff]  ;;  %v3024_v42 = vld [vmem:[%s5787_s1 + $0x168] sm:$0xff]  ;;  %v3021_v53 = vld [vmem:[%s5787_s1 + $0x150] sm:$0xff] }
  0x22   : > { %327 = vmatpush.msra.mxu0 %v3003_v14  ;;  %3360 = vmatpush.msra.mxu2 %v3003_v14  ;;  %v3746_v36 = vld [vmem:[%s3728_s25 + $0x120] sm:$0xff]  ;;  %v272_v44 = vld [vmem:[%s3728_s25 + $0x9] sm:$0xff]  ;;  %v3070_v54 = vld [vmem:[%s5787_s1 + $0x1d8] sm:$0xff] }
  0x23   : > { %440 = vmatpush.msra.mxu1 %v263_v15  ;;  %3376 = vmatpush.msra.mxu3 %v263_v15  ;;  %v3072_v45 = vld [vmem:[%s5787_s1 + $0x1e8] sm:$0xff]  ;;  %v3119_v48 = vld [vmem:[%s5787_s1 + $0x260] sm:$0xff]  ;;  %v3806_v58 = vld [vmem:[%s3728_s25 + $0x18] sm:$0xff] }
  0x24   : > { %328 = vmatpush.msra.mxu0 %v3002_v16  ;;  %3361 = vmatpush.msra.mxu2 %v3002_v16  ;;  %v296_v46 = vld [vmem:[%s3728_s25 + $0x129] sm:$0xff]  ;;  %v3023_v49 = vld [vmem:[%s5787_s1 + $0x160] sm:$0xff]  ;;  %v3816_v61 = vld [vmem:[%s3728_s25 + $0x138] sm:$0xff] }
  0x25   : > { %441 = vmatpush.msra.mxu1 %v262_v17  ;;  %3377 = vmatpush.msra.mxu3 %v262_v17  ;;  %v224_v47 = vld [vmem:[%s3728_s25 + $0x8] sm:$0xff]  ;;  %v3071_v52 = vld [vmem:[%s5787_s1 + $0x1e0] sm:$0xff]  ;;  %v3069_v59 = vld [vmem:[%s5787_s1 + $0x1d0] sm:$0xff] }
  0x26   : > { %329 = vmatpush.msra.mxu0 %v3001_v18  ;;  %3362 = vmatpush.msra.mxu2 %v3001_v18  ;;  %v3783_v50 = vld [vmem:[%s3728_s25 + $0x128] sm:$0xff]  ;;  %v3799_v55 = vld [vmem:[%s3728_s25 + $0x19] sm:$0xff]  ;;  %v3017_v2 = vld [vmem:[%s5787_s1 + $0x130] sm:$0xff] }
  0x27   : > { %442 = vmatpush.msra.mxu1 %v261_v19  ;;  %3378 = vmatpush.msra.mxu3 %v261_v19  ;;  %v3020_v56 = vld [vmem:[%s5787_s1 + $0x148] sm:$0xff]  ;;  %v297_v57 = vld [vmem:[%s3728_s25 + $0x139] sm:$0xff]  ;;  %v3065_v8 = vld [vmem:[%s5787_s1 + $0x1b0] sm:$0xff] }
  0x28   : > { %330 = vmatpush.msra.mxu0 %v3000_v20  ;;  %3363 = vmatpush.msra.mxu2 %v3000_v20  ;;  %v3019_v60 = vld [vmem:[%s5787_s1 + $0x140] sm:$0xff]  ;;  %v3068_v62 = vld [vmem:[%s5787_s1 + $0x1c8] sm:$0xff]  ;;  %v3118_v63 = vld [vmem:[%s5787_s1 + $0x258] sm:$0xff] }
  0x29   : > { %443 = vmatpush.msra.mxu1 %v260_v21  ;;  %3379 = vmatpush.msra.mxu3 %v260_v21  ;;  %v3018_v0 = vld [vmem:[%s5787_s1 + $0x138] sm:$0xff]  ;;  %v3067_v1 = vld [vmem:[%s5787_s1 + $0x1c0] sm:$0xff]  ;;  %v3016_v7 = vld [vmem:[%s5787_s1 + $0x128] sm:$0xff] }
  0x2a   : > { %331 = vmatpush.msra.mxu0 %v2999_v22  ;;  %3364 = vmatpush.msra.mxu2 %v2999_v22  ;;  %v3836_v3 = vld [vmem:[%s3728_s25 + $0x21] sm:$0xff]  ;;  %v3066_v4 = vld [vmem:[%s5787_s1 + $0x1b8] sm:$0xff]  ;;  %v3117_v14 = vld [vmem:[%s5787_s1 + $0x250] sm:$0xff] }
  0x2b   : > { %444 = vmatpush.msra.mxu1 %v259_v23  ;;  %3380 = vmatpush.msra.mxu3 %v259_v23  ;;  %v298_v5 = vld [vmem:[%s3728_s25 + $0x141] sm:$0xff]  ;;  %v3014_v12 = vld [vmem:[%s5787_s1 + $0x118] sm:$0xff]  ;;  %v3013_v16 = vld [vmem:[%s5787_s1 + $0x110] sm:$0xff] }
  0x2c   : > { %332 = vmatpush.msra.mxu0 %v2998_v24  ;;  %3365 = vmatpush.msra.mxu2 %v2998_v24  ;;  %v3843_v6 = vld [vmem:[%s3728_s25 + $0x20] sm:$0xff]  ;;  %v3064_v11 = vld [vmem:[%s5787_s1 + $0x1a8] sm:$0xff]  ;;  %v3873_v15 = vld [vmem:[%s3728_s25 + $0x31] sm:$0xff] }
  0x2d   : > { %445 = vmatpush.msra.mxu1 %v258_v25  ;;  %3381 = vmatpush.msra.mxu3 %v258_v25  ;;  %v3853_v9 = vld [vmem:[%s3728_s25 + $0x140] sm:$0xff]  ;;  %v299_v17 = vld [vmem:[%s3728_s25 + $0x151] sm:$0xff]  ;;  %v3012_v20 = vld [vmem:[%s5787_s1 + $0x108] sm:$0xff] }
  0x2e   : > { %333 = vmatpush.msra.mxu0 %v2997_v26  ;;  %3366 = vmatpush.msra.mxu2 %v2997_v26  ;;  %v3015_v10 = vld [vmem:[%s5787_s1 + $0x120] sm:$0xff]  ;;  %v3880_v18 = vld [vmem:[%s3728_s25 + $0x30] sm:$0xff]  ;;  %v3062_v19 = vld [vmem:[%s5787_s1 + $0x198] sm:$0xff] }
  0x2f   : > { %446 = vmatpush.msra.mxu1 %v257_v27  ;;  %3382 = vmatpush.msra.mxu3 %v257_v27  ;;  %v3063_v13 = vld [vmem:[%s5787_s1 + $0x1a0] sm:$0xff]  ;;  %v251_v21 = vld [vmem:[%s3728_s25 + $0x150] sm:$0xff]  ;;  %v3060_v24 = vld [vmem:[%s5787_s1 + $0x188] sm:$0xff] }
  0x30   : > { %334 = vmatpush.msra.mxu0 %v2996_v28  ;;  %3367 = vmatpush.msra.mxu2 %v2996_v28  ;;  %v3061_v22 = vld [vmem:[%s5787_s1 + $0x190] sm:$0xff]  ;;  %v3011_v23 = vld [vmem:[%s5787_s1 + $0x100] sm:$0xff]  ;;  %v228_v28 = vld [vmem:[%s3728_s25 + $0x38] sm:$0xff] }
  0x31   : > { %447 = vmatpush.msra.mxu1 %v256_v29  ;;  %3383 = vmatpush.msra.mxu3 %v256_v29  ;;  %v3901_v25 = vld [vmem:[%s3728_s25 + $0x39] sm:$0xff] }
  0x32   : > { %335 = vmatpush.msra.mxu0 %v2995_v30  ;;  %3368 = vmatpush.msra.mxu2 %v2995_v30  ;;  %v3059_v26 = vld [vmem:[%s5787_s1 + $0x180] sm:$0xff]  ;;  %v3910_v29 = vld [vmem:[%s3728_s25 + $0x158] sm:$0xff]  ;;  %v3116_v30 = vld [vmem:[%s5787_s1 + $0x248] sm:$0xff] }
  0x33   : > { %448 = vmatpush.msra.mxu1 %v255_v31  ;;  %336 = vmatmul.f32.vlgmr.msra.gmra.mxu0 %v271_v32  ;;  %v300_v27 = vld [vmem:[%s3728_s25 + $0x159] sm:$0xff]  ;;  %v301_v32 = vld [vmem:[%s3728_s25 + $0x169] sm:$0xff] }
  0x34   : > { %408 = vmatmul.f32.vlgmr.msra.gmra.mxu2 %v295_v33  ;;  %449 = vmatmul.f32.vlgmr.msra.gmra.mxu1 %v223_v34  ;;  %v229_v33 = vld [vmem:[%s3728_s25 + $0x48] sm:$0xff] }
  0x35   : > { %984 = vmatpush.msrb.mxu0 %v3122_v35  ;;  %3384 = vmatpush.msra.mxu3 %v255_v31  ;;  %v3917_v31 = vld [vmem:[%s3728_s25 + $0x49] sm:$0xff]  ;;  %v3115_v35 = vld [vmem:[%s5787_s1 + $0x240] sm:$0xff] }
  0x36   : > { %521 = vmatmul.f32.vlgmr.msra.gmra.mxu3 %v3746_v36  ;;  %595 = vmatpush.msrb.mxu2 %v3026_v38  ;;  %v3923_v34 = vld [vmem:[%s3728_s25 + $0x168] sm:$0xff]  ;;  %v302_v38 = vld [vmem:[%s3728_s25 + $0x171] sm:$0xff] }
  0x37   : > { %985 = vmatpush.msrb.mxu0 %v3121_v37  ;;  %790 = vmatpush.msrb.mxu3 %v3074_v41  ;;  %v3930_v37 = vld [vmem:[%s3728_s25 + $0x51] sm:$0xff]  ;;  %v3940_v41 = vld [vmem:[%s3728_s25 + $0x61] sm:$0xff] }
  0x38   : > { %596 = vmatpush.msrb.mxu2 %v3025_v40  ;;  %v3936_v40 = vld [vmem:[%s3728_s25 + $0x170] sm:$0xff] }
  0x39   : > { %986 = vmatpush.msrb.mxu0 %v3120_v39  ;;  %791 = vmatpush.msrb.mxu3 %v3073_v43  ;;  %v230_v39 = vld [vmem:[%s3728_s25 + $0x50] sm:$0xff]  ;;  %v546_v43 = vld [vmem:[%s3728_s25 + $0x2] sm:$0xff] }
  0x3a   : > { %597 = vmatpush.msrb.mxu2 %v3024_v42  ;;  %v231_v42 = vld [vmem:[%s3728_s25 + $0x60] sm:$0xff] }
  0x3b   : > { %339 = vmatmul.f32.gmra.mxu0 %v272_v44  ;;  %792 = vmatpush.msrb.mxu3 %v3072_v45  ;;  %v3114_v44 = vld [vmem:[%s5787_s1 + $0x238] sm:$0xff]  ;;  %v3950_v45 = vld [vmem:[%s3728_s25 + $0x69] sm:$0xff] }
  0x3c   : > { %411 = vmatmul.f32.gmra.mxu2 %v296_v46  ;;  %452 = vmatmul.f32.gmra.mxu1 %v224_v47  ;;  %v232_v46 = vld [vmem:[%s3728_s25 + $0x68] sm:$0xff] }
  0x3d   : > { %987 = vmatpush.msrb.mxu0 %v3119_v48  ;;  %598 = vmatpush.msrb.mxu2 %v3023_v49  ;;  %v547_v47 = vld [vmem:[%s3728_s25 + $0xa] sm:$0xff]  ;;  %v3960_v49 = vld [vmem:[%s3728_s25 + $0x79] sm:$0xff] }
  0x3e   : > { %524 = vmatmul.f32.gmra.mxu3 %v3783_v50  ;;  %v3113_v48 = vld [vmem:[%s5787_s1 + $0x230] sm:$0xff] }
  0x3f   : > { %599 = vmatpush.msrb.mxu2 %v3022_v51  ;;  %793 = vmatpush.msrb.mxu3 %v3071_v52  ;;  %v233_v51 = vld [vmem:[%s3728_s25 + $0x78] sm:$0xff] }
  0x40   : > { %988 = vmatpush.msrb.mxu0 %v3118_v63  ;;  %v3964_v52 = vld [vmem:[%s3728_s25 + $0x1a] sm:$0xff] }
  0x41   : > { %600 = vmatpush.msrb.mxu2 %v3021_v53  ;;  %794 = vmatpush.msrb.mxu3 %v3070_v54  ;;  %v3970_v53 = vld [vmem:[%s3728_s25 + $0x81] sm:$0xff]  ;;  %v4000_v63 = vld [vmem:[%s3728_s25 + $0x99] sm:$0xff] }
  0x42   : > { %989 = vmatpush.msrb.mxu0 %v3117_v14  ;;  %v3973_v54 = vld [vmem:[%s3728_s25 + $0x80] sm:$0xff] }
  0x43   : > { %342 = vmatmul.f32.gmra.mxu0 %v3799_v55  ;;  %601 = vmatpush.msrb.mxu2 %v3020_v56  ;;  %v3976_v56 = vld [vmem:[%s3728_s25 + $0x22] sm:$0xff] }
  0x44   : > { %414 = vmatmul.f32.gmra.mxu2 %v297_v57  ;;  %455 = vmatmul.f32.gmra.mxu1 %v3806_v58  ;;  %v3112_v57 = vld [vmem:[%s5787_s1 + $0x228] sm:$0xff]  ;;  %v4047_v14 = vld [vmem:[%s3728_s25 + $0xc0] sm:$0xff] }
  0x45   : > { %795 = vmatpush.msrb.mxu3 %v3069_v59  ;;  %602 = vmatpush.msrb.mxu2 %v3019_v60  ;;  %v3988_v59 = vld [vmem:[%s3728_s25 + $0x90] sm:$0xff] }
  0x46   : > { %527 = vmatmul.f32.gmra.mxu3 %v3816_v61  ;;  %990 = vmatpush.msrb.mxu0 %v3116_v30  ;;  %v3991_v60 = vld [vmem:[%s3728_s25 + $0x32] sm:$0xff]  ;;  %v3108_v30 = vld [vmem:[%s5787_s1 + $0x208] sm:$0xff] }
  0x47   : > { %796 = vmatpush.msrb.mxu3 %v3068_v62  ;;  %603 = vmatpush.msrb.mxu2 %v3018_v0  ;;  %v3111_v62 = vld [vmem:[%s5787_s1 + $0x220] sm:$0xff]  ;;  %v4003_v0 = vld [vmem:[%s3728_s25 + $0x98] sm:$0xff] }
  0x48   : > { %991 = vmatpush.msrb.mxu0 %v3115_v35 }
  0x49   : > { %797 = vmatpush.msrb.mxu3 %v3067_v1  ;;  %604 = vmatpush.msrb.mxu2 %v3017_v2  ;;  %v4006_v1 = vld [vmem:[%s3728_s25 + $0x3a] sm:$0xff]  ;;  %v4012_v2 = vld [vmem:[%s3728_s25 + $0xa9] sm:$0xff] }
  0x4a   : > { %992 = vmatpush.msrb.mxu0 %v3114_v44  ;;  %v4101_v44 = vld [vmem:[%s3728_s25 + $0xd8] sm:$0xff] }
  0x4b   : > { %345 = vmatmul.f32.gmra.mxu0 %v3836_v3  ;;  %798 = vmatpush.msrb.mxu3 %v3066_v4  ;;  %v4015_v4 = vld [vmem:[%s3728_s25 + $0xa8] sm:$0xff] }
  0x4c   : > { %417 = vmatmul.f32.gmra.mxu2 %v298_v5  ;;  %458 = vmatmul.f32.gmra.mxu1 %v3843_v6  ;;  %v4018_v5 = vld [vmem:[%s3728_s25 + $0x4a] sm:$0xff] }
  0x4d   : > { %605 = vmatpush.msrb.mxu2 %v3016_v7  ;;  %799 = vmatpush.msrb.mxu3 %v3065_v8  ;;  %v4027_v7 = vld [vmem:[%s3728_s25 + $0xb1] sm:$0xff] }
  0x4e   : > { %530 = vmatmul.f32.gmra.mxu3 %v3853_v9  ;;  %993 = vmatpush.msrb.mxu0 %v3113_v48  ;;  %v4030_v8 = vld [vmem:[%s3728_s25 + $0xb0] sm:$0xff] }
  0x4f   : > { %606 = vmatpush.msrb.mxu2 %v3015_v10  ;;  %800 = vmatpush.msrb.mxu3 %v3064_v11  ;;  %v4033_v10 = vld [vmem:[%s3728_s25 + $0x52] sm:$0xff] }
  0x50   : > { %994 = vmatpush.msrb.mxu0 %v3112_v57  ;;  %v3109_v11 = vld [vmem:[%s5787_s1 + $0x210] sm:$0xff]  ;;  %v3162_v57 = vld [vmem:[%s5787_s1 + $0x2b8] sm:$0xff] }
  0x51   : > { %607 = vmatpush.msrb.mxu2 %v3014_v12  ;;  %801 = vmatpush.msrb.mxu3 %v3063_v13  ;;  %v4044_v13 = vld [vmem:[%s3728_s25 + $0xc1] sm:$0xff] }
  0x52   : > { %995 = vmatpush.msrb.mxu0 %v3111_v62  ;;  %5804 = vst [vmem:[#allocation5_spill] sm:$0xff] %v4044_v13 }
  0x53   : > { %348 = vmatmul.f32.gmra.mxu0 %v3873_v15  ;;  %608 = vmatpush.msrb.mxu2 %v3013_v16  ;;  %v4050_v16 = vld [vmem:[%s3728_s25 + $0x62] sm:$0xff] }
  0x54   : > { %420 = vmatmul.f32.gmra.mxu2 %v299_v17  ;;  %461 = vmatmul.f32.gmra.mxu1 %v3880_v18  ;;  %v3170_v17 = vld [vmem:[%s5787_s1 + $0x2f8] sm:$0xff] }
  0x55   : > { %802 = vmatpush.msrb.mxu3 %v3062_v19  ;;  %609 = vmatpush.msrb.mxu2 %v3012_v20 }
  0x56   : > { %533 = vmatmul.f32.gmra.mxu3 %v251_v21  ;;  %1178 = vmatpush.msrb.mxu1 %v3170_v17  ;;  %v4063_v21 = vld [vmem:[%s3728_s25 + $0xc9] sm:$0xff]  ;;  %v4129_v17 = vld [vmem:[%s3728_s25 + $0xe1] sm:$0xff] }
  0x57   : > { %803 = vmatpush.msrb.mxu3 %v3061_v22  ;;  %610 = vmatpush.msrb.mxu2 %v3011_v23  ;;  %5805 = vst [vmem:[#allocation6_spill] sm:$0xff] %v4063_v21  ;;  %v3169_v22 = vld [vmem:[%s5787_s1 + $0x2f0] sm:$0xff] }
  0x58   : > { %1179 = vmatpush.msrb.mxu1 %v3169_v22  ;;  %5809 = vst [vmem:[#allocation10_spill] sm:$0xff] %v4129_v17  ;;  %v4135_v22 = vld [vmem:[%s3728_s25 + $0xe0] sm:$0xff] }
  0x59   : > { %804 = vmatpush.msrb.mxu3 %v3060_v24  ;;  %v4069_v24 = vld [vmem:[%s3728_s25 + $0xc8] sm:$0xff] }
  0x5b   : > { %351 = vmatmul.f32.gmra.mxu0 %v3901_v25  ;;  %805 = vmatpush.msrb.mxu3 %v3059_v26  ;;  %v4072_v26 = vld [vmem:[%s3728_s25 + $0x6a] sm:$0xff] }
  0x5c   : > { %423 = vmatmul.f32.gmra.mxu2 %v300_v27  ;;  %464 = vmatmul.f32.gmra.mxu1 %v228_v28 }
  0x5e   : > { %536 = vmatmul.f32.gmra.mxu3 %v3910_v29 }
  0x63   : > { %354 = vmatmul.f32.gmra.mxu0 %v3917_v31 }
  0x64   : > { %426 = vmatmul.f32.gmra.mxu2 %v301_v32  ;;  %467 = vmatmul.f32.gmra.mxu1 %v229_v33  ;;  %v3167_v32 = vld [vmem:[%s5787_s1 + $0x2e0] sm:$0xff] }
  0x66   : > { %539 = vmatmul.f32.gmra.mxu3 %v3923_v34 }
  0x6b   : > { %357 = vmatmul.f32.gmra.mxu0 %v3930_v37 }
  0x6c   : > { %429 = vmatmul.f32.gmra.mxu2 %v302_v38  ;;  %470 = vmatmul.f32.gmra.mxu1 %v230_v39 }
  0x6e   : > { %542 = vmatmul.f32.gmra.mxu3 %v3936_v40 }
  0x73   : > { %360 = vmatmul.f32.gmra.mxu0 %v3940_v41 }
  0x74   : > { %473 = vmatmul.f32.gmra.mxu1 %v231_v42  ;;  %611 = vmatmul.f32.vlgmr.msrb.gmra.mxu2 %v546_v43 }
  0x76   : > { %806 = vmatmul.f32.vlgmr.msrb.gmra.mxu3 %v3806_v58  ;;  %v3985_v58 = vld [vmem:[%s3728_s25 + $0x91] sm:$0xff] }
  0x7b   : > { %363 = vmatmul.f32.gmra.mxu0 %v3950_v45 }
  0x7c   : > { %476 = vmatmul.f32.gmra.mxu1 %v232_v46  ;;  %614 = vmatmul.f32.gmra.mxu2 %v547_v47 }
  0x7e   : > { %809 = vmatmul.f32.gmra.mxu3 %v3843_v6  ;;  %v3110_v6 = vld [vmem:[%s5787_s1 + $0x218] sm:$0xff] }
  0x7f   : > { %996 = vmatpush.msrb.mxu0 %v3110_v6  ;;  %v3107_v6 = vld [vmem:[%s5787_s1 + $0x200] sm:$0xff] }
  0x81   : > { %997 = vmatpush.msrb.mxu0 %v3109_v11 }
  0x83   : > { %366 = vmatmul.f32.gmra.mxu0 %v3960_v49 }
  0x84   : > { %479 = vmatmul.f32.gmra.mxu1 %v233_v51  ;;  %617 = vmatmul.f32.gmra.mxu2 %v3964_v52 }
  0x85   : > { %998 = vmatpush.msrb.mxu0 %v3108_v30  ;;  %v3218_v30 = vld [vmem:[%s5787_s1 + $0x378] sm:$0xff] }
  0x86   : > { %812 = vmatmul.f32.gmra.mxu3 %v3880_v18  ;;  %1373 = vmatpush.msra.mxu2 %v3218_v30  ;;  %v3156_v30 = vld [vmem:[%s5787_s1 + $0x288] sm:$0xff] }
  0x87   : > { %999 = vmatpush.msrb.mxu0 %v3107_v6 }
  0x8b   : > { %369 = vmatmul.f32.gmra.mxu0 %v3970_v53 }
  0x8c   : > { %482 = vmatmul.f32.gmra.mxu1 %v3973_v54  ;;  %620 = vmatmul.f32.gmra.mxu2 %v3976_v56 }
  0x8e   : > { %815 = vmatmul.f32.gmra.mxu3 %v228_v28  ;;  %v3168_v28 = vld [vmem:[%s5787_s1 + $0x2e8] sm:$0xff] }
  0x8f   : > { %1180 = vmatpush.msrb.mxu1 %v3168_v28 }
  0x91   : > { %1181 = vmatpush.msrb.mxu1 %v3167_v32  ;;  %v3160_v32 = vld [vmem:[%s5787_s1 + $0x2a8] sm:$0xff] }
  0x93   : > { %372 = vmatmul.f32.gmra.mxu0 %v3985_v58 }
  0x94   : > { %485 = vmatmul.f32.gmra.mxu1 %v3988_v59  ;;  %623 = vmatmul.f32.gmra.mxu2 %v3991_v60 }
  0x96   : > { %818 = vmatmul.f32.gmra.mxu3 %v229_v33  ;;  %v3166_v33 = vld [vmem:[%s5787_s1 + $0x2d8] sm:$0xff] }
  0x97   : > { %1182 = vmatpush.msrb.mxu1 %v3166_v33 }
  0x9b   : > { %375 = vmatmul.f32.gmra.mxu0 %v4000_v63 }
  0x9c   : > { %488 = vmatmul.f32.gmra.mxu1 %v4003_v0  ;;  %626 = vmatmul.f32.gmra.mxu2 %v4006_v1 }
  0x9e   : > { %821 = vmatmul.f32.gmra.mxu3 %v230_v39  ;;  %v4095_v39 = vld [vmem:[%s3728_s25 + $0xd9] sm:$0xff] }
  0x9f   : > { %5807 = vst [vmem:[#allocation8_spill] sm:$0xff] %v4095_v39 }
  0xa3   : > { %378 = vmatmul.f32.gmra.mxu0 %v4012_v2 }
  0xa4   : > { %491 = vmatmul.f32.gmra.mxu1 %v4015_v4  ;;  %629 = vmatmul.f32.gmra.mxu2 %v4018_v5 }
  0xa6   : > { %824 = vmatmul.f32.gmra.mxu3 %v231_v42  ;;  %v3165_v42 = vld [vmem:[%s5787_s1 + $0x2d0] sm:$0xff] }
  0xa7   : > { %1183 = vmatpush.msrb.mxu1 %v3165_v42  ;;  %v3159_v42 = vld [vmem:[%s5787_s1 + $0x2a0] sm:$0xff] }
  0xab   : > { %381 = vmatmul.f32.gmra.mxu0 %v4027_v7 }
  0xac   : > { %494 = vmatmul.f32.gmra.mxu1 %v4030_v8  ;;  %632 = vmatmul.f32.gmra.mxu2 %v4033_v10 }
  0xae   : > { %827 = vmatmul.f32.gmra.mxu3 %v232_v46  ;;  %v4104_v46 = vld [vmem:[%s3728_s25 + $0x7a] sm:$0xff] }
  0xb0   : > { %v4041_v12 = vpop.f32.mrf.mxu0 }
  0xb1   : > { %v4058_v19 = vpop.f32.mrf.mxu1 }
  0xb3   : > { %384 = vmatmul.f32.gmra.mxu0 %v4044_v13  ;;  %v4285_v13 = vld [vmem:[%s3728_s25 + $0xca] sm:$0xff] }
  0xb4   : > { %497 = vmatmul.f32.gmra.mxu1 %v4047_v14  ;;  %635 = vmatmul.f32.gmra.mxu2 %v4050_v16 }
  0xb6   : > { %830 = vmatmul.f32.gmra.mxu3 %v233_v51  ;;  %v3164_v51 = vld [vmem:[%s5787_s1 + $0x2c8] sm:$0xff] }
  0xb7   : > { %v409_v18 = vpop.f32.mrf.mxu2  ;;  %1184 = vmatpush.msrb.mxu1 %v3164_v51 }
  0xb8   : > { %v4060_v20 = vpop.f32.mrf.mxu0 }
  0xb9   : > { %v522_v23 = vpop.f32.mrf.mxu3  ;;  %v4106_v47 = vpop.f32.mrf.mxu1 }
  0xba   : > { %v4074_v27 = vadd.f32 %v522_v23, %v409_v18  ;;  %v3161_v18 = vld [vmem:[%s5787_s1 + $0x2b0] sm:$0xff]  ;;  %v4138_v23 = vld [vmem:[%s3728_s25 + $0x82] sm:$0xff] }
  0xbb   : > { %387 = vmatmul.f32.gmra.mxu0 %v4063_v21  ;;  %v4267_v21 = vld [vmem:[%s3728_s25 + $0xc2] sm:$0xff] }
  0xbc   : > { %5806 = vst [vmem:[#allocation7_spill] sm:$0xff] %v4074_v27  ;;  %500 = vmatmul.f32.gmra.mxu1 %v4069_v24  ;;  %638 = vmatmul.f32.gmra.mxu2 %v4072_v26  ;;  %v4228_v27 = vld [vmem:[%s3728_s25 + $0xaa] sm:$0xff] }
  0xbd   : > { %5819 = vst [vmem:[#allocation20_spill] sm:$0xff] %v4267_v21 }
  0xbe   : > { %833 = vmatmul.f32.gmra.mxu3 %v3973_v54  ;;  %v3163_v54 = vld [vmem:[%s5787_s1 + $0x2c0] sm:$0xff] }
  0xbf   : > { %v412_v35 = vpop.f32.mrf.mxu2  ;;  %1185 = vmatpush.msrb.mxu1 %v3163_v54 }
  0xc0   : > { %v4092_v38 = vpop.f32.mrf.mxu0 }
  0xc1   : > { %v525_v43 = vpop.f32.mrf.mxu3  ;;  %1186 = vmatpush.msrb.mxu1 %v3162_v57  ;;  %v4149_v33 = vpop.f32.mrf.mxu1  ;;  %v4166_v57 = vld [vmem:[%s3728_s25 + $0xf1] sm:$0xff] }
  0xc2   : > { %v4108_v48 = vadd.f32 %v525_v43, %v412_v35  ;;  %v3266_v35 = vld [vmem:[%s5787_s1 + $0x3f8] sm:$0xff]  ;;  %5811 = vst [vmem:[#allocation12_spill] sm:$0xff] %v4166_v57 }
  0xc3   : > { %390 = vmatmul.f32.gmra.mxu0 %v4095_v39  ;;  %1187 = vmatpush.msrb.mxu1 %v3161_v18  ;;  %v3158_v43 = vld [vmem:[%s5787_s1 + $0x298] sm:$0xff]  ;;  %v4172_v18 = vld [vmem:[%s3728_s25 + $0xf0] sm:$0xff] }
  0xc4   : > { %5808 = vst [vmem:[#allocation9_spill] sm:$0xff] %v4108_v48  ;;  %503 = vmatmul.f32.gmra.mxu1 %v4101_v44  ;;  %641 = vmatmul.f32.gmra.mxu2 %v4104_v46  ;;  %v4225_v48 = vld [vmem:[%s3728_s25 + $0x108] sm:$0xff] }
  0xc5   : > { %1188 = vmatpush.msrb.mxu1 %v3160_v32  ;;  %1567 = vmatpush.msra.mxu3 %v3266_v35  ;;  %v3314_v32 = vld [vmem:[%s5787_s1 + $0x478] sm:$0xff]  ;;  %v3155_v35 = vld [vmem:[%s5787_s1 + $0x280] sm:$0xff] }
  0xc6   : > { %836 = vmatmul.f32.gmra.mxu3 %v3988_v59  ;;  %1761 = vmatpush.msra.mxu0 %v3314_v32  ;;  %v3265_v32 = vld [vmem:[%s5787_s1 + $0x3f0] sm:$0xff] }
  0xc7   : > { %v415_v62 = vpop.f32.mrf.mxu2  ;;  %1189 = vmatpush.msrb.mxu1 %v3159_v42  ;;  %1568 = vmatpush.msra.mxu3 %v3265_v32 }
  0xc8   : > { %v4126_v11 = vpop.f32.mrf.mxu0 }
  0xc9   : > { %v528_v59 = vpop.f32.mrf.mxu3  ;;  %1190 = vmatpush.msrb.mxu1 %v3158_v43  ;;  %v4191_v42 = vpop.f32.mrf.mxu1 }
  0xca   : > { %v4140_v28 = vadd.f32 %v528_v59, %v415_v62  ;;  %v3157_v62 = vld [vmem:[%s5787_s1 + $0x290] sm:$0xff] }
  0xcb   : > { %393 = vmatmul.f32.gmra.mxu0 %v4129_v17  ;;  %v4175_v59 = vld [vmem:[%s3728_s25 + $0x92] sm:$0xff]  ;;  %1191 = vmatpush.msrb.mxu1 %v3157_v62 }
  0xcc   : > { %5810 = vst [vmem:[#allocation11_spill] sm:$0xff] %v4140_v28  ;;  %506 = vmatmul.f32.gmra.mxu1 %v4135_v22  ;;  %644 = vmatmul.f32.gmra.mxu2 %v4138_v23  ;;  %v4197_v62 = vld [vmem:[%s3728_s25 + $0xf9] sm:$0xff]  ;;  %v4242_v17 = vld [vmem:[%s3728_s25 + $0x111] sm:$0xff] }
  0xcd   : > { %1192 = vmatpush.msrb.mxu1 %v3156_v30  ;;  %5813 = vst [vmem:[#allocation14_spill] sm:$0xff] %v4197_v62  ;;  %v4203_v28 = vld [vmem:[%s3728_s25 + $0x9a] sm:$0xff] }
  0xce   : > { %839 = vmatmul.f32.gmra.mxu3 %v4003_v0  ;;  %5817 = vst [vmem:[#allocation18_spill] sm:$0xff] %v4242_v17 }
  0xcf   : > { %v418_v51 = vpop.f32.mrf.mxu2  ;;  %1193 = vmatpush.msrb.mxu1 %v3155_v35 }
  0xd0   : > { %v4163_v54 = vpop.f32.mrf.mxu0 }
  0xd1   : > { %v531_v6 = vpop.f32.mrf.mxu3 }
  0xd2   : > { %v4177_v0 = vadd.f32 %v531_v6, %v418_v51 }
  0xd3   : > { %396 = vmatmul.f32.gmra.mxu0 %v4166_v57 }
  0xd4   : > { %5812 = vst [vmem:[#allocation13_spill] sm:$0xff] %v4177_v0  ;;  %509 = vmatmul.f32.gmra.mxu1 %v4172_v18  ;;  %647 = vmatmul.f32.gmra.mxu2 %v4175_v59  ;;  %v4200_v0 = vld [vmem:[%s3728_s25 + $0xf8] sm:$0xff] }
  0xd6   : > { %842 = vmatmul.f32.gmra.mxu3 %v4015_v4  ;;  %v3217_v4 = vld [vmem:[%s5787_s1 + $0x370] sm:$0xff] }
  0xd7   : > { %v421_v43 = vpop.f32.mrf.mxu2  ;;  %1374 = vmatpush.msra.mxu2 %v3217_v4 }
  0xd8   : > { %v4194_v51 = vpop.f32.mrf.mxu0 }
  0xd9   : > { %v534_v6 = vpop.f32.mrf.mxu3 }
  0xda   : > { %v4205_v30 = vadd.f32 %v534_v6, %v421_v43  ;;  %v4217_v43 = vpop.f32.mrf.mxu1 }
  0xdb   : > { %399 = vmatmul.f32.gmra.mxu0 %v4197_v62 }
  0xdc   : > { %5814 = vst [vmem:[#allocation15_spill] sm:$0xff] %v4205_v30  ;;  %512 = vmatmul.f32.gmra.mxu1 %v4200_v0  ;;  %650 = vmatmul.f32.gmra.mxu2 %v4203_v28  ;;  %v4222_v30 = vld [vmem:[%s3728_s25 + $0x109] sm:$0xff] }
  0xdd   : > { %5815 = vst [vmem:[#allocation16_spill] sm:$0xff] %v4222_v30 }
  0xde   : > { %845 = vmatmul.f32.gmra.mxu3 %v4030_v8  ;;  %v3313_v8 = vld [vmem:[%s5787_s1 + $0x470] sm:$0xff] }
  0xdf   : > { %v424_v35 = vpop.f32.mrf.mxu2  ;;  %1762 = vmatpush.msra.mxu0 %v3313_v8  ;;  %v3216_v8 = vld [vmem:[%s5787_s1 + $0x368] sm:$0xff] }
  0xe0   : > { %v4219_v6 = vpop.f32.mrf.mxu0  ;;  %1375 = vmatpush.msra.mxu2 %v3216_v8 }
  0xe1   : > { %v537_v4 = vpop.f32.mrf.mxu3 }
  0xe2   : > { %v4230_v62 = vadd.f32 %v537_v4, %v424_v35  ;;  %v4245_v4 = vld [vmem:[%s3728_s25 + $0x110] sm:$0xff] }
  0xe3   : > { %402 = vmatmul.f32.gmra.mxu0 %v4222_v30  ;;  %v4250_v30 = vpop.f32.mrf.mxu1 }
  0xe4   : > { %5816 = vst [vmem:[#allocation17_spill] sm:$0xff] %v4230_v62  ;;  %515 = vmatmul.f32.gmra.mxu1 %v4225_v48  ;;  %653 = vmatmul.f32.gmra.mxu2 %v4228_v27  ;;  %v4248_v62 = vld [vmem:[%s3728_s25 + $0xb2] sm:$0xff] }
  0xe6   : > { %848 = vmatmul.f32.gmra.mxu3 %v4047_v14  ;;  %v3264_v14 = vld [vmem:[%s5787_s1 + $0x3e8] sm:$0xff] }
  0xe7   : > { %v427_v32 = vpop.f32.mrf.mxu2  ;;  %1569 = vmatpush.msra.mxu3 %v3264_v14  ;;  %v451_v14 = vadd.f32 %v4058_v19, %v4041_v12  ;;  %v3263_v12 = vld [vmem:[%s5787_s1 + $0x3e0] sm:$0xff]  ;;  %v454_v19 = vadd.f32 %v4106_v47, %v4060_v20  ;;  %v457_v47 = vadd.f32 %v4149_v33, %v4092_v38  ;;  %v3262_v38 = vld [vmem:[%s5787_s1 + $0x3d8] sm:$0xff]  ;;  %v460_v33 = vadd.f32 %v4191_v42, %v4126_v11 }
  0xe8   : > { %v4239_v57 = vpop.f32.mrf.mxu0  ;;  %v3311_v20 = vld [vmem:[%s5787_s1 + $0x460] sm:$0xff]  ;;  %v3310_v11 = vld [vmem:[%s5787_s1 + $0x458] sm:$0xff] }
  0xe9   : > { %v540_v35 = vpop.f32.mrf.mxu3  ;;  %1570 = vmatpush.msra.mxu3 %v3263_v12 }
  0xea   : > { %v4252_v39 = vadd.f32 %v540_v35, %v427_v32 }
  0xeb   : > { %405 = vmatmul.f32.gmra.mxu0 %v4242_v17  ;;  %v4272_v8 = vpop.f32.mrf.mxu1  ;;  %1571 = vmatpush.msra.mxu3 %v3262_v38 }
  0xec   : > { %5818 = vst [vmem:[#allocation19_spill] sm:$0xff] %v4252_v39  ;;  %518 = vmatmul.f32.gmra.mxu1 %v4245_v4  ;;  %656 = vmatmul.f32.gmra.mxu2 %v4248_v62 }
  0xee   : > { %851 = vmatmul.f32.gmra.mxu3 %v4069_v24  ;;  %v3312_v24 = vld [vmem:[%s5787_s1 + $0x468] sm:$0xff] }
  0xef   : > { %v430_v32 = vpop.f32.mrf.mxu2  ;;  %1763 = vmatpush.msra.mxu0 %v3312_v24 }
  0xf0   : > { %v4264_v35 = vpop.f32.mrf.mxu0 }
  0xf1   : > { %v543_v39 = vpop.f32.mrf.mxu3  ;;  %1764 = vmatpush.msra.mxu0 %v3311_v20  ;;  %v4343_v20 = vld [vmem:[%s3728_s25 + $0xf2] sm:$0xff] }
  0xf2   : > { %v4269_v17 = vadd.f32 %v543_v39, %v430_v32 }
  0xf3   : > { %1000 = vmatmul.f32.vlgmr.msrb.gmra.mxu0 %v3799_v55 }
  0xf4   : > { %5820 = vst [vmem:[#allocation21_spill] sm:$0xff] %v4269_v17  ;;  %659 = vmatmul.f32.gmra.mxu2 %v4267_v21  ;;  %1194 = vmatmul.f32.vlgmr.msrb.gmra.mxu1 %v3964_v52  ;;  %v3215_v52 = vld [vmem:[%s5787_s1 + $0x360] sm:$0xff] }
  0xf5   : > { %1376 = vmatpush.msra.mxu2 %v3215_v52  ;;  %1765 = vmatpush.msra.mxu0 %v3310_v11 }
  0xf6   : > { %854 = vmatmul.f32.gmra.mxu3 %v4101_v44  ;;  %v4300_v44 = vpop.f32.mrf.mxu1 }
  0xf7   : > { %v612_v39 = vpop.f32.mrf.mxu2 }
  0xf8   : > { %v708_v32 = vadd.f32 %v612_v39, %v451_v14  ;;  %v4282_v17 = vpop.f32.mrf.mxu0 }
  0xf9   : > { %v807_v55 = vpop.f32.mrf.mxu3 }
  0xfa   : > { %v4287_v21 = vadd.f32 %v807_v55, %v708_v32  ;;  %v4306_v32 = vld [vmem:[%s3728_s25 + $0xda] sm:$0xff] }
  0xfb   : > { %1003 = vmatmul.f32.gmra.mxu0 %v3836_v3 }
  0xfc   : > { %662 = vmatmul.f32.gmra.mxu2 %v4285_v13  ;;  %1197 = vmatmul.f32.gmra.mxu1 %v3976_v56 }
  0xfe   : > { %857 = vmatmul.f32.gmra.mxu3 %v4135_v22  ;;  %v4319_v55 = vpop.f32.mrf.mxu1 }
  0xff   : > { %v615_v24 = vpop.f32.mrf.mxu2 }
 0x100   : > { %v709_v14 = vadd.f32 %v615_v24, %v454_v19  ;;  %v4303_v3 = vpop.f32.mrf.mxu0  ;;  %v4324_v19 = vld [vmem:[%s3728_s25 + $0xe2] sm:$0xff]  ;;  %v3214_v24 = vld [vmem:[%s5787_s1 + $0x358] sm:$0xff] }
 0x101   : > { %v810_v39 = vpop.f32.mrf.mxu3  ;;  %1377 = vmatpush.msra.mxu2 %v3214_v24 }
 0x102   : > { %v4308_v56 = vadd.f32 %v810_v39, %v709_v14 }
 0x103   : > { %1006 = vmatmul.f32.gmra.mxu0 %v3873_v15 }
 0x104   : > { %665 = vmatmul.f32.gmra.mxu2 %v4306_v32  ;;  %1200 = vmatmul.f32.gmra.mxu1 %v3991_v60 }
 0x106   : > { %860 = vmatmul.f32.gmra.mxu3 %v4172_v18 }
 0x107   : > { %v618_v22 = vpop.f32.mrf.mxu2 }
 0x108   : > { %v710_v52 = vadd.f32 %v618_v22, %v457_v47  ;;  %v4321_v12 = vpop.f32.mrf.mxu0  ;;  %v4345_v47 = vpop.f32.mrf.mxu1 }
 0x109   : > { %v813_v15 = vpop.f32.mrf.mxu3 }
 0x10a   : > { %v4326_v60 = vadd.f32 %v813_v15, %v710_v52 }
 0x10b   : > { %1009 = vmatmul.f32.gmra.mxu0 %v3901_v25 }
 0x10c   : > { %668 = vmatmul.f32.gmra.mxu2 %v4324_v19  ;;  %1203 = vmatmul.f32.gmra.mxu1 %v4006_v1 }
 0x10e   : > { %863 = vmatmul.f32.gmra.mxu3 %v4200_v0  ;;  %v463_v0 = vadd.f32 %v4217_v43, %v4163_v54  ;;  %v466_v43 = vadd.f32 %v4250_v30, %v4194_v51  ;;  %v469_v51 = vadd.f32 %v4272_v8, %v4219_v6  ;;  %v472_v6 = vadd.f32 %v4300_v44, %v4239_v57 }
 0x10f   : > { %v621_v18 = vpop.f32.mrf.mxu2  ;;  %v475_v57 = vadd.f32 %v4319_v55, %v4264_v35  ;;  %v478_v35 = vadd.f32 %v4345_v47, %v4282_v17  ;;  %v3210_v17 = vld [vmem:[%s5787_s1 + $0x338] sm:$0xff]  ;;  %v3209_v47 = vld [vmem:[%s5787_s1 + $0x330] sm:$0xff] }
 0x110   : > { %v711_v14 = vadd.f32 %v621_v18, %v460_v33  ;;  %v4340_v39 = vpop.f32.mrf.mxu0  ;;  %v4369_v54 = vpop.f32.mrf.mxu1 }
 0x111   : > { %v816_v25 = vpop.f32.mrf.mxu3 }
 0x112   : > { %v4347_v1 = vadd.f32 %v816_v25, %v711_v14  ;;  %v4382_v14 = vld [vmem:[%s3728_s25 + $0x10a] sm:$0xff] }
 0x113   : > { %1012 = vmatmul.f32.gmra.mxu0 %v3917_v31  ;;  %v4361_v31 = vld [vmem:[%s3728_s25 + $0xfa] sm:$0xff] }
 0x114   : > { %671 = vmatmul.f32.gmra.mxu2 %v4343_v20  ;;  %1206 = vmatmul.f32.gmra.mxu1 %v4018_v5  ;;  %v3213_v5 = vld [vmem:[%s5787_s1 + $0x350] sm:$0xff] }
 0x115   : > { %1378 = vmatpush.msra.mxu2 %v3213_v5 }
 0x116   : > { %866 = vmatmul.f32.gmra.mxu3 %v4225_v48  ;;  %v3261_v48 = vld [vmem:[%s5787_s1 + $0x3d0] sm:$0xff] }
 0x117   : > { %v624_v42 = vpop.f32.mrf.mxu2  ;;  %1572 = vmatpush.msra.mxu3 %v3261_v48 }
 0x118   : > { %v712_v22 = vadd.f32 %v624_v42, %v463_v0  ;;  %v4358_v52 = vpop.f32.mrf.mxu0  ;;  %v4394_v30 = vpop.f32.mrf.mxu1  ;;  %v4400_v42 = vld [vmem:[%s3728_s25 + $0x112] sm:$0xff] }
 0x119   : > { %v819_v15 = vpop.f32.mrf.mxu3 }
 0x11a   : > { %v4363_v24 = vadd.f32 %v819_v15, %v712_v22  ;;  %v3212_v22 = vld [vmem:[%s5787_s1 + $0x348] sm:$0xff] }
 0x11b   : > { %1015 = vmatmul.f32.gmra.mxu0 %v3930_v37  ;;  %1379 = vmatpush.msra.mxu2 %v3212_v22 }
 0x11c   : > { %674 = vmatmul.f32.gmra.mxu2 %v4361_v31  ;;  %1209 = vmatmul.f32.gmra.mxu1 %v4033_v10  ;;  %v3309_v10 = vld [vmem:[%s5787_s1 + $0x450] sm:$0xff] }
 0x11d   : > { %1766 = vmatpush.msra.mxu0 %v3309_v10 }
 0x11e   : > { %869 = vmatmul.f32.gmra.mxu3 %v4245_v4 }
 0x11f   : > { %v627_v38 = vpop.f32.mrf.mxu2 }
 0x120   : > { %v713_v33 = vadd.f32 %v627_v38, %v466_v43  ;;  %v4379_v37 = vpop.f32.mrf.mxu0  ;;  %v4416_v15 = vpop.f32.mrf.mxu1  ;;  %v4421_v43 = vld [vmem:[%s3728_s25 + $0x122] sm:$0xff] }
 0x121   : > { %v822_v18 = vpop.f32.mrf.mxu3 }
 0x122   : > { %v4384_v25 = vadd.f32 %v822_v18, %v713_v33 }
 0x123   : > { %1018 = vmatmul.f32.gmra.mxu0 %v3940_v41 }
 0x124   : > { %677 = vmatmul.f32.gmra.mxu2 %v4382_v14  ;;  %1212 = vmatmul.f32.gmra.mxu1 %v4050_v16 }
 0x126   : > { %872 = vmatmul.f32.gmra.mxu3 %v3746_v36  ;;  %v3260_v36 = vld [vmem:[%s5787_s1 + $0x3c8] sm:$0xff] }
 0x127   : > { %v630_v4 = vpop.f32.mrf.mxu2  ;;  %1573 = vmatpush.msra.mxu3 %v3260_v36 }
 0x128   : > { %v714_v11 = vadd.f32 %v630_v4, %v469_v51  ;;  %v4397_v0 = vpop.f32.mrf.mxu0  ;;  %v4439_v10 = vpop.f32.mrf.mxu1  ;;  %v3211_v51 = vld [vmem:[%s5787_s1 + $0x340] sm:$0xff] }
 0x129   : > { %v825_v41 = vpop.f32.mrf.mxu3  ;;  %1380 = vmatpush.msra.mxu2 %v3211_v51  ;;  %v3255_v51 = vld [vmem:[%s5787_s1 + $0x3a0] sm:$0xff] }
 0x12a   : > { %v4402_v16 = vadd.f32 %v825_v41, %v714_v11  ;;  %v4458_v41 = vld [vmem:[%s3728_s25 + $0x13a] sm:$0xff] }
 0x12b   : > { %1021 = vmatmul.f32.gmra.mxu0 %v3950_v45  ;;  %1381 = vmatpush.msra.mxu2 %v3210_v17  ;;  %v3203_v17 = vld [vmem:[%s5787_s1 + $0x300] sm:$0xff] }
 0x12c   : > { %680 = vmatmul.f32.gmra.mxu2 %v4400_v42  ;;  %1215 = vmatmul.f32.gmra.mxu1 %v4072_v26 }
 0x12d   : > { %1382 = vmatpush.msra.mxu2 %v3209_v47  ;;  %v3306_v47 = vld [vmem:[%s5787_s1 + $0x438] sm:$0xff] }
 0x12e   : > { %875 = vmatmul.f32.gmra.mxu3 %v3783_v50  ;;  %v3308_v50 = vld [vmem:[%s5787_s1 + $0x448] sm:$0xff] }
 0x12f   : > { %v633_v8 = vpop.f32.mrf.mxu2  ;;  %1767 = vmatpush.msra.mxu0 %v3308_v50  ;;  %v4491_v50 = vld [vmem:[%s3728_s25 + $0x142] sm:$0xff] }
 0x130   : > { %v715_v5 = vadd.f32 %v633_v8, %v472_v6  ;;  %v4418_v45 = vpop.f32.mrf.mxu0  ;;  %v4464_v36 = vpop.f32.mrf.mxu1 }
 0x131   : > { %v828_v48 = vpop.f32.mrf.mxu3 }
 0x132   : > { %v4423_v26 = vadd.f32 %v828_v48, %v715_v5  ;;  %v3208_v48 = vld [vmem:[%s5787_s1 + $0x328] sm:$0xff] }
 0x133   : > { %1024 = vmatmul.f32.gmra.mxu0 %v3960_v49  ;;  %v4437_v49 = vld [vmem:[%s3728_s25 + $0x12a] sm:$0xff]  ;;  %1383 = vmatpush.msra.mxu2 %v3208_v48 }
 0x134   : > { %683 = vmatmul.f32.gmra.mxu2 %v4421_v43  ;;  %1218 = vmatmul.f32.gmra.mxu1 %v4104_v46 }
 0x136   : > { %878 = vmatmul.f32.gmra.mxu3 %v3816_v61  ;;  %v3259_v61 = vld [vmem:[%s5787_s1 + $0x3c0] sm:$0xff] }
 0x137   : > { %v636_v44 = vpop.f32.mrf.mxu2  ;;  %1574 = vmatpush.msra.mxu3 %v3259_v61  ;;  %v484_v61 = vadd.f32 %v4394_v30, %v4321_v12  ;;  %v3204_v12 = vld [vmem:[%s5787_s1 + $0x308] sm:$0xff] }
 0x138   : > { %v716_v38 = vadd.f32 %v636_v44, %v475_v57  ;;  %v4434_v33 = vpop.f32.mrf.mxu0  ;;  %v3207_v44 = vld [vmem:[%s5787_s1 + $0x320] sm:$0xff] }
 0x139   : > { %v831_v18 = vpop.f32.mrf.mxu3  ;;  %1384 = vmatpush.msra.mxu2 %v3207_v44 }
 0x13a   : > { %v4441_v46 = vadd.f32 %v831_v18, %v716_v38  ;;  %v3256_v38 = vld [vmem:[%s5787_s1 + $0x3a8] sm:$0xff]  ;;  %v3206_v18 = vld [vmem:[%s5787_s1 + $0x318] sm:$0xff] }
 0x13b   : > { %1027 = vmatmul.f32.gmra.mxu0 %v3970_v53  ;;  %1385 = vmatpush.msra.mxu2 %v3206_v18 }
 0x13c   : > { %686 = vmatmul.f32.gmra.mxu2 %v4437_v49  ;;  %1221 = vmatmul.f32.gmra.mxu1 %v4138_v23  ;;  %v3053_v23 = vld [vmem:[%s3728_s25 + $0x150] sm:$0xff] }
 0x13e   : > { %881 = vmatmul.f32.gmra.mxu3 %v3853_v9  ;;  %v3307_v9 = vld [vmem:[%s5787_s1 + $0x440] sm:$0xff] }
 0x13f   : > { %v639_v55 = vpop.f32.mrf.mxu2  ;;  %1768 = vmatpush.msra.mxu0 %v3307_v9 }
 0x140   : > { %v717_v4 = vadd.f32 %v639_v55, %v478_v35  ;;  %v4455_v11 = vpop.f32.mrf.mxu0  ;;  %v3254_v35 = vld [vmem:[%s5787_s1 + $0x398] sm:$0xff] }
 0x141   : > { %v834_v53 = vpop.f32.mrf.mxu3  ;;  %1769 = vmatpush.msra.mxu0 %v3306_v47 }
 0x142   : > { %v4460_v22 = vadd.f32 %v834_v53, %v717_v4 }
 0x143   : > { %1030 = vmatmul.f32.gmra.mxu0 %v3985_v58  ;;  %v481_v58 = vadd.f32 %v4369_v54, %v4303_v3  ;;  %v3257_v3 = vld [vmem:[%s5787_s1 + $0x3b0] sm:$0xff] }
 0x144   : > { %689 = vmatmul.f32.gmra.mxu2 %v4458_v41  ;;  %1224 = vmatmul.f32.gmra.mxu1 %v4175_v59  ;;  %v3258_v59 = vld [vmem:[%s5787_s1 + $0x3b8] sm:$0xff] }
 0x145   : > { %1575 = vmatpush.msra.mxu3 %v3258_v59  ;;  %v3251_v59 = vld [vmem:[%s5787_s1 + $0x380] sm:$0xff] }
 0x146   : > { %884 = vmatmul.f32.gmra.mxu3 %v3053_v23  ;;  %v4530_v23 = vld [vmem:[%s3728_s25 + $0x152] sm:$0xff] }
 0x147   : > { %v642_v6 = vpop.f32.mrf.mxu2  ;;  %1576 = vmatpush.msra.mxu3 %v3257_v3 }
 0x148   : > { %v718_v8 = vadd.f32 %v642_v6, %v481_v58  ;;  %v4482_v5 = vpop.f32.mrf.mxu0  ;;  %v3252_v58 = vld [vmem:[%s5787_s1 + $0x388] sm:$0xff]  ;;  %v487_v6 = vadd.f32 %v4416_v15, %v4340_v39 }
 0x149   : > { %v837_v54 = vpop.f32.mrf.mxu3  ;;  %1577 = vmatpush.msra.mxu3 %v3256_v38 }
 0x14a   : > { %v4493_v57 = vadd.f32 %v837_v54, %v718_v8  ;;  %v4555_v54 = vld [vmem:[%s3728_s25 + $0x15a] sm:$0xff] }
 0x14b   : > { %1033 = vmatmul.f32.gmra.mxu0 %v4000_v63  ;;  %v4512_v63 = vpop.f32.mrf.mxu1  ;;  %1578 = vmatpush.msra.mxu3 %v3255_v51  ;;  %v4568_v51 = vld [vmem:[%s3728_s25 + $0x16a] sm:$0xff] }
 0x14c   : > { %692 = vmatmul.f32.gmra.mxu2 %v4491_v50  ;;  %1227 = vmatmul.f32.gmra.mxu1 %v4203_v28  ;;  %v3205_v28 = vld [vmem:[%s5787_s1 + $0x310] sm:$0xff] }
 0x14d   : > { %1386 = vmatpush.msra.mxu2 %v3205_v28  ;;  %1579 = vmatpush.msra.mxu3 %v3254_v35 }
 0x14e   : > { %887 = vmatmul.f32.gmra.mxu3 %v3910_v29  ;;  %v3253_v29 = vld [vmem:[%s5787_s1 + $0x390] sm:$0xff] }
 0x14f   : > { %v645_v55 = vpop.f32.mrf.mxu2  ;;  %1387 = vmatpush.msra.mxu2 %v3204_v12  ;;  %1580 = vmatpush.msra.mxu3 %v3253_v29  ;;  %v4587_v29 = vld [vmem:[%s3728_s25 + $0x172] sm:$0xff] }
 0x150   : > { %v719_v4 = vadd.f32 %v645_v55, %v484_v61  ;;  %v4521_v53 = vpop.f32.mrf.mxu0 }
 0x151   : > { %v840_v30 = vpop.f32.mrf.mxu3  ;;  %1388 = vmatpush.msra.mxu2 %v3203_v17  ;;  %1581 = vmatpush.msra.mxu3 %v3252_v58  ;;  %v5823_v17 = vld [vmem:[#allocation6_spill] sm:$0xff] }
 0x152   : > { %v4532_v9 = vadd.f32 %v840_v30, %v719_v4  ;;  %v4593_v58 = vld [vmem:[%s3728_s25 + $0x188] sm:$0xff] }
 0x153   : > { %1036 = vmatmul.f32.gmra.mxu0 %v4012_v2  ;;  %1582 = vmatpush.msra.mxu3 %v3251_v59 }
 0x154   : > { %695 = vmatmul.f32.gmra.mxu2 %v4530_v23  ;;  %1230 = vmatmul.f32.gmra.mxu1 %v4228_v27  ;;  %v498_v27 = vpop.f32.mrf.mxu1 }
 0x156   : > { %890 = vmatmul.f32.gmra.mxu3 %v3923_v34  ;;  %v490_v34 = vadd.f32 %v4439_v10, %v4358_v52  ;;  %v5822_v52 = vld [vmem:[#allocation20_spill] sm:$0xff]  ;;  %v493_v10 = vadd.f32 %v4464_v36, %v4379_v37  ;;  %v496_v37 = vadd.f32 %v4512_v63, %v4397_v0  ;;  %v499_v0 = vadd.f32 %v498_v27, %v4418_v45 }
 0x157   : > { %v648_v2 = vpop.f32.mrf.mxu2 }
 0x158   : > { %v720_v8 = vadd.f32 %v648_v2, %v487_v6  ;;  %v4552_v48 = vpop.f32.mrf.mxu0 }
 0x159   : > { %v843_v3 = vpop.f32.mrf.mxu3 }
 0x15a   : > { %v4557_v44 = vadd.f32 %v843_v3, %v720_v8  ;;  %v3171_v8 = vld [vmem:[%s3728_s25 + $0x30] sm:$0xff] }
 0x15b   : > { %1039 = vmatmul.f32.gmra.mxu0 %v4027_v7  ;;  %v5821_v7 = vld [vmem:[#allocation5_spill] sm:$0xff] }
 0x15c   : > { %698 = vmatmul.f32.gmra.mxu2 %v4555_v54  ;;  %1233 = vmatmul.f32.gmra.mxu1 %v4248_v62  ;;  %v501_v61 = vpop.f32.mrf.mxu1  ;;  %v4574_v62 = vld [vmem:[%s3728_s25 + $0x180] sm:$0xff] }
 0x15d   : > { %v502_v45 = vadd.f32 %v501_v61, %v4434_v33 }
 0x15e   : > { %893 = vmatmul.f32.gmra.mxu3 %v3936_v40  ;;  %v3305_v40 = vld [vmem:[%s5787_s1 + $0x430] sm:$0xff] }
 0x15f   : > { %v651_v39 = vpop.f32.mrf.mxu2  ;;  %1770 = vmatpush.msra.mxu0 %v3305_v40  ;;  %v3172_v40 = vld [vmem:[%s3728_s25 + $0x38] sm:$0xff] }
 0x160   : > { %v721_v15 = vadd.f32 %v651_v39, %v490_v34  ;;  %v4565_v38 = vpop.f32.mrf.mxu0  ;;  %v5825_v34 = vld [vmem:[#allocation8_spill] sm:$0xff] }
 0x161   : > { %v846_v18 = vpop.f32.mrf.mxu3  ;;  %v3219_v39 = vld [vmem:[%s3728_s25 + $0x31] sm:$0xff] }
 0x162   : > { %v4570_v28 = vadd.f32 %v846_v18, %v721_v15 }
 0x163   : > { %1042 = vmatmul.f32.gmra.mxu0 %v5821_v7 }
 0x164   : > { %701 = vmatmul.f32.gmra.mxu2 %v4568_v51  ;;  %1236 = vmatmul.f32.gmra.mxu1 %v5822_v52  ;;  %v504_v47 = vpop.f32.mrf.mxu1 }
 0x165   : > { %v505_v33 = vadd.f32 %v504_v47, %v4455_v11 }
 0x166   : > { %896 = vmatmul.f32.gmra.mxu3 %v4574_v62 }
 0x167   : > { %v654_v35 = vpop.f32.mrf.mxu2 }
 0x168   : > { %v722_v55 = vadd.f32 %v654_v35, %v493_v10  ;;  %v4584_v4 = vpop.f32.mrf.mxu0  ;;  %v3220_v35 = vld [vmem:[%s3728_s25 + $0x39] sm:$0xff] }
 0x169   : > { %v849_v12 = vpop.f32.mrf.mxu3 }
 0x16a   : > { %v4589_v30 = vadd.f32 %v849_v12, %v722_v55 }
 0x16b   : > { %1045 = vmatmul.f32.gmra.mxu0 %v5823_v17 }
 0x16c   : > { %704 = vmatmul.f32.gmra.mxu2 %v4587_v29  ;;  %1239 = vmatmul.f32.gmra.mxu1 %v4285_v13  ;;  %v3304_v13 = vld [vmem:[%s5787_s1 + $0x428] sm:$0xff]  ;;  %v507_v63 = vpop.f32.mrf.mxu1 }
 0x16d   : > { %1771 = vmatpush.msra.mxu0 %v3304_v13  ;;  %v508_v11 = vadd.f32 %v507_v63, %v4482_v5 }
 0x16e   : > { %899 = vmatmul.f32.gmra.mxu3 %v4593_v58 }
 0x16f   : > { %v657_v36 = vpop.f32.mrf.mxu2 }
 0x170   : > { %v723_v59 = vadd.f32 %v657_v36, %v496_v37  ;;  %v4600_v6 = vpop.f32.mrf.mxu0  ;;  %v3173_v36 = vld [vmem:[%s3728_s25 + $0x48] sm:$0xff] }
 0x171   : > { %v852_v2 = vpop.f32.mrf.mxu3 }
 0x172   : > { %v4603_v3 = vadd.f32 %v852_v2, %v723_v59  ;;  %v5829_v2 = vld [vmem:[#allocation12_spill] sm:$0xff] }
 0x173   : > { %1048 = vmatmul.f32.gmra.mxu0 %v5825_v34 }
 0x174   : > { %5824 = vst [vmem:[#allocation5_spill] sm:$0xff] %v4603_v3  ;;  %1389 = vmatmul.f32.vlgmr.msra.gmra.mxu2 %v3171_v8  ;;  %1242 = vmatmul.f32.gmra.mxu1 %v4306_v32  ;;  %v5827_v32 = vld [vmem:[#allocation10_spill] sm:$0xff]  ;;  %v510_v55 = vpop.f32.mrf.mxu1 }
 0x175   : > { %v3221_v8 = vld [vmem:[%s3728_s25 + $0x49] sm:$0xff]  ;;  %v511_v5 = vadd.f32 %v510_v55, %v4521_v53  ;;  %v3250_v3 = vld [vmem:[%s3728_s25 + $0x1a1] sm:$0xff] }
 0x176   : > { %1583 = vmatmul.f32.vlgmr.msra.gmra.mxu3 %v3219_v39 }
 0x177   : > { %v660_v15 = vpop.f32.mrf.mxu2 }
 0x178   : > { %v724_v18 = vadd.f32 %v660_v15, %v499_v0  ;;  %v4612_v7 = vpop.f32.mrf.mxu0  ;;  %v3174_v0 = vld [vmem:[%s3728_s25 + $0x50] sm:$0xff] }
 0x179   : > { %v855_v52 = vpop.f32.mrf.mxu3 }
 0x17a   : > { %v4615_v10 = vadd.f32 %v855_v52, %v724_v18  ;;  %v3222_v52 = vld [vmem:[%s3728_s25 + $0x51] sm:$0xff] }
 0x17b   : > { %1051 = vmatmul.f32.gmra.mxu0 %v5827_v32 }
 0x17c   : > { %5826 = vst [vmem:[#allocation20_spill] sm:$0xff] %v4615_v10  ;;  %1392 = vmatmul.f32.gmra.mxu2 %v3172_v40  ;;  %1245 = vmatmul.f32.gmra.mxu1 %v4324_v19  ;;  %v3303_v19 = vld [vmem:[%s5787_s1 + $0x420] sm:$0xff]  ;;  %v513_v15 = vpop.f32.mrf.mxu1  ;;  %v3267_v10 = vld [vmem:[%s3728_s25 + $0x32] sm:$0xff] }
 0x17d   : > { %1772 = vmatpush.msra.mxu0 %v3303_v19  ;;  %v514_v53 = vadd.f32 %v513_v15, %v4552_v48 }
 0x17e   : > { %1586 = vmatmul.f32.gmra.mxu3 %v3220_v35 }
 0x17f   : > { %v663_v27 = vpop.f32.mrf.mxu2 }
 0x180   : > { %v725_v12 = vadd.f32 %v663_v27, %v502_v45  ;;  %v4621_v17 = vpop.f32.mrf.mxu0  ;;  %v3175_v45 = vld [vmem:[%s3728_s25 + $0x60] sm:$0xff] }
 0x181   : > { %v858_v37 = vpop.f32.mrf.mxu3 }
 0x182   : > { %v4624_v59 = vadd.f32 %v858_v37, %v725_v12  ;;  %v5833_v12 = vld [vmem:[#allocation16_spill] sm:$0xff]  ;;  %v3223_v37 = vld [vmem:[%s3728_s25 + $0x61] sm:$0xff] }
 0x183   : > { %1054 = vmatmul.f32.gmra.mxu0 %v5829_v2 }
 0x184   : > { %5828 = vst [vmem:[#allocation6_spill] sm:$0xff] %v4624_v59  ;;  %1395 = vmatmul.f32.gmra.mxu2 %v3173_v36  ;;  %1248 = vmatmul.f32.gmra.mxu1 %v4343_v20  ;;  %v5831_v20 = vld [vmem:[#allocation14_spill] sm:$0xff]  ;;  %v516_v36 = vpop.f32.mrf.mxu1 }
 0x185   : > { %v517_v48 = vadd.f32 %v516_v36, %v4565_v38 }
 0x186   : > { %1589 = vmatmul.f32.gmra.mxu3 %v3221_v8 }
 0x187   : > { %v666_v61 = vpop.f32.mrf.mxu2 }
 0x188   : > { %v726_v34 = vadd.f32 %v666_v61, %v505_v33  ;;  %v4633_v39 = vpop.f32.mrf.mxu0  ;;  %v3176_v33 = vld [vmem:[%s3728_s25 + $0x68] sm:$0xff] }
 0x189   : > { %v861_v13 = vpop.f32.mrf.mxu3 }
 0x18a   : > { %v4636_v18 = vadd.f32 %v861_v13, %v726_v34  ;;  %v5835_v34 = vld [vmem:[#allocation18_spill] sm:$0xff] }
 0x18b   : > { %1057 = vmatmul.f32.gmra.mxu0 %v5831_v20 }
 0x18c   : > { %5830 = vst [vmem:[#allocation8_spill] sm:$0xff] %v4636_v18  ;;  %1398 = vmatmul.f32.gmra.mxu2 %v3174_v0  ;;  %1251 = vmatmul.f32.gmra.mxu1 %v4361_v31  ;;  %v3302_v31 = vld [vmem:[%s5787_s1 + $0x418] sm:$0xff]  ;;  %v519_v55 = vpop.f32.mrf.mxu1  ;;  %v3186_v18 = vld [vmem:[%s3728_s25 + $0xe0] sm:$0xff] }
 0x18d   : > { %1773 = vmatpush.msra.mxu0 %v3302_v31  ;;  %v4683_v31 = vld [vmem:[%s3728_s25 + $0x129] sm:$0xff]  ;;  %v520_v38 = vadd.f32 %v519_v55, %v4584_v4 }
 0x18e   : > { %1592 = vmatmul.f32.gmra.mxu3 %v3222_v52  ;;  %v4666_v52 = vld [vmem:[%s3728_s25 + $0x121] sm:$0xff] }
 0x18f   : > { %v669_v47 = vpop.f32.mrf.mxu2  ;;  %v3300_v4 = vld [vmem:[%s5787_s1 + $0x408] sm:$0xff] }
 0x190   : > { %v727_v40 = vadd.f32 %v669_v47, %v508_v11  ;;  %v4642_v32 = vpop.f32.mrf.mxu0  ;;  %v3177_v47 = vld [vmem:[%s3728_s25 + $0x78] sm:$0xff] }
 0x191   : > { %v864_v35 = vpop.f32.mrf.mxu3 }
 0x192   : > { %v4645_v27 = vadd.f32 %v864_v35, %v727_v40  ;;  %v3225_v35 = vld [vmem:[%s3728_s25 + $0x79] sm:$0xff] }
 0x193   : > { %1060 = vmatmul.f32.gmra.mxu0 %v5833_v12 }
 0x194   : > { %5832 = vst [vmem:[#allocation10_spill] sm:$0xff] %v4645_v27  ;;  %1401 = vmatmul.f32.gmra.mxu2 %v3175_v45  ;;  %1254 = vmatmul.f32.gmra.mxu1 %v4382_v14  ;;  %v3224_v14 = vld [vmem:[%s3728_s25 + $0x69] sm:$0xff]  ;;  %v4678_v15 = vpop.f32.mrf.mxu1 }
 0x196   : > { %1595 = vmatmul.f32.gmra.mxu3 %v3223_v37 }
 0x197   : > { %v672_v63 = vpop.f32.mrf.mxu2 }
 0x198   : > { %v728_v2 = vadd.f32 %v672_v63, %v511_v5  ;;  %v4654_v8 = vpop.f32.mrf.mxu0 }
 0x199   : > { %v867_v19 = vpop.f32.mrf.mxu3 }
 0x19a   : > { %v4657_v61 = vadd.f32 %v867_v19, %v728_v2  ;;  %v3226_v2 = vld [vmem:[%s3728_s25 + $0x81] sm:$0xff] }
 0x19b   : > { %1063 = vmatmul.f32.gmra.mxu0 %v5835_v34 }
 0x19c   : > { %5834 = vst [vmem:[#allocation12_spill] sm:$0xff] %v4657_v61  ;;  %1404 = vmatmul.f32.gmra.mxu2 %v3176_v33  ;;  %1257 = vmatmul.f32.gmra.mxu1 %v4400_v42  ;;  %v3301_v42 = vld [vmem:[%s5787_s1 + $0x410] sm:$0xff]  ;;  %v4692_v19 = vpop.f32.mrf.mxu1 }
 0x19d   : > { %1774 = vmatpush.msra.mxu0 %v3301_v42  ;;  %v4712_v42 = vld [vmem:[%s3728_s25 + $0x141] sm:$0xff]  ;;  %v4800_v61 = vld [vmem:[%s3728_s25 + $0x189] sm:$0xff] }
 0x19e   : > { %1598 = vmatmul.f32.gmra.mxu3 %v3224_v14  ;;  %v4697_v14 = vld [vmem:[%s3728_s25 + $0x139] sm:$0xff] }
 0x19f   : > { %v675_v13 = vpop.f32.mrf.mxu2  ;;  %1775 = vmatpush.msra.mxu0 %v3300_v4  ;;  %v3229_v4 = vld [vmem:[%s3728_s25 + $0xa9] sm:$0xff] }
 0x1a0   : > { %v729_v0 = vadd.f32 %v675_v13, %v514_v53  ;;  %v4663_v20 = vpop.f32.mrf.mxu0  ;;  %v3179_v13 = vld [vmem:[%s3728_s25 + $0x90] sm:$0xff] }
 0x1a1   : > { %v870_v11 = vpop.f32.mrf.mxu3 }
 0x1a2   : > { %v4669_v40 = vadd.f32 %v870_v11, %v729_v0  ;;  %v5839_v11 = vld [vmem:[#allocation7_spill] sm:$0xff] }
 0x1a3   : > { %1066 = vmatmul.f32.gmra.mxu0 %v4666_v52 }
 0x1a4   : > { %5836 = vst [vmem:[#allocation14_spill] sm:$0xff] %v4669_v40  ;;  %1407 = vmatmul.f32.gmra.mxu2 %v3177_v47  ;;  %1260 = vmatmul.f32.gmra.mxu1 %v4421_v43  ;;  %v3178_v43 = vld [vmem:[%s3728_s25 + $0x80] sm:$0xff] }
 0x1a6   : > { %1601 = vmatmul.f32.gmra.mxu3 %v3225_v35 }
 0x1a7   : > { %v678_v45 = vpop.f32.mrf.mxu2 }
 0x1a8   : > { %v730_v12 = vadd.f32 %v678_v45, %v517_v48  ;;  %v4680_v37 = vpop.f32.mrf.mxu0  ;;  %v3180_v45 = vld [vmem:[%s3728_s25 + $0x98] sm:$0xff] }
 0x1a9   : > { %v873_v5 = vpop.f32.mrf.mxu3 }
 0x1aa   : > { %v4686_v63 = vadd.f32 %v873_v5, %v730_v12  ;;  %v4715_v12 = vpop.f32.mrf.mxu1  ;;  %v3228_v5 = vld [vmem:[%s3728_s25 + $0x99] sm:$0xff] }
 0x1ab   : > { %1069 = vmatmul.f32.gmra.mxu0 %v4683_v31 }
 0x1ac   : > { %5837 = vst [vmem:[#allocation16_spill] sm:$0xff] %v4686_v63  ;;  %1410 = vmatmul.f32.gmra.mxu2 %v3178_v43  ;;  %1263 = vmatmul.f32.gmra.mxu1 %v4437_v49  ;;  %v3227_v49 = vld [vmem:[%s3728_s25 + $0x91] sm:$0xff] }
 0x1ae   : > { %1604 = vmatmul.f32.gmra.mxu3 %v3226_v2  ;;  %v5841_v2 = vld [vmem:[#allocation9_spill] sm:$0xff] }
 0x1af   : > { %v681_v36 = vpop.f32.mrf.mxu2 }
 0x1b0   : > { %v731_v33 = vadd.f32 %v681_v36, %v520_v38  ;;  %v4694_v34 = vpop.f32.mrf.mxu0 }
 0x1b1   : > { %v876_v53 = vpop.f32.mrf.mxu3 }
 0x1b2   : > { %v4700_v0 = vadd.f32 %v876_v53, %v731_v33  ;;  %v4726_v33 = vld [vmem:[%s3728_s25 + $0x151] sm:$0xff] }
 0x1b3   : > { %1072 = vmatmul.f32.gmra.mxu0 %v4697_v14 }
 0x1b4   : > { %5838 = vst [vmem:[#allocation18_spill] sm:$0xff] %v4700_v0  ;;  %1413 = vmatmul.f32.gmra.mxu2 %v3179_v13  ;;  %1266 = vmatmul.f32.gmra.mxu1 %v4458_v41  ;;  %v3181_v13 = vld [vmem:[%s3728_s25 + $0xa8] sm:$0xff] }
 0x1b5   : > { %v4783_v0 = vld [vmem:[%s3728_s25 + $0x181] sm:$0xff] }
 0x1b6   : > { %1607 = vmatmul.f32.gmra.mxu3 %v3227_v49 }
 0x1b7   : > { %v684_v55 = vpop.f32.mrf.mxu2 }
 0x1b8   : > { %v732_v47 = vadd.f32 %v684_v55, %v5839_v11  ;;  %v4709_v35 = vpop.f32.mrf.mxu0  ;;  %v4733_v55 = vpop.f32.mrf.mxu1 }
 0x1b9   : > { %v879_v48 = vpop.f32.mrf.mxu3 }
 0x1ba   : > { %v4717_v41 = vadd.f32 %v879_v48, %v732_v47  ;;  %v5843_v47 = vld [vmem:[#allocation11_spill] sm:$0xff] }
 0x1bb   : > { %1075 = vmatmul.f32.gmra.mxu0 %v4712_v42 }
 0x1bc   : > { %5840 = vst [vmem:[#allocation7_spill] sm:$0xff] %v4717_v41  ;;  %1416 = vmatmul.f32.gmra.mxu2 %v3180_v45  ;;  %1269 = vmatmul.f32.gmra.mxu1 %v4491_v50  ;;  %v3299_v50 = vld [vmem:[%s5787_s1 + $0x400] sm:$0xff]  ;;  %v4771_v41 = vld [vmem:[%s3728_s25 + $0x171] sm:$0xff] }
 0x1bd   : > { %1776 = vmatpush.msra.mxu0 %v3299_v50 }
 0x1be   : > { %1610 = vmatmul.f32.gmra.mxu3 %v3228_v5  ;;  %v4743_v5 = vld [vmem:[%s3728_s25 + $0x159] sm:$0xff] }
 0x1bf   : > { %v687_v43 = vpop.f32.mrf.mxu2 }
 0x1c0   : > { %v733_v38 = vadd.f32 %v687_v43, %v5841_v2  ;;  %v4723_v36 = vpop.f32.mrf.mxu0  ;;  %v3182_v2 = vld [vmem:[%s3728_s25 + $0xb0] sm:$0xff] }
 0x1c1   : > { %v882_v53 = vpop.f32.mrf.mxu3 }
 0x1c2   : > { %v4729_v49 = vadd.f32 %v882_v53, %v733_v38  ;;  %v4751_v53 = vpop.f32.mrf.mxu1 }
 0x1c3   : > { %1078 = vmatmul.f32.gmra.mxu0 %v4726_v33 }
 0x1c4   : > { %5842 = vst [vmem:[#allocation9_spill] sm:$0xff] %v4729_v49  ;;  %1419 = vmatmul.f32.gmra.mxu2 %v3181_v13  ;;  %1272 = vmatmul.f32.gmra.mxu1 %v4530_v23  ;;  %v3230_v23 = vld [vmem:[%s3728_s25 + $0xb1] sm:$0xff] }
 0x1c6   : > { %1613 = vmatmul.f32.gmra.mxu3 %v3229_v4  ;;  %v5845_v4 = vld [vmem:[#allocation13_spill] sm:$0xff] }
 0x1c7   : > { %v690_v11 = vpop.f32.mrf.mxu2 }
 0x1c8   : > { %v734_v48 = vadd.f32 %v690_v11, %v5843_v47  ;;  %v4740_v45 = vpop.f32.mrf.mxu0  ;;  %v4757_v47 = vld [vmem:[%s3728_s25 + $0x169] sm:$0xff] }
 0x1c9   : > { %v885_v43 = vpop.f32.mrf.mxu3 }
 0x1ca   : > { %v4746_v38 = vadd.f32 %v885_v43, %v734_v48  ;;  %v3183_v43 = vld [vmem:[%s3728_s25 + $0xc0] sm:$0xff] }
 0x1cb   : > { %1081 = vmatmul.f32.gmra.mxu0 %v4743_v5 }
 0x1cc   : > { %5844 = vst [vmem:[#allocation11_spill] sm:$0xff] %v4746_v38  ;;  %1422 = vmatmul.f32.gmra.mxu2 %v3182_v2  ;;  %1275 = vmatmul.f32.gmra.mxu1 %v4555_v54  ;;  %v3231_v54 = vld [vmem:[%s3728_s25 + $0xc1] sm:$0xff] }
 0x1ce   : > { %1616 = vmatmul.f32.gmra.mxu3 %v3230_v23  ;;  %v4765_v23 = vpop.f32.mrf.mxu1 }
 0x1cf   : > { %v693_v13 = vpop.f32.mrf.mxu2 }
 0x1d0   : > { %v735_v50 = vadd.f32 %v693_v13, %v5845_v4  ;;  %v4754_v11 = vpop.f32.mrf.mxu0  ;;  %v5847_v13 = vld [vmem:[#allocation15_spill] sm:$0xff] }
 0x1d1   : > { %v888_v48 = vpop.f32.mrf.mxu3 }
 0x1d2   : > { %v4760_v38 = vadd.f32 %v888_v48, %v735_v50  ;;  %v3184_v48 = vld [vmem:[%s3728_s25 + $0xc8] sm:$0xff] }
 0x1d3   : > { %1084 = vmatmul.f32.gmra.mxu0 %v4757_v47 }
 0x1d4   : > { %5846 = vst [vmem:[#allocation13_spill] sm:$0xff] %v4760_v38  ;;  %1425 = vmatmul.f32.gmra.mxu2 %v3183_v43  ;;  %1278 = vmatmul.f32.gmra.mxu1 %v4568_v51  ;;  %v3232_v51 = vld [vmem:[%s3728_s25 + $0xc9] sm:$0xff] }
 0x1d6   : > { %1619 = vmatmul.f32.gmra.mxu3 %v3231_v54  ;;  %v5849_v54 = vld [vmem:[#allocation17_spill] sm:$0xff] }
 0x1d7   : > { %v696_v2 = vpop.f32.mrf.mxu2 }
 0x1d8   : > { %v736_v4 = vadd.f32 %v696_v2, %v5847_v13  ;;  %v4768_v49 = vpop.f32.mrf.mxu0 }
 0x1d9   : > { %v891_v50 = vpop.f32.mrf.mxu3 }
 0x1da   : > { %v4774_v38 = vadd.f32 %v891_v50, %v736_v4  ;;  %v3185_v4 = vld [vmem:[%s3728_s25 + $0xd8] sm:$0xff]  ;;  %v4787_v50 = vld [vmem:[%s3728_s25 + $0x182] sm:$0xff] }
 0x1db   : > { %1087 = vmatmul.f32.gmra.mxu0 %v4771_v41 }
 0x1dc   : > { %5848 = vst [vmem:[#allocation15_spill] sm:$0xff] %v4774_v38  ;;  %1428 = vmatmul.f32.gmra.mxu2 %v3184_v48  ;;  %1281 = vmatmul.f32.gmra.mxu1 %v4587_v29  ;;  %v4789_v38 = vpop.f32.mrf.mxu1  ;;  %v3233_v29 = vld [vmem:[%s3728_s25 + $0xd9] sm:$0xff] }
 0x1de   : > { %1622 = vmatmul.f32.gmra.mxu3 %v3232_v51 }
 0x1df   : > { %v699_v43 = vpop.f32.mrf.mxu2 }
 0x1e0   : > { %v737_v2 = vadd.f32 %v699_v43, %v5849_v54  ;;  %v4780_v13 = vpop.f32.mrf.mxu0  ;;  %v5851_v43 = vld [vmem:[#allocation19_spill] sm:$0xff] }
 0x1e1   : > { %v894_v63 = vpop.f32.mrf.mxu3 }
 0x1e2   : > { %v4791_v48 = vadd.f32 %v894_v63, %v737_v2  ;;  %v4804_v63 = vld [vmem:[%s3728_s25 + $0x18a] sm:$0xff] }
 0x1e3   : > { %1090 = vmatmul.f32.gmra.mxu0 %v4783_v0  ;;  %5853 = vst [vmem:[#allocation22_spill] sm:$0xff] %v4804_v63 }
 0x1e4   : > { %5850 = vst [vmem:[#allocation17_spill] sm:$0xff] %v4791_v48  ;;  %1431 = vmatmul.f32.gmra.mxu2 %v3185_v4  ;;  %1284 = vmatmul.f32.gmra.mxu1 %v4787_v50  ;;  %v3234_v4 = vld [vmem:[%s3728_s25 + $0xe1] sm:$0xff] }
 0x1e6   : > { %1625 = vmatmul.f32.gmra.mxu3 %v3233_v29  ;;  %v4810_v29 = vpop.f32.mrf.mxu1 }
 0x1e7   : > { %v702_v51 = vpop.f32.mrf.mxu2 }
 0x1e8   : > { %v738_v54 = vadd.f32 %v702_v51, %v5851_v43  ;;  %v4797_v40 = vpop.f32.mrf.mxu0  ;;  %v5855_v43 = vld [vmem:[#allocation21_spill] sm:$0xff] }
 0x1e9   : > { %5852 = vst [vmem:[#allocation19_spill] sm:$0xff] %v4797_v40  ;;  %v897_v27 = vpop.f32.mrf.mxu3  ;;  %v3268_v40 = vld [vmem:[%s3728_s25 + $0x3a] sm:$0xff] }
 0x1ea   : > { %v4806_v2 = vadd.f32 %v897_v27, %v738_v54  ;;  %v3187_v54 = vld [vmem:[%s3728_s25 + $0xf0] sm:$0xff] }
 0x1eb   : > { %1093 = vmatmul.f32.gmra.mxu0 %v4800_v61 }
 0x1ec   : > { %5854 = vst [vmem:[#allocation23_spill] sm:$0xff] %v4806_v2  ;;  %1434 = vmatmul.f32.gmra.mxu2 %v3186_v18  ;;  %1287 = vmatmul.f32.gmra.mxu1 %v4804_v63  ;;  %v3235_v18 = vld [vmem:[%s3728_s25 + $0xf1] sm:$0xff] }
 0x1ee   : > { %1628 = vmatmul.f32.gmra.mxu3 %v3234_v4 }
 0x1ef   : > { %v705_v51 = vpop.f32.mrf.mxu2 }
 0x1f0   : > { %v739_v48 = vadd.f32 %v705_v51, %v5855_v43  ;;  %v4814_v59 = vpop.f32.mrf.mxu0  ;;  %v3188_v51 = vld [vmem:[%s3728_s25 + $0xf8] sm:$0xff] }
 0x1f1   : > { %5856 = vst [vmem:[#allocation21_spill] sm:$0xff] %v4814_v59  ;;  %v900_v27 = vpop.f32.mrf.mxu3  ;;  %v3236_v43 = vld [vmem:[%s3728_s25 + $0xf9] sm:$0xff] }
 0x1f2   : > { %v4818_v2 = vadd.f32 %v900_v27, %v739_v48  ;;  %v3269_v48 = vld [vmem:[%s3728_s25 + $0x4a] sm:$0xff] }
 0x1f3   : > { %1777 = vmatmul.f32.vlgmr.msra.gmra.mxu0 %v3267_v10  ;;  %v3189_v10 = vld [vmem:[%s3728_s25 + $0x108] sm:$0xff] }
 0x1f4   : > { %5857 = vst [vmem:[#allocation24_spill] sm:$0xff] %v4818_v2  ;;  %1437 = vmatmul.f32.gmra.mxu2 %v3187_v54  ;;  %v3237_v27 = vld [vmem:[%s3728_s25 + $0x109] sm:$0xff] }
 0x1f5   : > { %v3190_v2 = vld [vmem:[%s3728_s25 + $0x110] sm:$0xff] }
 0x1f6   : > { %1631 = vmatmul.f32.gmra.mxu3 %v3235_v18  ;;  %v3270_v18 = vld [vmem:[%s3728_s25 + $0x52] sm:$0xff] }
 0x1f8   : > { %v4821_v4 = vpop.f32.mrf.mxu0 }
 0x1f9   : > { %5858 = vst [vmem:[#allocation25_spill] sm:$0xff] %v4821_v4 }
 0x1fb   : > { %1780 = vmatmul.f32.gmra.mxu0 %v3268_v40  ;;  %v3238_v40 = vld [vmem:[%s3728_s25 + $0x111] sm:$0xff] }
 0x1fc   : > { %1440 = vmatmul.f32.gmra.mxu2 %v3188_v51 }
 0x1fe   : > { %1634 = vmatmul.f32.gmra.mxu3 %v3236_v43  ;;  %v3271_v43 = vld [vmem:[%s3728_s25 + $0x62] sm:$0xff] }
 0x200   : > { %v4826_v59 = vpop.f32.mrf.mxu0 }
 0x201   : > { %5859 = vst [vmem:[#allocation26_spill] sm:$0xff] %v4826_v59  ;;  %v3191_v59 = vld [vmem:[%s3728_s25 + $0x120] sm:$0xff] }
 0x203   : > { %1783 = vmatmul.f32.gmra.mxu0 %v3269_v48 }
 0x204   : > { %1443 = vmatmul.f32.gmra.mxu2 %v3189_v10  ;;  %v3272_v10 = vld [vmem:[%s3728_s25 + $0x6a] sm:$0xff] }
 0x206   : > { %1637 = vmatmul.f32.gmra.mxu3 %v3237_v27  ;;  %v3192_v27 = vld [vmem:[%s3728_s25 + $0x128] sm:$0xff] }
 0x208   : > { %v4831_v54 = vpop.f32.mrf.mxu0 }
 0x209   : > { %5860 = vst [vmem:[#allocation27_spill] sm:$0xff] %v4831_v54  ;;  %v3202_v54 = vld [vmem:[%s3728_s25 + $0x1a0] sm:$0xff] }
 0x20b   : > { %1786 = vmatmul.f32.gmra.mxu0 %v3270_v18  ;;  %v3273_v18 = vld [vmem:[%s3728_s25 + $0x7a] sm:$0xff] }
 0x20c   : > { %1446 = vmatmul.f32.gmra.mxu2 %v3190_v2 }
 0x20e   : > { %1640 = vmatmul.f32.gmra.mxu3 %v3238_v40  ;;  %v3193_v40 = vld [vmem:[%s3728_s25 + $0x138] sm:$0xff] }
 0x210   : > { %v4836_v51 = vpop.f32.mrf.mxu0 }
 0x211   : > { %5861 = vst [vmem:[#allocation28_spill] sm:$0xff] %v4836_v51  ;;  %v3278_v51 = vld [vmem:[%s3728_s25 + $0xb2] sm:$0xff] }
 0x213   : > { %1789 = vmatmul.f32.gmra.mxu0 %v3271_v43 }
 0x214   : > { %1449 = vmatmul.f32.gmra.mxu2 %v3191_v59  ;;  %v4850_v59 = vpop.f32.mrf.mxu2 }
 0x216   : > { %1643 = vmatmul.f32.gmra.mxu3 %v4666_v52  ;;  %v4853_v52 = vpop.f32.mrf.mxu3 }
 0x218   : > { %v4841_v48 = vpop.f32.mrf.mxu0 }
 0x219   : > { %5862 = vst [vmem:[#allocation29_spill] sm:$0xff] %v4841_v48 }
 0x21b   : > { %1792 = vmatmul.f32.gmra.mxu0 %v3272_v10  ;;  %v3274_v10 = vld [vmem:[%s3728_s25 + $0x82] sm:$0xff] }
 0x21c   : > { %1452 = vmatmul.f32.gmra.mxu2 %v3192_v27  ;;  %v4860_v27 = vpop.f32.mrf.mxu2 }
 0x21e   : > { %1646 = vmatmul.f32.gmra.mxu3 %v4683_v31  ;;  %v3194_v31 = vld [vmem:[%s3728_s25 + $0x140] sm:$0xff] }
 0x220   : > { %v4846_v2 = vpop.f32.mrf.mxu0 }
 0x221   : > { %5863 = vst [vmem:[#allocation30_spill] sm:$0xff] %v4846_v2  ;;  %v4866_v2 = vpop.f32.mrf.mxu3 }
 0x223   : > { %1795 = vmatmul.f32.gmra.mxu0 %v3273_v18 }
 0x224   : > { %1455 = vmatmul.f32.gmra.mxu2 %v3193_v40  ;;  %v3275_v40 = vld [vmem:[%s3728_s25 + $0x92] sm:$0xff] }
 0x226   : > { %1649 = vmatmul.f32.gmra.mxu3 %v4697_v14  ;;  %v3195_v14 = vld [vmem:[%s3728_s25 + $0x150] sm:$0xff] }
 0x228   : > { %v4855_v43 = vpop.f32.mrf.mxu0 }
 0x229   : > { %5864 = vst [vmem:[#allocation31_spill] sm:$0xff] %v4855_v43 }
 0x22b   : > { %1798 = vmatmul.f32.gmra.mxu0 %v3274_v10  ;;  %v3276_v10 = vld [vmem:[%s3728_s25 + $0x9a] sm:$0xff] }
 0x22c   : > { %1458 = vmatmul.f32.gmra.mxu2 %v3194_v31  ;;  %v3196_v31 = vld [vmem:[%s3728_s25 + $0x158] sm:$0xff] }
 0x22e   : > { %1652 = vmatmul.f32.gmra.mxu3 %v4712_v42  ;;  %v4873_v42 = vpop.f32.mrf.mxu2 }
 0x230   : > { %v4862_v18 = vpop.f32.mrf.mxu0 }
 0x231   : > { %5865 = vst [vmem:[#allocation32_spill] sm:$0xff] %v4862_v18  ;;  %v4875_v18 = vpop.f32.mrf.mxu3 }
 0x233   : > { %1801 = vmatmul.f32.gmra.mxu0 %v3275_v40  ;;  %v3277_v40 = vld [vmem:[%s3728_s25 + $0xaa] sm:$0xff] }
 0x234   : > { %1461 = vmatmul.f32.gmra.mxu2 %v3195_v14  ;;  %v3197_v14 = vld [vmem:[%s3728_s25 + $0x168] sm:$0xff] }
 0x236   : > { %1655 = vmatmul.f32.gmra.mxu3 %v4726_v33  ;;  %v4882_v33 = vpop.f32.mrf.mxu2 }
 0x238   : > { %v4869_v43 = vpop.f32.mrf.mxu0 }
 0x239   : > { %5866 = vst [vmem:[#allocation33_spill] sm:$0xff] %v4869_v43  ;;  %v4884_v43 = vpop.f32.mrf.mxu3 }
 0x23b   : > { %1804 = vmatmul.f32.gmra.mxu0 %v3276_v10 }
 0x23c   : > { %1464 = vmatmul.f32.gmra.mxu2 %v3196_v31  ;;  %v3198_v31 = vld [vmem:[%s3728_s25 + $0x170] sm:$0xff] }
 0x23e   : > { %1658 = vmatmul.f32.gmra.mxu3 %v4743_v5  ;;  %v4891_v5 = vpop.f32.mrf.mxu2 }
 0x240   : > { %v4878_v48 = vpop.f32.mrf.mxu0 }
 0x241   : > { %5867 = vst [vmem:[#allocation34_spill] sm:$0xff] %v4878_v48  ;;  %v3279_v48 = vld [vmem:[%s3728_s25 + $0xc2] sm:$0xff] }
 0x243   : > { %1807 = vmatmul.f32.gmra.mxu0 %v3277_v40  ;;  %v4894_v40 = vpop.f32.mrf.mxu3 }
 0x244   : > { %1467 = vmatmul.f32.gmra.mxu2 %v3197_v14 }
 0x246   : > { %1661 = vmatmul.f32.gmra.mxu3 %v4757_v47  ;;  %v4901_v47 = vpop.f32.mrf.mxu2 }
 0x248   : > { %v4887_v10 = vpop.f32.mrf.mxu0 }
 0x249   : > { %5868 = vst [vmem:[#allocation35_spill] sm:$0xff] %v4887_v10 }
 0x24b   : > { %1810 = vmatmul.f32.gmra.mxu0 %v3278_v51  ;;  %v4906_v10 = vpop.f32.mrf.mxu3 }
 0x24c   : > { %1470 = vmatmul.f32.gmra.mxu2 %v3198_v31  ;;  %v3280_v31 = vld [vmem:[%s3728_s25 + $0xca] sm:$0xff] }
 0x24e   : > { %1664 = vmatmul.f32.gmra.mxu3 %v4771_v41 }
 0x250   : > { %v4896_v14 = vpop.f32.mrf.mxu0 }
 0x251   : > { %5869 = vst [vmem:[#allocation36_spill] sm:$0xff] %v4896_v14  ;;  %v3249_v14 = vld [vmem:[%s3728_s25 + $0x199] sm:$0xff] }
 0x253   : > { %1813 = vmatmul.f32.gmra.mxu0 %v3279_v48  ;;  %v3201_v48 = vld [vmem:[%s3728_s25 + $0x198] sm:$0xff] }
 0x254   : > { %1473 = vmatmul.f32.gmra.mxu2 %v4574_v62  ;;  %v3281_v62 = vld [vmem:[%s3728_s25 + $0xda] sm:$0xff] }
 0x256   : > { %1667 = vmatmul.f32.gmra.mxu3 %v4783_v0  ;;  %v4914_v0 = vpop.f32.mrf.mxu2 }
 0x258   : > { %v4903_v51 = vpop.f32.mrf.mxu0 }
 0x259   : > { %5870 = vst [vmem:[#allocation37_spill] sm:$0xff] %v4903_v51  ;;  %v4917_v51 = vpop.f32.mrf.mxu3 }
 0x25b   : > { %1816 = vmatmul.f32.gmra.mxu0 %v3280_v31  ;;  %v1097_v31 = vadd.f32 %v4600_v6, %v4287_v21  ;;  %v4938_v6 = vld [vmem:[%s5788_s2] ss:$0 sm:$0xff] }
 0x25c   : > { %1476 = vmatmul.f32.gmra.mxu2 %v4593_v58 }
 0x25e   : > { %1670 = vmatmul.f32.gmra.mxu3 %v4800_v61  ;;  %v3282_v61 = vld [vmem:[%s3728_s25 + $0xe2] sm:$0xff] }
 0x260   : > { %v4910_v41 = vpop.f32.mrf.mxu0 }
 0x261   : > { %5871 = vst [vmem:[#allocation38_spill] sm:$0xff] %v4910_v41  ;;  %v1291_v41 = vadd.f32 %v4678_v15, %v1097_v31  ;;  %v4932_v63 = vpop.f32.mrf.mxu3  ;;  %v3284_v31 = vld [vmem:[%s3728_s25 + $0xfa] sm:$0xff] }
 0x263   : > { %1819 = vmatmul.f32.gmra.mxu0 %v3281_v62  ;;  %v1486_v4 = vadd.f32 %v4850_v59, %v1291_v41  ;;  %v4928_v62 = vpop.f32.mrf.mxu2  ;;  %v3283_v59 = vld [vmem:[%s3728_s25 + $0xf2] sm:$0xff] }
 0x264   : > { %1479 = vmatmul.f32.gmra.mxu2 %v3201_v48  ;;  %v1098_v48 = vadd.f32 %v4612_v7, %v4308_v56 }
 0x265   : > { %v1680_v21 = vadd.f32 %v4853_v52, %v1486_v4  ;;  %v4947_v4 = vpop.f32.mrf.mxu1 }
 0x266   : > { %1673 = vmatmul.f32.gmra.mxu3 %v3249_v14  ;;  %v1292_v14 = vadd.f32 %v4692_v19, %v1098_v48 }
 0x268   : > { %v4921_v58 = vpop.f32.mrf.mxu0 }
 0x26b   : > { %1822 = vmatmul.f32.gmra.mxu0 %v3282_v61  ;;  %v4951_v48 = vpop.f32.mrf.mxu2 }
 0x26c   : > { %1482 = vmatmul.f32.gmra.mxu2 %v3202_v54  ;;  %v1487_v54 = vadd.f32 %v4860_v27, %v1292_v14 }
 0x26e   : > { %1676 = vmatmul.f32.gmra.mxu3 %v3250_v3  ;;  %v1099_v3 = vadd.f32 %v4621_v17, %v4326_v60  ;;  %v1681_v7 = vadd.f32 %v4866_v2, %v1487_v54  ;;  %v2069_v60 = vld [vmem:[%s5789_s3 + $0xf8] sm:$0xff]  ;;  %v1100_v17 = vadd.f32 %v4633_v39, %v4347_v1  ;;  %v4960_v2 = vpop.f32.mrf.mxu3 }
 0x26f   : > { %2135 = vmatpush.msrb.mxu2 %v2069_v60  ;;  %v2053_v54 = vld [vmem:[%s5789_s3 + $0x78] sm:$0xff] }
 0x270   : > { %v1778_v15 = vpop.f32.mrf.mxu0  ;;  %v1293_v61 = vadd.f32 %v4715_v12, %v1099_v3  ;;  %2070 = vmatpush.msra.mxu1 %v2053_v54  ;;  %v3288_v54 = vld [vmem:[%s3728_s25 + $0x12a] sm:$0xff] }
 0x271   : > { %v1874_v41 = vadd.f32 %v1778_v15, %v1680_v21 }
 0x272   : > { %v1488_v27 = vadd.f32 %v4873_v42, %v1293_v61  ;;  %v1294_v42 = vadd.f32 %v4733_v55, %v1100_v17 }
 0x273   : > { %1825 = vmatmul.f32.gmra.mxu0 %v3283_v59  ;;  %v1910_v56 = vadd.f32 %v4938_v6, %v1874_v41  ;;  %v3285_v59 = vld [vmem:[%s3728_s25 + $0x10a] sm:$0xff]  ;;  %v4965_v41 = vpop.f32.mrf.mxu1  ;;  %v4972_v39 = vpop.f32.mrf.mxu2 }
 0x274   : > { %v1682_v12 = vadd.f32 %v4875_v18, %v1488_v27  ;;  %v1101_v18 = vadd.f32 %v4642_v32, %v4363_v24  ;;  %v2068_v24 = vld [vmem:[%s5789_s3 + $0xf0] sm:$0xff] }
 0x275   : > { %1942 = vxpose.xlu1.b32.start [1/16] %v1910_v56, 128  ;;  %v1489_v56 = vadd.f32 %v4882_v33, %v1294_v42  ;;  %2136 = vmatpush.msrb.mxu2 %v2068_v24 }
 0x276   : > { %v4977_v3 = vpop.f32.mrf.mxu3 }
 0x277   : > { %v1683_v55 = vadd.f32 %v4884_v43, %v1489_v56  ;;  %v1102_v43 = vadd.f32 %v4654_v8, %v4384_v25  ;;  %v1103_v8 = vadd.f32 %v4663_v20, %v4402_v16  ;;  %v2067_v16 = vld [vmem:[%s5789_s3 + $0xe8] sm:$0xff] }
 0x278   : > { %v1781_v52 = vpop.f32.mrf.mxu0  ;;  %2137 = vmatpush.msrb.mxu2 %v2067_v16 }
 0x279   : > { %v1875_v19 = vadd.f32 %v1781_v52, %v1681_v7  ;;  %v3286_v52 = vld [vmem:[%s3728_s25 + $0x112] sm:$0xff]  ;;  %v1296_v60 = vadd.f32 %v4765_v23, %v1102_v43  ;;  %v1297_v56 = vadd.f32 %v4789_v38, %v1103_v8  ;;  %v3290_v43 = vld [vmem:[%s3728_s25 + $0x142] sm:$0xff] }
 0x27a   : > { %v2050_v8 = vld [vmem:[%s5789_s3 + $0x60] sm:$0xff] }
 0x27b   : > { %1828 = vmatmul.f32.gmra.mxu0 %v3284_v31  ;;  %v1911_v21 = vadd.f32 %v4938_v6, %v1875_v19  ;;  %v1295_v31 = vadd.f32 %v4751_v53, %v1101_v18  ;;  %v4986_v32 = vpop.f32.mrf.mxu1  ;;  %v4990_v27 = vpop.f32.mrf.mxu2 }
 0x27d   : > { %1943 = vxpose.xlu1.b32.cont [2/16] %v1911_v21, 128  ;;  %v1490_v61 = vadd.f32 %v4891_v5, %v1295_v31  ;;  %v3287_v5 = vld [vmem:[%s3728_s25 + $0x122] sm:$0xff] }
 0x27f   : > { %v1684_v53 = vadd.f32 %v4894_v40, %v1490_v61  ;;  %v2051_v61 = vld [vmem:[%s5789_s3 + $0x68] sm:$0xff] }
 0x280   : > { %v1784_v15 = vpop.f32.mrf.mxu0 }
 0x281   : > { %v1876_v14 = vadd.f32 %v1784_v15, %v1682_v12  ;;  %v4995_v12 = vpop.f32.mrf.mxu3  ;;  %v2052_v15 = vld [vmem:[%s5789_s3 + $0x70] sm:$0xff] }
 0x282   : > { %2071 = vmatpush.msra.mxu1 %v2052_v15  ;;  %v3291_v15 = vld [vmem:[%s3728_s25 + $0x152] sm:$0xff] }
 0x283   : > { %1831 = vmatmul.f32.gmra.mxu0 %v3285_v59  ;;  %v1912_v1 = vadd.f32 %v4938_v6, %v1876_v14  ;;  %v1491_v59 = vadd.f32 %v4901_v47, %v1296_v60  ;;  %v5004_v40 = vpop.f32.mrf.mxu1  ;;  %v5007_v42 = vpop.f32.mrf.mxu2 }
 0x284   : > { %2072 = vmatpush.msra.mxu1 %v2051_v61 }
 0x285   : > { %1944 = vxpose.xlu1.b32.cont [3/16] %v1912_v1, 128  ;;  %v1685_v23 = vadd.f32 %v4906_v10, %v1491_v59  ;;  %v1492_v1 = vadd.f32 %v4914_v0, %v1297_v56  ;;  %v1104_v10 = vadd.f32 %v4680_v37, %v4423_v26  ;;  %v1105_v37 = vadd.f32 %v4694_v34, %v4441_v46  ;;  %v2066_v46 = vld [vmem:[%s5789_s3 + $0xe0] sm:$0xff] }
 0x286   : > { %2138 = vmatpush.msrb.mxu2 %v2066_v46  ;;  %2073 = vmatpush.msra.mxu1 %v2050_v8  ;;  %v3292_v56 = vld [vmem:[%s3728_s25 + $0x15a] sm:$0xff] }
 0x288   : > { %v1787_v7 = vpop.f32.mrf.mxu0 }
 0x289   : > { %v1877_v33 = vadd.f32 %v1787_v7, %v1683_v55  ;;  %v5016_v20 = vpop.f32.mrf.mxu3  ;;  %v1686_v55 = vadd.f32 %v4917_v51, %v1492_v1  ;;  %v3289_v7 = vld [vmem:[%s3728_s25 + $0x13a] sm:$0xff] }
 0x28b   : > { %1834 = vmatmul.f32.gmra.mxu0 %v3286_v52  ;;  %v1913_v19 = vadd.f32 %v4938_v6, %v1877_v33  ;;  %v5021_v38 = vpop.f32.mrf.mxu1  ;;  %v1298_v52 = vadd.f32 %v4810_v29, %v1104_v10  ;;  %v5025_v33 = vpop.f32.mrf.mxu2 }
 0x28d   : > { %1945 = vxpose.xlu1.b32.cont [4/16] %v1913_v19, 128  ;;  %v1493_v19 = vadd.f32 %v4928_v62, %v1298_v52  ;;  %v2049_v52 = vld [vmem:[%s5789_s3 + $0x58] sm:$0xff] }
 0x28e   : > { %2074 = vmatpush.msra.mxu1 %v2049_v52 }
 0x28f   : > { %v1687_v29 = vadd.f32 %v4932_v63, %v1493_v19  ;;  %v1106_v63 = vadd.f32 %v4709_v35, %v4460_v22 }
 0x290   : > { %v1790_v21 = vpop.f32.mrf.mxu0 }
 0x291   : > { %v1878_v17 = vadd.f32 %v1790_v21, %v1684_v53  ;;  %v5034_v51 = vpop.f32.mrf.mxu3  ;;  %v1299_v53 = vadd.f32 %v4947_v4, %v1105_v37  ;;  %v1300_v59 = vadd.f32 %v4965_v41, %v1106_v63 }
 0x293   : > { %1837 = vmatmul.f32.gmra.mxu0 %v3287_v5  ;;  %v1914_v25 = vadd.f32 %v4938_v6, %v1878_v17  ;;  %v5039_v5 = vpop.f32.mrf.mxu1  ;;  %v1494_v62 = vadd.f32 %v4951_v48, %v1299_v53  ;;  %v5046_v34 = vpop.f32.mrf.mxu2  ;;  %v2064_v53 = vld [vmem:[%s5789_s3 + $0xd0] sm:$0xff] }
 0x295   : > { %1946 = vxpose.xlu1.b32.cont [5/16] %v1914_v25, 128  ;;  %v1688_v4 = vadd.f32 %v4960_v2, %v1494_v62  ;;  %v1107_v2 = vadd.f32 %v4723_v36, %v4493_v57  ;;  %v2065_v57 = vld [vmem:[%s5789_s3 + $0xd8] sm:$0xff]  ;;  %v1108_v36 = vadd.f32 %v4740_v45, %v4532_v9 }
 0x296   : > { %2139 = vmatpush.msrb.mxu2 %v2065_v57 }
 0x298   : > { %v1793_v14 = vpop.f32.mrf.mxu0  ;;  %2140 = vmatpush.msrb.mxu2 %v2064_v53  ;;  %v5879_v53 = vld [vmem:[#allocation8_spill] sm:$0xff] }
 0x299   : > { %v1879_v47 = vadd.f32 %v1793_v14, %v1685_v23  ;;  %v5051_v17 = vpop.f32.mrf.mxu3  ;;  %v1495_v23 = vadd.f32 %v4972_v39, %v1300_v59  ;;  %v5872_v59 = vld [vmem:[#allocation22_spill] sm:$0xff] }
 0x29b   : > { %1840 = vmatmul.f32.gmra.mxu0 %v3288_v54  ;;  %v1915_v18 = vadd.f32 %v4938_v6, %v1879_v47  ;;  %v5060_v35 = vpop.f32.mrf.mxu1  ;;  %v5064_v14 = vpop.f32.mrf.mxu2  ;;  %v1689_v41 = vadd.f32 %v4977_v3, %v1495_v23  ;;  %v1301_v47 = vadd.f32 %v4986_v32, %v1107_v2  ;;  %v3297_v2 = vld [vmem:[%s3728_s25 + $0x19a] sm:$0xff] }
 0x29d   : > { %1947 = vxpose.xlu1.b32.cont [6/16] %v1915_v18, 128  ;;  %v1496_v18 = vadd.f32 %v4990_v27, %v1301_v47  ;;  %v3293_v27 = vld [vmem:[%s3728_s25 + $0x16a] sm:$0xff] }
 0x29f   : > { %v1690_v32 = vadd.f32 %v4995_v12, %v1496_v18  ;;  %v1109_v12 = vadd.f32 %v4754_v11, %v4557_v44  ;;  %v1110_v44 = vadd.f32 %v4768_v49, %v4570_v28  ;;  %v1111_v49 = vadd.f32 %v4780_v13, %v4589_v30  ;;  %v5875_v18 = vld [vmem:[#allocation20_spill] sm:$0xff] }
 0x2a0   : > { %v1796_v0 = vpop.f32.mrf.mxu0 }
 0x2a1   : > { %v1880_v31 = vadd.f32 %v1796_v0, %v1686_v55  ;;  %v5069_v1 = vpop.f32.mrf.mxu3  ;;  %v1302_v0 = vadd.f32 %v5004_v40, %v1108_v36  ;;  %v1303_v37 = vadd.f32 %v5021_v38, %v1109_v12  ;;  %v5878_v12 = vld [vmem:[#allocation25_spill] sm:$0xff] }
 0x2a3   : > { %1843 = vmatmul.f32.gmra.mxu0 %v3289_v7  ;;  %v1916_v26 = vadd.f32 %v4938_v6, %v1880_v31  ;;  %v1240_v3 = vpop.f32.mrf.mxu1  ;;  %v5079_v10 = vpop.f32.mrf.mxu2  ;;  %v1497_v31 = vadd.f32 %v5007_v42, %v1302_v0  ;;  %v1498_v42 = vadd.f32 %v5025_v33, %v1303_v37 }
 0x2a5   : > { %1948 = vxpose.xlu1.b32.cont [7/16] %v1916_v26, 128  ;;  %v1691_v61 = vadd.f32 %v5016_v20, %v1497_v31  ;;  %v3294_v26 = vld [vmem:[%s3728_s25 + $0x172] sm:$0xff]  ;;  %v1692_v20 = vadd.f32 %v5034_v51, %v1498_v42 }
 0x2a8   : > { %v1799_v24 = vpop.f32.mrf.mxu0 }
 0x2a9   : > { %v1881_v21 = vadd.f32 %v1799_v24, %v1687_v29  ;;  %v1629_v45 = vpop.f32.mrf.mxu3 }
 0x2ab   : > { %1846 = vmatmul.f32.gmra.mxu0 %v3290_v43  ;;  %v1917_v60 = vadd.f32 %v4938_v6, %v1881_v21  ;;  %v1243_v19 = vpop.f32.mrf.mxu1  ;;  %v1438_v24 = vpop.f32.mrf.mxu2  ;;  %v1304_v21 = vadd.f32 %v5039_v5, %v1110_v44  ;;  %v5880_v44 = vld [vmem:[#allocation26_spill] sm:$0xff] }
 0x2ad   : > { %1949 = vxpose.xlu1.b32.cont [8/16] %v1917_v60, 128  ;;  %v2048_v60 = vld [vmem:[%s5789_s3 + $0x50] sm:$0xff]  ;;  %v1499_v46 = vadd.f32 %v5046_v34, %v1304_v21 }
 0x2ae   : > { %2075 = vmatpush.msra.mxu1 %v2048_v60 }
 0x2af   : > { %v1693_v51 = vadd.f32 %v5051_v17, %v1499_v46  ;;  %v5874_v17 = vld [vmem:[#allocation19_spill] sm:$0xff] }
 0x2b0   : > { %v1802_v48 = vpop.f32.mrf.mxu0 }
 0x2b1   : > { %v1882_v25 = vadd.f32 %v1802_v48, %v1688_v4  ;;  %v1632_v11 = vpop.f32.mrf.mxu3  ;;  %v1305_v48 = vadd.f32 %v5060_v35, %v1111_v49 }
 0x2b3   : > { %1849 = vmatmul.f32.gmra.mxu0 %v3291_v15  ;;  %v1918_v22 = vadd.f32 %v4938_v6, %v1882_v25  ;;  %v1246_v33 = vpop.f32.mrf.mxu1  ;;  %v1441_v28 = vpop.f32.mrf.mxu2  ;;  %v1500_v34 = vadd.f32 %v5064_v14, %v1305_v48  ;;  %v5873_v25 = vld [vmem:[#allocation5_spill] sm:$0xff]  ;;  %v2047_v14 = vld [vmem:[%s5789_s3 + $0x48] sm:$0xff] }
 0x2b4   : > { %v1112_v8 = vadd.f32 %v5874_v17, %v5873_v25  ;;  %2076 = vmatpush.msra.mxu1 %v2047_v14 }
 0x2b5   : > { %1950 = vxpose.xlu1.b32.cont [9/16] %v1918_v22, 128  ;;  %v1694_v22 = vadd.f32 %v5069_v1, %v1500_v34 }
 0x2b8   : > { %v1805_v54 = vpop.f32.mrf.mxu0 }
 0x2b9   : > { %v1883_v39 = vadd.f32 %v1805_v54, %v1689_v41  ;;  %v1635_v5 = vpop.f32.mrf.mxu3  ;;  %v1306_v41 = vadd.f32 %v1240_v3, %v1112_v8  ;;  %v5883_v8 = vld [vmem:[#allocation12_spill] sm:$0xff] }
 0x2bb   : > { %1852 = vmatmul.f32.gmra.mxu0 %v3292_v56  ;;  %v1919_v16 = vadd.f32 %v4938_v6, %v1883_v39  ;;  %v1249_v13 = vpop.f32.mrf.mxu1  ;;  %v1444_v23 = vpop.f32.mrf.mxu2  ;;  %v1501_v47 = vadd.f32 %v5079_v10, %v1306_v41 }
 0x2bd   : > { %1951 = vxpose.xlu1.b32.cont [10/16] %v1919_v16, 128  ;;  %v5876_v16 = vld [vmem:[#allocation21_spill] sm:$0xff]  ;;  %v1695_v36 = vadd.f32 %v1629_v45, %v1501_v47 }
 0x2be   : > { %v1113_v57 = vadd.f32 %v5876_v16, %v5875_v18  ;;  %v5885_v16 = vld [vmem:[#allocation14_spill] sm:$0xff] }
 0x2c0   : > { %v1808_v55 = vpop.f32.mrf.mxu0 }
 0x2c1   : > { %v1884_v7 = vadd.f32 %v1808_v55, %v1690_v32  ;;  %v1638_v56 = vpop.f32.mrf.mxu3  ;;  %v3298_v55 = vld [vmem:[%s3728_s25 + $0x1a2] sm:$0xff]  ;;  %s2923_s25 = scalar_lea.hbm %s5791_s5, %s3352_s8 }
 0x2c2   : > { %s2926_s12 = sshll.u32 %s2923_s25, 4  ;;  %s2927_s12 = int_to_ptr.hbm [resolvable:$true] %s2926_s12 }
 0x2c3   : > { %1855 = vmatmul.f32.gmra.mxu0 %v3293_v27  ;;  %v1920_v9 = vadd.f32 %v4938_v6, %v1884_v7  ;;  %v1252_v1 = vpop.f32.mrf.mxu1  ;;  %v1447_v32 = vpop.f32.mrf.mxu2  ;;  %v1307_v27 = vadd.f32 %v1243_v19, %v1113_v57  ;;  %v2062_v7 = vld [vmem:[%s5789_s3 + $0xc0] sm:$0xff]  ;;  %s3506_s13 = sshra.s32 %s2927_s12, 4  ;;  %s3507_s13 = int_to_ptr.hbm [resolvable:$true] %s3506_s13 }
 0x2c4   : > { %v5886_v57 = vld [vmem:[#allocation29_spill] sm:$0xff]  ;;  %s3508_s14 = scalar_lea.hbm %s3507_s13, 256  ;;  %p3513_p0 = scmp.lt.s32.totalorder %s3507_s13, %s5791_s5 }
 0x2c5   : > { %1952 = vxpose.xlu1.b32.cont [11/16] %v1920_v9, 128  ;;  %v1502_v10 = vadd.f32 %v1438_v24, %v1307_v27  ;;  %v5877_v9 = vld [vmem:[#allocation6_spill] sm:$0xff]  ;;  %p3509_p11 = scmp.ne.s32.totalorder %s3507_s13, %s3508_s14  ;;  %p3514_p1 = scmp.lt.s32.totalorder %s3512_s17, %s3508_s14 }
 0x2c7   : > { %v1696_v45 = vadd.f32 %v1632_v11, %v1502_v10  ;;  %p3510_p12 = pnand %p3509_p11, %p3626_p5  ;;  %p3515_p2 = por %p3514_p1, %p3513_p0 }
 0x2c8   : > { %v1811_v40 = vpop.f32.mrf.mxu0 }
 0x2c9   : > { %v1885_v29 = vadd.f32 %v1811_v40, %v1691_v61  ;;  %v1641_v31 = vpop.f32.mrf.mxu3  ;;  %v1114_v61 = vadd.f32 %v5878_v12, %v5877_v9  ;;  %v5887_v9 = vld [vmem:[#allocation16_spill] sm:$0xff]  ;;  %v5888_v12 = vld [vmem:[#allocation30_spill] sm:$0xff]  ;;  %p3511_p13 = pneg %p3510_p12 }
 0x2cb   : > { %1858 = vmatmul.f32.gmra.mxu0 %v3294_v26  ;;  %v1921_v43 = vadd.f32 %v4938_v6, %v1885_v29  ;;  %v1255_v40 = vpop.f32.mrf.mxu1  ;;  %v1308_v37 = vadd.f32 %v1246_v33, %v1114_v61  ;;  %v2046_v29 = vld [vmem:[%s5789_s3 + $0x40] sm:$0xff]  ;;  %v1450_v42 = vpop.f32.mrf.mxu2  ;;  %v2061_v33 = vld [vmem:[%s5789_s3 + $0xb8] sm:$0xff]  ;;  %v1119_v61 = vadd.f32 %v5888_v12, %v5887_v9  ;;  %p3516_p3 = pnand %p3515_p2, %p3511_p13 }
 0x2cc   : > { %2077 = vmatpush.msra.mxu1 %v2046_v29  ;;  %v2059_v29 = vld [vmem:[%s5789_s3 + $0xa8] sm:$0xff]  ;;  %v5897_v12 = vld [vmem:[#allocation13_spill] sm:$0xff] }
 0x2cd   : > { %1953 = vxpose.xlu1.b32.cont [12/16] %v1921_v43, 128  ;;  %v1503_v24 = vadd.f32 %v1441_v28, %v1308_v37 }
 0x2cf   : > { %v1697_v21 = vadd.f32 %v1635_v5, %v1503_v24 }
 0x2d0   : > { %v1814_v38 = vpop.f32.mrf.mxu0 }
 0x2d1   : > { %v1886_v62 = vadd.f32 %v1814_v38, %v1692_v20  ;;  %v1115_v20 = vadd.f32 %v5880_v44, %v5879_v53  ;;  %v1644_v38 = vpop.f32.mrf.mxu3  ;;  %v5889_v53 = vld [vmem:[#allocation18_spill] sm:$0xff]  ;;  %v5890_v44 = vld [vmem:[#allocation31_spill] sm:$0xff] }
 0x2d3   : > { %1861 = vmatmul.f32.gmra.mxu0 %v4787_v50  ;;  %v1922_v63 = vadd.f32 %v4938_v6, %v1886_v62  ;;  %v2063_v50 = vld [vmem:[%s5789_s3 + $0xc8] sm:$0xff]  ;;  %v1309_v62 = vadd.f32 %v1249_v13, %v1115_v20  ;;  %v1258_v46 = vpop.f32.mrf.mxu1  ;;  %v1453_v49 = vpop.f32.mrf.mxu2  ;;  %v1120_v20 = vadd.f32 %v5890_v44, %v5889_v53  ;;  %v5899_v44 = vld [vmem:[#allocation15_spill] sm:$0xff] }
 0x2d4   : > { %2141 = vmatpush.msrb.mxu2 %v2063_v50 }
 0x2d5   : > { %1954 = vxpose.xlu1.b32.cont [13/16] %v1922_v63, 128  ;;  %v1504_v63 = vadd.f32 %v1444_v23, %v1309_v62  ;;  %v5884_v23 = vld [vmem:[#allocation28_spill] sm:$0xff] }
 0x2d6   : > { %2142 = vmatpush.msrb.mxu2 %v2062_v7  ;;  %v2044_v7 = vld [vmem:[%s5789_s3 + $0x30] sm:$0xff] }
 0x2d8   : > { %v1817_v4 = vpop.f32.mrf.mxu0  ;;  %2143 = vmatpush.msrb.mxu2 %v2061_v33  ;;  %v2043_v33 = vld [vmem:[%s5789_s3 + $0x28] sm:$0xff] }
 0x2d9   : > { %v1887_v15 = vadd.f32 %v1817_v4, %v1693_v51  ;;  %v5881_v51 = vld [vmem:[#allocation10_spill] sm:$0xff]  ;;  %v5882_v4 = vld [vmem:[#allocation27_spill] sm:$0xff]  ;;  %v1647_v50 = vpop.f32.mrf.mxu3 }
 0x2da   : > { %v1116_v48 = vadd.f32 %v5882_v4, %v5881_v51  ;;  %v5891_v51 = vld [vmem:[#allocation7_spill] sm:$0xff]  ;;  %v5892_v4 = vld [vmem:[#allocation32_spill] sm:$0xff] }
 0x2db   : > { %1864 = vmatmul.f32.gmra.mxu0 %v5872_v59  ;;  %v1923_v30 = vadd.f32 %v4938_v6, %v1887_v15  ;;  %v1698_v15 = vadd.f32 %v1638_v56, %v1504_v63  ;;  %v1261_v17 = vpop.f32.mrf.mxu1  ;;  %v2060_v56 = vld [vmem:[%s5789_s3 + $0xb0] sm:$0xff] }
 0x2dc   : > { %v1310_v34 = vadd.f32 %v1252_v1, %v1116_v48  ;;  %2144 = vmatpush.msrb.mxu2 %v2060_v56  ;;  %v1118_v1 = vadd.f32 %v5886_v57, %v5885_v16  ;;  %v1313_v37 = vadd.f32 %v1261_v17, %v1119_v61  ;;  %v1121_v48 = vadd.f32 %v5892_v4, %v5891_v51  ;;  %v5895_v57 = vld [vmem:[#allocation11_spill] sm:$0xff]  ;;  %v5901_v4 = vld [vmem:[#allocation17_spill] sm:$0xff] }
 0x2dd   : > { %1955 = vxpose.xlu1.b32.cont [14/16] %v1923_v30, 128  ;;  %v2045_v30 = vld [vmem:[%s5789_s3 + $0x38] sm:$0xff]  ;;  %v5898_v61 = vld [vmem:[#allocation35_spill] sm:$0xff] }
 0x2de   : > { %2078 = vmatpush.msra.mxu1 %v2045_v30  ;;  %v1505_v13 = vadd.f32 %v1447_v32, %v1310_v34  ;;  %v1312_v27 = vadd.f32 %v1258_v46, %v1118_v1  ;;  %2145 = vmatpush.msrb.mxu2 %v2059_v29  ;;  %v2058_v30 = vld [vmem:[%s5789_s3 + $0xa0] sm:$0xff]  ;;  %v5896_v1 = vld [vmem:[#allocation34_spill] sm:$0xff] }
 0x2e0   : > { %v1820_v35 = vpop.f32.mrf.mxu0  ;;  %2079 = vmatpush.msra.mxu1 %v2044_v7  ;;  %v1507_v10 = vadd.f32 %v1453_v49, %v1312_v27  ;;  %2146 = vmatpush.msrb.mxu2 %v2058_v30 }
 0x2e1   : > { %v1888_v54 = vadd.f32 %v1820_v35, %v1694_v22  ;;  %v1117_v22 = vadd.f32 %v5884_v23, %v5883_v8  ;;  %v1456_v35 = vpop.f32.mrf.mxu2  ;;  %v1650_v47 = vpop.f32.mrf.mxu3  ;;  %v5893_v23 = vld [vmem:[#allocation9_spill] sm:$0xff] }
 0x2e2   : > { %v1508_v24 = vadd.f32 %v1456_v35, %v1313_v37  ;;  %2080 = vmatpush.msra.mxu1 %v2043_v33 }
 0x2e3   : > { %1867 = vmatmul.f32.gmra.mxu0 %v3297_v2  ;;  %v1924_v39 = vadd.f32 %v4938_v6, %v1888_v54  ;;  %v1699_v2 = vadd.f32 %v1641_v31, %v1505_v13  ;;  %v1311_v54 = vadd.f32 %v1255_v40, %v1117_v22  ;;  %v2666_v13 = vld [vmem:[%s5790_s4 + $0x10] sm:$0xff]  ;;  %v5894_v22 = vld [vmem:[#allocation33_spill] sm:$0xff] }
 0x2e4   : > { %2731 = vmatpush.msrb.mxu3 %v2666_v13  ;;  %v1122_v35 = vadd.f32 %v5894_v22, %v5893_v23  ;;  %v2038_v13 = vld [vmem:[%s5789_s3] sm:$0xff] }
 0x2e5   : > { %1956 = vxpose.xlu1.b32.cont [15/16] %v1924_v39, 128  ;;  %v1506_v39 = vadd.f32 %v1450_v42, %v1311_v54 }
 0x2e7   : > { %v1700_v32 = vadd.f32 %v1644_v38, %v1506_v39 }
 0x2e8   : > { %v1823_v3 = vpop.f32.mrf.mxu0 }
 0x2e9   : > { %v1889_v0 = vadd.f32 %v1823_v3, %v1695_v36  ;;  %v1264_v36 = vpop.f32.mrf.mxu1  ;;  %v1459_v3 = vpop.f32.mrf.mxu2 }
 0x2ea   : > { %v1653_v31 = vpop.f32.mrf.mxu3  ;;  %v1314_v62 = vadd.f32 %v1264_v36, %v1120_v20  ;;  %v1123_v36 = vadd.f32 %v5896_v1, %v5895_v57  ;;  %v5900_v20 = vld [vmem:[#allocation36_spill] sm:$0xff] }
 0x2eb   : > { %1870 = vmatmul.f32.gmra.mxu0 %v3298_v55  ;;  %v1925_v52 = vadd.f32 %v4938_v6, %v1889_v0 }
 0x2ec   : > { %v1509_v63 = vadd.f32 %v1459_v3, %v1314_v62 }
 0x2ed   : > { %1957 = vxpose.xlu1.b32.end [16/16] %v1925_v52, 128 }
 0x2f0   : > { %v1826_v26 = vpop.f32.mrf.mxu0 }
 0x2f1   : > { %v1890_v19 = vadd.f32 %v1826_v26, %v1696_v45  ;;  %v1701_v45 = vadd.f32 %v1647_v50, %v1507_v10  ;;  %v1267_v40 = vpop.f32.mrf.mxu1  ;;  %v1462_v42 = vpop.f32.mrf.mxu2  ;;  %v2057_v10 = vld [vmem:[%s5789_s3 + $0x98] sm:$0xff] }
 0x2f2   : > { %v1656_v38 = vpop.f32.mrf.mxu3  ;;  %v1315_v34 = vadd.f32 %v1267_v40, %v1121_v48  ;;  %2147 = vmatpush.msrb.mxu2 %v2057_v10  ;;  %v5902_v48 = vld [vmem:[#allocation37_spill] sm:$0xff] }
 0x2f3   : > { %v1926_v43 = vadd.f32 %v4938_v6, %v1890_v19 }
 0x2f5   : > { %1974 = vxpose.xlu0.b32.start [1/16] %v1926_v43, 128 }
 0x2f8   : > { %v1829_v11 = vpop.f32.mrf.mxu0 }
 0x2f9   : > { %v1891_v60 = vadd.f32 %v1829_v11, %v1697_v21  ;;  %v1702_v21 = vadd.f32 %v1650_v47, %v1508_v24  ;;  %v1270_v46 = vpop.f32.mrf.mxu1  ;;  %v1465_v49 = vpop.f32.mrf.mxu2  ;;  %v2042_v47 = vld [vmem:[%s5789_s3 + $0x20] sm:$0xff] }
 0x2fa   : > { %v1659_v50 = vpop.f32.mrf.mxu3  ;;  %2081 = vmatpush.msra.mxu1 %v2042_v47 }
 0x2fb   : > { %v1927_v28 = vadd.f32 %v4938_v6, %v1891_v60 }
 0x2fd   : > { %1975 = vxpose.xlu0.b32.cont [2/16] %v1927_v28, 128 }
 0x300   : > { %v1832_v5 = vpop.f32.mrf.mxu0 }
 0x301   : > { %v1892_v59 = vadd.f32 %v1832_v5, %v1698_v15  ;;  %v1703_v15 = vadd.f32 %v1653_v31, %v1509_v63  ;;  %v1273_v8 = vpop.f32.mrf.mxu1 }
 0x302   : > { %v1662_v39 = vpop.f32.mrf.mxu3 }
 0x303   : > { %v1928_v25 = vadd.f32 %v4938_v6, %v1892_v59 }
 0x305   : > { %1976 = vxpose.xlu0.b32.cont [3/16] %v1928_v25, 128  ;;  %v1510_v25 = vadd.f32 %v1462_v42, %v1315_v34  ;;  %v2041_v42 = vld [vmem:[%s5789_s3 + $0x18] sm:$0xff]  ;;  %v2039_v34 = vld [vmem:[%s5789_s3 + $0x8] sm:$0xff] }
 0x306   : > { %2082 = vmatpush.msra.mxu1 %v2041_v42 }
 0x308   : > { %v1835_v41 = vpop.f32.mrf.mxu0 }
 0x309   : > { %v1893_v14 = vadd.f32 %v1835_v41, %v1699_v2  ;;  %v1468_v2 = vpop.f32.mrf.mxu2  ;;  %v1704_v41 = vadd.f32 %v1656_v38, %v1510_v25  ;;  %v1125_v38 = vadd.f32 %v5900_v20, %v5899_v44 }
 0x30a   : > { %v1665_v9 = vpop.f32.mrf.mxu3 }
 0x30b   : > { %v1929_v18 = vadd.f32 %v4938_v6, %v1893_v14  ;;  %v1316_v14 = vadd.f32 %v1270_v46, %v1122_v35  ;;  %v2056_v46 = vld [vmem:[%s5789_s3 + $0x90] sm:$0xff] }
 0x30c   : > { %2148 = vmatpush.msrb.mxu2 %v2056_v46 }
 0x30d   : > { %1977 = vxpose.xlu0.b32.cont [4/16] %v1929_v18, 128  ;;  %v1511_v18 = vadd.f32 %v1465_v49, %v1316_v14 }
 0x30f   : > { %v1705_v3 = vadd.f32 %v1659_v50, %v1511_v18  ;;  %v2040_v50 = vld [vmem:[%s5789_s3 + $0x10] sm:$0xff] }
 0x310   : > { %v1838_v55 = vpop.f32.mrf.mxu0  ;;  %2083 = vmatpush.msra.mxu1 %v2040_v50 }
 0x311   : > { %v1894_v0 = vadd.f32 %v1838_v55, %v1700_v32  ;;  %v1276_v32 = vpop.f32.mrf.mxu1  ;;  %v1471_v55 = vpop.f32.mrf.mxu2 }
 0x312   : > { %2084 = vmatpush.msra.mxu1 %v2039_v34 }
 0x313   : > { %v1930_v52 = vadd.f32 %v4938_v6, %v1894_v0  ;;  %v1317_v0 = vadd.f32 %v1273_v8, %v1123_v36 }
 0x314   : > { %2085 = vmatpush.msra.mxu1 %v2038_v13 }
 0x315   : > { %1978 = vxpose.xlu0.b32.cont [5/16] %v1930_v52, 128  ;;  %v1512_v52 = vadd.f32 %v1468_v2, %v1317_v0 }
 0x317   : > { %v1706_v40 = vadd.f32 %v1662_v39, %v1512_v52 }
 0x318   : > { %v1841_v26 = vpop.f32.mrf.mxu0 }
 0x319   : > { %v1895_v19 = vadd.f32 %v1841_v26, %v1701_v45  ;;  %v1124_v45 = vadd.f32 %v5898_v61, %v5897_v12  ;;  %v1279_v26 = vpop.f32.mrf.mxu1  ;;  %v1474_v24 = vpop.f32.mrf.mxu2 }
 0x31b   : > { %v1931_v43 = vadd.f32 %v4938_v6, %v1895_v19  ;;  %v1318_v19 = vadd.f32 %v1276_v32, %v1124_v45  ;;  %v5905_v32 = vld [vmem:[#allocation24_spill] sm:$0xff] }
 0x31d   : > { %1979 = vxpose.xlu0.b32.cont [6/16] %v1931_v43, 128  ;;  %v1513_v43 = vadd.f32 %v1471_v55, %v1318_v19 }
 0x320   : > { %v1844_v11 = vpop.f32.mrf.mxu0 }
 0x321   : > { %v1896_v60 = vadd.f32 %v1844_v11, %v1702_v21  ;;  %v1668_v21 = vpop.f32.mrf.mxu3  ;;  %v1707_v11 = vadd.f32 %v1665_v9, %v1513_v43  ;;  %v1282_v63 = vpop.f32.mrf.mxu1 }
 0x322   : > { %v1477_v51 = vpop.f32.mrf.mxu2 }
 0x323   : > { %v1932_v28 = vadd.f32 %v4938_v6, %v1896_v60  ;;  %v1319_v60 = vadd.f32 %v1279_v26, %v1125_v38 }
 0x325   : > { %1980 = vxpose.xlu0.b32.cont [7/16] %v1932_v28, 128  ;;  %v1514_v28 = vadd.f32 %v1474_v24, %v1319_v60 }
 0x327   : > { %v1708_v30 = vadd.f32 %v1668_v21, %v1514_v28 }
 0x328   : > { %v1847_v5 = vpop.f32.mrf.mxu0 }
 0x329   : > { %v1897_v59 = vadd.f32 %v1847_v5, %v1703_v15  ;;  %v1126_v15 = vadd.f32 %v5902_v48, %v5901_v4  ;;  %v2055_v5 = vld [vmem:[%s5789_s3 + $0x88] sm:$0xff]  ;;  %v1671_v25 = vpop.f32.mrf.mxu3  ;;  %v1285_v2 = vpop.f32.mrf.mxu1  ;;  %v2667_v48 = vld [vmem:[%s5790_s4 + $0x18] sm:$0xff] }
 0x32a   : > { %2149 = vmatpush.msrb.mxu2 %v2055_v5  ;;  %2796 = vmatpush.msrb.mxu1 %v2667_v48 }
 0x32b   : > { %v1933_v17 = vadd.f32 %v4938_v6, %v1897_v59  ;;  %v2054_v59 = vld [vmem:[%s5789_s3 + $0x80] sm:$0xff]  ;;  %v1320_v8 = vadd.f32 %v1282_v63, %v1126_v15 }
 0x32c   : > { %2150 = vmatpush.msrb.mxu2 %v2054_v59  ;;  %v2664_v63 = vld [vmem:[%s5790_s4] sm:$0xff] }
 0x32d   : > { %1981 = vxpose.xlu0.b32.cont [8/16] %v1933_v17, 128  ;;  %v1515_v22 = vadd.f32 %v1477_v51, %v1320_v8  ;;  %2732 = vmatpush.msrb.mxu3 %v2664_v63 }
 0x32f   : > { %v1709_v47 = vadd.f32 %v1671_v25, %v1515_v22 }
 0x330   : > { %v1850_v54 = vpop.f32.mrf.mxu0 }
 0x331   : > { %v1898_v56 = vadd.f32 %v1850_v54, %v1704_v41  ;;  %v5903_v41 = vld [vmem:[#allocation23_spill] sm:$0xff]  ;;  %v5904_v54 = vld [vmem:[#allocation38_spill] sm:$0xff]  ;;  %v1674_v57 = vpop.f32.mrf.mxu3  ;;  %v1288_v55 = vpop.f32.mrf.mxu1 }
 0x332   : > { %v1127_v14 = vadd.f32 %v5904_v54, %v5903_v41 }
 0x333   : > { %v1934_v16 = vadd.f32 %v4938_v6, %v1898_v56  ;;  %v1480_v56 = vpop.f32.mrf.mxu2 }
 0x334   : > { %v1321_v18 = vadd.f32 %v1285_v2, %v1127_v14 }
 0x335   : > { %1982 = vxpose.xlu0.b32.cont [9/16] %v1934_v16, 128 }
 0x336   : > { %v1516_v1 = vadd.f32 %v1480_v56, %v1321_v18 }
 0x338   : > { %v1853_v27 = vpop.f32.mrf.mxu0 }
 0x339   : > { %v1899_v7 = vadd.f32 %v1853_v27, %v1705_v3  ;;  %v1128_v3 = vadd.f32 %v4921_v58, %v5905_v32  ;;  %v1710_v27 = vadd.f32 %v1674_v57, %v1516_v1  ;;  %v1677_v12 = vpop.f32.mrf.mxu3 }
 0x33b   : > { %v1935_v31 = vadd.f32 %v4938_v6, %v1899_v7  ;;  %v1483_v0 = vpop.f32.mrf.mxu2  ;;  %v1322_v10 = vadd.f32 %v1288_v55, %v1128_v3 }
 0x33d   : > { %1983 = vxpose.xlu0.b32.cont [10/16] %v1935_v31, 128  ;;  %v1517_v31 = vadd.f32 %v1483_v0, %v1322_v10 }
 0x33f   : > { %v1711_v61 = vadd.f32 %v1677_v12, %v1517_v31 }
 0x340   : > { %v1856_v37 = vpop.f32.mrf.mxu0 }
 0x341   : > { %v1900_v29 = vadd.f32 %v1856_v37, %v1706_v40  ;;  %v5234_v37 = vpop.trf.xlu1 }
 0x342   : > { %v2006_v58 = vmul.f32 %v5234_v37, %v5234_v37 }
 0x343   : > { %v1936_v53 = vadd.f32 %v4938_v6, %v1900_v29 }
 0x344   : > { %2086 = vmatmul.f32.vlgmr.msra.gmra.mxu1 %v2006_v58 }
 0x345   : > { %1984 = vxpose.xlu0.b32.cont [11/16] %v1936_v53, 128 }
 0x348   : > { %v1859_v62 = vpop.f32.mrf.mxu0 }
 0x349   : > { %v1901_v33 = vadd.f32 %v1859_v62, %v1707_v11  ;;  %v5238_v19 = vpop.trf.xlu1 }
 0x34a   : > { %v2008_v29 = vmul.f32 %v5238_v19, %v5238_v19 }
 0x34b   : > { %v1937_v49 = vadd.f32 %v4938_v6, %v1901_v33 }
 0x34c   : > { %2089 = vmatmul.f32.gmra.mxu1 %v2008_v29 }
 0x34d   : > { %1985 = vxpose.xlu0.b32.cont [12/16] %v1937_v49, 128 }
 0x350   : > { %v1862_v17 = vpop.f32.mrf.mxu0 }
 0x351   : > { %v1902_v23 = vadd.f32 %v1862_v17, %v1708_v30  ;;  %v5242_v42 = vpop.trf.xlu1 }
 0x352   : > { %v2010_v24 = vmul.f32 %v5242_v42, %v5242_v42 }
 0x353   : > { %v1938_v35 = vadd.f32 %v4938_v6, %v1902_v23 }
 0x354   : > { %2092 = vmatmul.f32.gmra.mxu1 %v2010_v24 }
 0x355   : > { %1986 = vxpose.xlu0.b32.cont [13/16] %v1938_v35, 128 }
 0x358   : > { %v1865_v39 = vpop.f32.mrf.mxu0 }
 0x359   : > { %v1903_v16 = vadd.f32 %v1865_v39, %v1709_v47 }
 0x35b   : > { %v1939_v36 = vadd.f32 %v4938_v6, %v1903_v16 }
 0x35d   : > { %1987 = vxpose.xlu0.b32.cont [14/16] %v1939_v36, 128 }
 0x360   : > { %v1868_v7 = vpop.f32.mrf.mxu0 }
 0x361   : > { %v1904_v52 = vadd.f32 %v1868_v7, %v1710_v27 }
 0x363   : > { %v1940_v9 = vadd.f32 %v4938_v6, %v1904_v52  ;;  %v2665_v52 = vld [vmem:[%s5790_s4 + $0x8] sm:$0xff] }
 0x364   : > { %2797 = vmatpush.msrb.mxu1 %v2665_v52 }
 0x365   : > { %1988 = vxpose.xlu0.b32.cont [15/16] %v1940_v9, 128 }
 0x368   : > { %v1871_v45 = vpop.f32.mrf.mxu0 }
 0x369   : > { %v1905_v40 = vadd.f32 %v1871_v45, %v1711_v61 }
 0x36b   : > { %v1941_v26 = vadd.f32 %v4938_v6, %v1905_v40  ;;  %v5246_v6 = vpop.trf.xlu1 }
 0x36c   : > { %v2012_v43 = vmul.f32 %v5246_v6, %v5246_v6 }
 0x36d   : > { %1989 = vxpose.xlu0.b32.end [16/16] %v1941_v26, 128 }
 0x36e   : > { %2095 = vmatmul.f32.gmra.mxu1 %v2012_v43 }
 0x373   : > { %v5254_v20 = vpop.trf.xlu1 }
 0x374   : > { %v2014_v38 = vmul.f32 %v5254_v20, %v5254_v20 }
 0x376   : > { %2098 = vmatmul.f32.gmra.mxu1 %v2014_v38 }
 0x37b   : > { %v5262_v62 = vpop.trf.xlu1 }
 0x37c   : > { %v2016_v60 = vmul.f32 %v5262_v62, %v5262_v62 }
 0x37e   : > { %2101 = vmatmul.f32.gmra.mxu1 %v2016_v60 }
 0x383   : > { %v5273_v28 = vpop.trf.xlu1 }
 0x384   : > { %v2018_v49 = vmul.f32 %v5273_v28, %v5273_v28 }
 0x386   : > { %2104 = vmatmul.f32.gmra.mxu1 %v2018_v49 }
 0x38b   : > { %v5284_v15 = vpop.trf.xlu1 }
 0x38c   : > { %v2020_v50 = vmul.f32 %v5284_v15, %v5284_v15 }
 0x38e   : > { %2107 = vmatmul.f32.gmra.mxu1 %v2020_v50 }
 0x393   : > { %v5292_v59 = vpop.trf.xlu1 }
 0x394   : > { %v2022_v30 = vmul.f32 %v5292_v59, %v5292_v59 }
 0x396   : > { %2110 = vmatmul.f32.gmra.mxu1 %v2022_v30 }
 0x399   : > { %v5250_v53 = vpop.trf.xlu0 }
 0x39a   : > { %v2007_v44 = vmul.f32 %v5250_v53, %v5250_v53 }
 0x39b   : > { %v5300_v17 = vpop.trf.xlu1 }
 0x39c   : > { %2151 = vmatmul.f32.vlgmr.msrb.gmra.mxu2 %v2007_v44  ;;  %v2024_v8 = vmul.f32 %v5300_v17, %v5300_v17 }
 0x39e   : > { %2113 = vmatmul.f32.gmra.mxu1 %v2024_v8 }
 0x3a1   : > { %v5258_v21 = vpop.trf.xlu0 }
 0x3a2   : > { %v2009_v11 = vmul.f32 %v5258_v21, %v5258_v21 }
 0x3a3   : > { %v5308_v35 = vpop.trf.xlu1 }
 0x3a4   : > { %2154 = vmatmul.f32.gmra.mxu2 %v2009_v11  ;;  %v2026_v2 = vmul.f32 %v5308_v35, %v5308_v35 }
 0x3a6   : > { %2116 = vmatmul.f32.gmra.mxu1 %v2026_v2 }
 0x3a9   : > { %v5266_v33 = vpop.trf.xlu0 }
 0x3aa   : > { %v2011_v46 = vmul.f32 %v5266_v33, %v5266_v33 }
 0x3ab   : > { %v5316_v14 = vpop.trf.xlu1 }
 0x3ac   : > { %2157 = vmatmul.f32.gmra.mxu2 %v2011_v46  ;;  %v2028_v56 = vmul.f32 %v5316_v14, %v5316_v14 }
 0x3ae   : > { %2119 = vmatmul.f32.gmra.mxu1 %v2028_v56 }
 0x3b1   : > { %v5277_v51 = vpop.trf.xlu0 }
 0x3b2   : > { %v2013_v4 = vmul.f32 %v5277_v51, %v5277_v51 }
 0x3b3   : > { %v5324_v18 = vpop.trf.xlu1 }
 0x3b4   : > { %2160 = vmatmul.f32.gmra.mxu2 %v2013_v4  ;;  %v2030_v16 = vmul.f32 %v5324_v18, %v5324_v18 }
 0x3b6   : > { %2122 = vmatmul.f32.gmra.mxu1 %v2030_v16 }
 0x3b9   : > { %v5288_v5 = vpop.trf.xlu0 }
 0x3ba   : > { %v2015_v34 = vmul.f32 %v5288_v5, %v5288_v5 }
 0x3bb   : > { %v5332_v36 = vpop.trf.xlu1 }
 0x3bc   : > { %2163 = vmatmul.f32.gmra.mxu2 %v2015_v34  ;;  %v2032_v32 = vmul.f32 %v5332_v36, %v5332_v36 }
 0x3be   : > { %2125 = vmatmul.f32.gmra.mxu1 %v2032_v32 }
 0x3c1   : > { %v5296_v13 = vpop.trf.xlu0  ;;  %v2087_v45 = vpop.f32.mrf.mxu1 }
 0x3c2   : > { %v2017_v25 = vmul.f32 %v5296_v13, %v5296_v13 }
 0x3c3   : > { %v5340_v27 = vpop.trf.xlu1 }
 0x3c4   : > { %2166 = vmatmul.f32.gmra.mxu2 %v2017_v25  ;;  %v2034_v0 = vmul.f32 %v5340_v27, %v5340_v27 }
 0x3c6   : > { %2128 = vmatmul.f32.gmra.mxu1 %v2034_v0 }
 0x3c9   : > { %v5304_v23 = vpop.trf.xlu0  ;;  %v2090_v29 = vpop.f32.mrf.mxu1 }
 0x3ca   : > { %v2019_v22 = vmul.f32 %v5304_v23, %v5304_v23 }
 0x3cb   : > { %v5351_v31 = vpop.trf.xlu1 }
 0x3cc   : > { %2169 = vmatmul.f32.gmra.mxu2 %v2019_v22  ;;  %v2036_v9 = vmul.f32 %v5351_v31, %v5351_v31 }
 0x3ce   : > { %2131 = vmatmul.f32.gmra.mxu1 %v2036_v9 }
 0x3d1   : > { %v5312_v41 = vpop.trf.xlu0  ;;  %v2093_v38 = vpop.f32.mrf.mxu1 }
 0x3d2   : > { %v2021_v54 = vmul.f32 %v5312_v41, %v5312_v41 }
 0x3d4   : > { %2172 = vmatmul.f32.gmra.mxu2 %v2021_v54 }
 0x3d9   : > { %v5320_v47 = vpop.trf.xlu0 }
 0x3da   : > { %v2023_v39 = vmul.f32 %v5320_v47, %v5320_v47 }
 0x3dc   : > { %2175 = vmatmul.f32.gmra.mxu2 %v2023_v39 }
 0x3e1   : > { %v5328_v57 = vpop.trf.xlu0 }
 0x3e2   : > { %v2025_v1 = vmul.f32 %v5328_v57, %v5328_v57 }
 0x3e4   : > { %2178 = vmatmul.f32.gmra.mxu2 %v2025_v1 }
 0x3e9   : > { %v5336_v3 = vpop.trf.xlu0 }
 0x3ea   : > { %v2027_v55 = vmul.f32 %v5336_v3, %v5336_v3 }
 0x3eb   : > { %v2096_v11 = vpop.f32.mrf.mxu1 }
 0x3ec   : > { %2181 = vmatmul.f32.gmra.mxu2 %v2027_v55 }
 0x3f1   : > { %v5344_v7 = vpop.trf.xlu0 }
 0x3f2   : > { %v2029_v10 = vmul.f32 %v5344_v7, %v5344_v7 }
 0x3f3   : > { %v2099_v49 = vpop.f32.mrf.mxu1 }
 0x3f4   : > { %2184 = vmatmul.f32.gmra.mxu2 %v2029_v10 }
 0x3f9   : > { %v5355_v12 = vpop.trf.xlu0 }
 0x3fa   : > { %v2031_v61 = vmul.f32 %v5355_v12, %v5355_v12 }
 0x3fb   : > { %v5380_v56 = vpop.f32.mrf.mxu1 }
 0x3fc   : > { %2187 = vmatmul.f32.gmra.mxu2 %v2031_v61 }
 0x401   : > { %v5359_v40 = vpop.trf.xlu0 }
 0x402   : > { %v2033_v26 = vmul.f32 %v5359_v40, %v5359_v40 }
 0x404   : > { %2190 = vmatmul.f32.gmra.mxu2 %v2033_v26 }
 0x409   : > { %v5363_v58 = vpop.trf.xlu0 }
 0x40a   : > { %v2035_v24 = vmul.f32 %v5363_v58, %v5363_v58 }
 0x40c   : > { %2193 = vmatmul.f32.gmra.mxu2 %v2035_v24 }
 0x411   : > { %v5367_v43 = vpop.trf.xlu0 }
 0x412   : > { %v2037_v44 = vmul.f32 %v5367_v43, %v5367_v43 }
 0x414   : > { %2196 = vmatmul.f32.gmra.mxu2 %v2037_v44 }
 0x41f   : > { %v2152_v60 = vpop.f32.mrf.mxu2 }
 0x420   : > { %v5371_v46 = vadd.f32 %v2152_v60, %v2087_v45 }
 0x422   : > { %3428 = vrsqrt.f32 %v5371_v46  ;;  %vm2223_vm0 = vcmp.eq.f32.partialorder %v5371_v46, inf  ;;  %v2226_v32 = vand.u32 2147483648, %v5371_v46  ;;  %v2200_v55 = vadd.f32 1.0, %v5371_v46 }
 0x423   : > { %vm2225_vm1 = vcmp.eq.f32.partialorder %v5371_v46, 0.0 }
 0x427   : > { %v2155_v63 = vpop.f32.mrf.mxu2 }
 0x428   : > { %v3429_v4 = vpop.eup %3428  ;;  %v5374_v48 = vadd.f32 %v2155_v63, %v2090_v29 }
 0x429   : > { %v2217_v50 = vmul.f32 %v3429_v4, %v5371_v46 }
 0x42a   : > { %3430 = vrsqrt.f32 %v5374_v48  ;;  %vm2235_vm2 = vcmp.eq.f32.partialorder %v5374_v48, inf  ;;  %vm2237_vm3 = vcmp.eq.f32.partialorder %v5374_v48, 0.0 }
 0x42b   : > { %v2218_v34 = vmul.f32 %v3429_v4, %v2217_v50  ;;  %v2201_v50 = vadd.f32 1.0, %v5374_v48 }
 0x42d   : > { %v2219_v30 = vmul.f32 0.5, %v2218_v34 }
 0x42f   : > { %v2220_v25 = vsub.f32 1.5, %v2219_v30  ;;  %v2158_v8 = vpop.f32.mrf.mxu2 }
 0x430   : > { %v3431_v22 = vpop.eup %3430  ;;  %v5378_v2 = vadd.f32 %v2158_v8, %v2093_v38  ;;  %v5394_v38 = vpop.f32.mrf.mxu1 }
 0x431   : > { %v2221_v54 = vmul.f32 %v3429_v4, %v2220_v25  ;;  %v2229_v39 = vmul.f32 %v3431_v22, %v5374_v48  ;;  %v2238_v4 = vand.u32 2147483648, %v5374_v48 }
 0x432   : > { %3432 = vrsqrt.f32 %v5378_v2  ;;  %vm2247_vm7 = vcmp.eq.f32.partialorder %v5378_v2, inf  ;;  %vm2249_vm9 = vcmp.eq.f32.partialorder %v5378_v2, 0.0 }
 0x433   : > { %v2222_v16 = vmul.f32 %v2221_v54, %v5371_v46  ;;  %v2230_v1 = vmul.f32 %v3431_v22, %v2229_v39 }
 0x435   : > { %v2224_v0 = vsel %vm2223_vm0, %v5371_v46, %v2222_v16  ;;  %v2231_v10 = vmul.f32 0.5, %v2230_v1 }
 0x436   : > { %v2227_v52 = vsel %vm2225_vm1, %v2226_v32, %v2224_v0 }
 0x437   : > { %v2161_v9 = vpop.f32.mrf.mxu2  ;;  %v2408_v61 = vmul.f32 %v2227_v52, %v2200_v55  ;;  %v2232_v45 = vsub.f32 1.5, %v2231_v10 }
 0x438   : > { %v3433_v26 = vpop.eup %3432  ;;  %v5390_v29 = vadd.f32 %v2161_v9, %v2096_v11 }
 0x439   : > { %3434 = vrcp.f32 %v2408_v61  ;;  %v2233_v24 = vmul.f32 %v3431_v22, %v2232_v45  ;;  %v2241_v44 = vmul.f32 %v3433_v26, %v5378_v2  ;;  %v2435_v0 = vand.u32 2147483648, %v2408_v61 }
 0x43a   : > { %3436 = vrsqrt.f32 %v5390_v29  ;;  %v2433_v45 = vand.u32 2147483647, %v2408_v61  ;;  %vm2429_vm6 = vweird.f32 %v2408_v61  ;;  %vm2259_vm11 = vcmp.eq.f32.partialorder %v5390_v29, inf }
 0x43b   : > { %v2234_v60 = vmul.f32 %v2233_v24, %v5374_v48  ;;  %v2242_v63 = vmul.f32 %v3433_v26, %v2241_v44  ;;  %v2202_v24 = vadd.f32 1.0, %v5378_v2  ;;  %vm2261_vm12 = vcmp.eq.f32.partialorder %v5390_v29, 0.0 }
 0x43c   : > { %vm2434_vm10 = vcmp.eq.f32.partialorder %v2433_v45, 8.507059e+37 }
 0x43d   : > { %v2236_v11 = vsel %vm2235_vm2, %v5374_v48, %v2234_v60  ;;  %v2243_v34 = vmul.f32 0.5, %v2242_v63 }
 0x43e   : > { %v2239_v8 = vsel %vm2237_vm3, %v2238_v4, %v2236_v11  ;;  %v2250_v4 = vand.u32 2147483648, %v5378_v2 }
 0x43f   : > { %v3435_v30 = vpop.eup %3434  ;;  %v2164_v25 = vpop.f32.mrf.mxu2  ;;  %v5404_v16 = vmul.f32 %v2239_v8, %v2201_v50  ;;  %v2244_v1 = vsub.f32 1.5, %v2243_v34 }
 0x440   : > { %v3437_v22 = vpop.eup %3436  ;;  %v5402_v54 = vadd.f32 %v2164_v25, %v2099_v49  ;;  %v2425_v39 = vmul.f32 %v3435_v30, %v2408_v61  ;;  %vm2430_vm4 = vweird.f32 %v3435_v30  ;;  %v5409_v49 = vpop.f32.mrf.mxu1 }
 0x441   : > { %v2253_v32 = vmul.f32 %v3437_v22, %v5390_v29  ;;  %v2245_v10 = vmul.f32 %v3433_v26, %v2244_v1  ;;  %vm2431_vm8 = vmor %vm2429_vm6, %vm2430_vm4  ;;  %v2436_v26 = vor.u32 1.1754944e-38, %v2435_v0  ;;  %vm2444_vm14 = vweird.f32 %v5404_v16 }
 0x442   : > { %3438 = vrsqrt.f32 %v5402_v54  ;;  %v2426_v55 = vsub.f32 1.0, %v2425_v39  ;;  %vm2271_vm2 = vcmp.eq.f32.partialorder %v5402_v54, inf  ;;  %vm2273_vm3 = vcmp.eq.f32.partialorder %v5402_v54, 0.0 }
 0x443   : > { %3440 = vrcp.f32 %v5404_v16  ;;  %v2254_v52 = vmul.f32 %v3437_v22, %v2253_v32  ;;  %v2246_v44 = vmul.f32 %v2245_v10, %v5378_v2 }
 0x444   : > { %v2427_v9 = vmul.f32 %v3435_v30, %v2426_v55 }
 0x445   : > { %v2255_v60 = vmul.f32 0.5, %v2254_v52  ;;  %v2248_v11 = vsel %vm2247_vm7, %v5378_v2, %v2246_v44  ;;  %v2262_v44 = vand.u32 2147483648, %v5390_v29 }
 0x446   : > { %v2428_v63 = vadd.f32 %v3435_v30, %v2427_v9  ;;  %v2251_v1 = vsel %vm2249_vm9, %v2250_v4, %v2248_v11 }
 0x447   : > { %v2167_v50 = vpop.f32.mrf.mxu2  ;;  %v2256_v34 = vsub.f32 1.5, %v2255_v60  ;;  %v5420_v55 = vmul.f32 %v2251_v1, %v2202_v24  ;;  %v2448_v24 = vand.u32 2147483647, %v5404_v16 }
 0x448   : > { %v3439_v25 = vpop.eup %3438  ;;  %v5418_v8 = vadd.f32 %v2167_v50, %v5380_v56  ;;  %v2432_v39 = vsel %vm2431_vm8, %v3435_v30, %v2428_v63  ;;  %v2203_v56 = vadd.f32 1.0, %v5390_v29 }
 0x449   : > { %v3441_v61 = vpop.eup %3440  ;;  %v2437_v32 = vsel %vm2434_vm10, %v2436_v26, %v2432_v39  ;;  %v2257_v10 = vmul.f32 %v3437_v22, %v2256_v34  ;;  %v2265_v52 = vmul.f32 %v3439_v25, %v5402_v54  ;;  %v5438_v26 = vpop.f32.mrf.mxu1  ;;  %vm2449_vm0 = vcmp.eq.f32.partialorder %v2448_v24, 8.507059e+37 }
 0x44a   : > { %3442 = vrsqrt.f32 %v5418_v8  ;;  %v2438_v0 = vmul.f32 %v2437_v32, %v5371_v46  ;;  %v2440_v9 = vmul.f32 %v3441_v61, %v5404_v16  ;;  %v2450_v46 = vand.u32 2147483648, %v5404_v16 }
 0x44b   : > { %3444 = vrcp.f32 %v5420_v55  ;;  %v2258_v45 = vmul.f32 %v2257_v10, %v5390_v29  ;;  %v2266_v22 = vmul.f32 %v3439_v25, %v2265_v52  ;;  %vm2445_vm13 = vweird.f32 %v3441_v61 }
 0x44c   : > { %3315 = vmatmul.msk.f32.vlgmr.msrb.gmra.mxu3 %vm2668_vm5, %v2438_v0  ;;  %3331 = vmatmul.msk.f32.vlgmr.msrb.gmra.mxu1 %vm2668_vm5, %v2438_v0  ;;  %v2441_v30 = vsub.f32 1.0, %v2440_v9  ;;  %vm2446_vm15 = vmor %vm2444_vm14, %vm2445_vm13  ;;  %v2451_v0 = vor.u32 1.1754944e-38, %v2450_v46  ;;  %v2463_v24 = vand.u32 2147483647, %v5420_v55  ;;  %vm2459_vm4 = vweird.f32 %v5420_v55 }
 0x44d   : > { %v2260_v63 = vsel %vm2259_vm11, %v5390_v29, %v2258_v45  ;;  %v2267_v4 = vmul.f32 0.5, %v2266_v22  ;;  %vm2283_vm10 = vcmp.eq.f32.partialorder %v5418_v8, inf  ;;  %vm2285_vm11 = vcmp.eq.f32.partialorder %v5418_v8, 0.0 }
 0x44e   : > { %v2442_v60 = vmul.f32 %v3441_v61, %v2441_v30  ;;  %v2263_v11 = vsel %vm2261_vm12, %v2262_v44, %v2260_v63  ;;  %v2465_v44 = vand.u32 2147483648, %v5420_v55  ;;  %vm2464_vm7 = vcmp.eq.f32.partialorder %v2463_v24, 8.507059e+37 }
 0x44f   : > { %v2170_v50 = vpop.f32.mrf.mxu2  ;;  %v5443_v32 = vmul.f32 %v2263_v11, %v2203_v56  ;;  %v2268_v10 = vsub.f32 1.5, %v2267_v4 }
 0x450   : > { %v3443_v34 = vpop.eup %3442  ;;  %v5441_v39 = vadd.f32 %v2170_v50, %v5394_v38  ;;  %v2443_v1 = vadd.f32 %v3441_v61, %v2442_v60  ;;  %v2204_v60 = vadd.f32 1.0, %v5402_v54 }
 0x451   : > { %v3445_v52 = vpop.eup %3444  ;;  %v2277_v9 = vmul.f32 %v3443_v34, %v5418_v8  ;;  %v2269_v56 = vmul.f32 %v3439_v25, %v2268_v10  ;;  %vm2474_vm9 = vweird.f32 %v5443_v32 }
 0x452   : > { %3446 = vrsqrt.f32 %v5441_v39  ;;  %v2447_v30 = vsel %vm2446_vm15, %v3441_v61, %v2443_v1  ;;  %v2455_v16 = vmul.f32 %v3445_v52, %v5420_v55  ;;  %vm2460_vm1 = vweird.f32 %v3445_v52 }
 0x453   : > { %v2452_v45 = vsel %vm2449_vm0, %v2451_v0, %v2447_v30  ;;  %3448 = vrcp.f32 %v5443_v32  ;;  %v2278_v46 = vmul.f32 %v3443_v34, %v2277_v9  ;;  %v2270_v63 = vmul.f32 %v2269_v56, %v5402_v54  ;;  %vm2461_vm6 = vmor %vm2459_vm4, %vm2460_vm1  ;;  %v5464_v30 = vpop.f32.mrf.mxu1 }
 0x454   : > { %v2453_v38 = vmul.f32 %v2452_v45, %v5374_v48  ;;  %v2456_v22 = vsub.f32 1.0, %v2455_v16  ;;  %v2274_v48 = vand.u32 2147483648, %v5402_v54  ;;  %v2466_v9 = vor.u32 1.1754944e-38, %v2465_v44 }
 0x455   : > { %v2279_v25 = vmul.f32 0.5, %v2278_v46  ;;  %v2272_v10 = vsel %vm2271_vm2, %v5402_v54, %v2270_v63  ;;  %vm2295_vm14 = vcmp.eq.f32.partialorder %v5441_v39, inf  ;;  %vm2297_vm15 = vcmp.eq.f32.partialorder %v5441_v39, 0.0 }
 0x456   : > { %3316 = vmatmul.msk.f32.gmra.mxu3 %vm2668_vm5, %v2453_v38  ;;  %3332 = vmatmul.msk.f32.gmra.mxu1 %vm2668_vm5, %v2453_v38  ;;  %v2457_v61 = vmul.f32 %v3445_v52, %v2456_v22  ;;  %v2275_v16 = vsel %vm2273_vm3, %v2274_v48, %v2272_v10  ;;  %v2480_v48 = vand.u32 2147483648, %v5443_v32 }
 0x457   : > { %v2173_v4 = vpop.f32.mrf.mxu2  ;;  %v2280_v45 = vsub.f32 1.5, %v2279_v25  ;;  %v5469_v46 = vmul.f32 %v2275_v16, %v2204_v60  ;;  %v2205_v25 = vadd.f32 1.0, %v5418_v8 }
 0x458   : > { %v3447_v50 = vpop.eup %3446  ;;  %v5460_v11 = vadd.f32 %v2173_v4, %v5409_v49  ;;  %v2458_v1 = vadd.f32 %v3445_v52, %v2457_v61  ;;  %v2478_v4 = vand.u32 2147483647, %v5443_v32 }
 0x459   : > { %v3449_v0 = vpop.eup %3448  ;;  %v2289_v38 = vmul.f32 %v3447_v50, %v5441_v39  ;;  %v2281_v55 = vmul.f32 %v3443_v34, %v2280_v45  ;;  %vm2489_vm1 = vweird.f32 %v5469_v46 }
 0x45a   : > { %3450 = vrsqrt.f32 %v5460_v11  ;;  %v2462_v22 = vsel %vm2461_vm6, %v3445_v52, %v2458_v1  ;;  %v2470_v49 = vmul.f32 %v3449_v0, %v5443_v32  ;;  %vm2475_vm8 = vweird.f32 %v3449_v0 }
 0x45b   : > { %v2467_v56 = vsel %vm2464_vm7, %v2466_v9, %v2462_v22  ;;  %v2290_v61 = vmul.f32 %v3447_v50, %v2289_v38  ;;  %3452 = vrcp.f32 %v5469_v46  ;;  %v2282_v34 = vmul.f32 %v2281_v55, %v5418_v8  ;;  %vm2476_vm12 = vmor %vm2474_vm9, %vm2475_vm8 }
 0x45c   : > { %v2468_v63 = vmul.f32 %v2467_v56, %v5378_v2  ;;  %v2471_v44 = vsub.f32 1.0, %v2470_v49  ;;  %v2286_v2 = vand.u32 2147483648, %v5418_v8  ;;  %vm2479_vm13 = vcmp.eq.f32.partialorder %v2478_v4, 8.507059e+37 }
 0x45d   : > { %v2291_v60 = vmul.f32 0.5, %v2290_v61  ;;  %v2284_v16 = vsel %vm2283_vm10, %v5418_v8, %v2282_v34  ;;  %v2481_v38 = vor.u32 1.1754944e-38, %v2480_v48  ;;  %v2206_v4 = vadd.f32 1.0, %v5441_v39 }
 0x45e   : > { %3317 = vmatmul.msk.f32.gmra.mxu3 %vm2668_vm5, %v2468_v63  ;;  %3333 = vmatmul.msk.f32.gmra.mxu1 %vm2668_vm5, %v2468_v63  ;;  %v2472_v52 = vmul.f32 %v3449_v0, %v2471_v44  ;;  %v2287_v22 = vsel %vm2285_vm11, %v2286_v2, %v2284_v16  ;;  %vm2307_vm3 = vcmp.eq.f32.partialorder %v5460_v11, inf  ;;  %vm2309_vm6 = vcmp.eq.f32.partialorder %v5460_v11, 0.0 }
 0x45f   : > { %v2176_v24 = vpop.f32.mrf.mxu2  ;;  %v2292_v45 = vsub.f32 1.5, %v2291_v60  ;;  %v5489_v56 = vmul.f32 %v2287_v22, %v2205_v25  ;;  %v2493_v60 = vand.u32 2147483647, %v5469_v46 }
 0x460   : > { %v3451_v1 = vpop.eup %3450  ;;  %v5484_v10 = vadd.f32 %v2176_v24, %v5438_v26  ;;  %v2473_v9 = vadd.f32 %v3449_v0, %v2472_v52  ;;  %v2117_v26 = vpop.f32.mrf.mxu1  ;;  %v2495_v24 = vand.u32 2147483648, %v5469_v46 }
 0x461   : > { %v2301_v32 = vmul.f32 %v3451_v1, %v5460_v11  ;;  %v2293_v55 = vmul.f32 %v3447_v50, %v2292_v45  ;;  %v3453_v61 = vpop.eup %3452  ;;  %vm2494_vm4 = vcmp.eq.f32.partialorder %v2493_v60, 8.507059e+37  ;;  %vm2504_vm8 = vweird.f32 %v5489_v56 }
 0x462   : > { %3454 = vrsqrt.f32 %v5484_v10  ;;  %v2477_v49 = vsel %vm2476_vm12, %v3449_v0, %v2473_v9  ;;  %v2485_v34 = vmul.f32 %v3453_v61, %v5469_v46  ;;  %v2298_v0 = vand.u32 2147483648, %v5441_v39 }
 0x463   : > { %v2482_v63 = vsel %vm2479_vm13, %v2481_v38, %v2477_v49  ;;  %v2302_v44 = vmul.f32 %v3451_v1, %v2301_v32  ;;  %3456 = vrcp.f32 %v5489_v56  ;;  %v2294_v48 = vmul.f32 %v2293_v55, %v5441_v39 }
 0x464   : > { %v2483_v52 = vmul.f32 %v2482_v63, %v5390_v29  ;;  %v2486_v50 = vsub.f32 1.0, %v2485_v34  ;;  %vm2490_vm0 = vweird.f32 %v3453_v61  ;;  %v2207_v49 = vadd.f32 1.0, %v5460_v11 }
 0x465   : > { %v2303_v29 = vmul.f32 0.5, %v2302_v44  ;;  %v2296_v2 = vsel %vm2295_vm14, %v5441_v39, %v2294_v48  ;;  %vm2491_vm2 = vmor %vm2489_vm1, %vm2490_vm0  ;;  %v2310_v46 = vand.u32 2147483648, %v5460_v11  ;;  %vm2319_vm13 = vcmp.eq.f32.partialorder %v5484_v10, inf }
 0x466   : > { %3318 = vmatmul.msk.f32.gmra.mxu3 %vm2668_vm5, %v2483_v52  ;;  %3334 = vmatmul.msk.f32.gmra.mxu1 %vm2668_vm5, %v2483_v52  ;;  %v2487_v45 = vmul.f32 %v3453_v61, %v2486_v50  ;;  %v2299_v38 = vsel %vm2297_vm15, %v2298_v0, %v2296_v2  ;;  %v2510_v2 = vand.u32 2147483648, %v5489_v56  ;;  %vm2321_vm14 = vcmp.eq.f32.partialorder %v5484_v10, 0.0 }
 0x467   : > { %v2179_v25 = vpop.f32.mrf.mxu2  ;;  %v2304_v22 = vsub.f32 1.5, %v2303_v29  ;;  %v5507_v32 = vmul.f32 %v2299_v38, %v2206_v4 }
 0x468   : > { %v3455_v9 = vpop.eup %3454  ;;  %v5505_v16 = vadd.f32 %v2179_v25, %v5464_v30  ;;  %v2488_v44 = vadd.f32 %v3453_v61, %v2487_v45  ;;  %v2496_v30 = vor.u32 1.1754944e-38, %v2495_v24  ;;  %v2120_v29 = vpop.f32.mrf.mxu1  ;;  %v2508_v24 = vand.u32 2147483647, %v5489_v56 }
 0x469   : > { %v2313_v55 = vmul.f32 %v3455_v9, %v5484_v10  ;;  %v3457_v63 = vpop.eup %3456  ;;  %v2305_v52 = vmul.f32 %v3451_v1, %v2304_v22  ;;  %vm2519_vm12 = vweird.f32 %v5507_v32 }
 0x46a   : > { %3458 = vrsqrt.f32 %v5505_v16  ;;  %v2500_v34 = vmul.f32 %v3457_v63, %v5489_v56  ;;  %v2492_v4 = vsel %vm2491_vm2, %v3453_v61, %v2488_v44  ;;  %vm2505_vm7 = vweird.f32 %v3457_v63 }
 0x46b   : > { %3460 = vrcp.f32 %v5507_v32  ;;  %v2306_v48 = vmul.f32 %v2305_v52, %v5460_v11  ;;  %v2497_v50 = vsel %vm2494_vm4, %v2496_v30, %v2492_v4  ;;  %v2314_v1 = vmul.f32 %v3455_v9, %v2313_v55  ;;  %vm2506_vm9 = vmor %vm2504_vm8, %vm2505_vm7 }
 0x46c   : > { %v2501_v0 = vsub.f32 1.0, %v2500_v34  ;;  %v2498_v25 = vmul.f32 %v2497_v50, %v5402_v54  ;;  %vm2509_vm10 = vcmp.eq.f32.partialorder %v2508_v24, 8.507059e+37  ;;  %v2523_v56 = vand.u32 2147483647, %v5507_v32 }
 0x46d   : > { %v2308_v45 = vsel %vm2307_vm3, %v5460_v11, %v2306_v48  ;;  %v2315_v22 = vmul.f32 0.5, %v2314_v1  ;;  %v2511_v48 = vor.u32 1.1754944e-38, %v2510_v2  ;;  %vm2331_vm3 = vcmp.eq.f32.partialorder %v5505_v16, inf }
 0x46e   : > { %v2502_v60 = vmul.f32 %v3457_v63, %v2501_v0  ;;  %v2311_v38 = vsel %vm2309_vm6, %v2310_v46, %v2308_v45  ;;  %3319 = vmatmul.msk.f32.gmra.mxu3 %vm2668_vm5, %v2498_v25  ;;  %3335 = vmatmul.msk.f32.gmra.mxu1 %vm2668_vm5, %v2498_v25  ;;  %v2525_v45 = vand.u32 2147483648, %v5507_v32  ;;  %vm2524_vm0 = vcmp.eq.f32.partialorder %v2523_v56, 8.507059e+37 }
 0x46f   : > { %v2182_v61 = vpop.f32.mrf.mxu2  ;;  %v5528_v55 = vmul.f32 %v2311_v38, %v2207_v49  ;;  %v2316_v34 = vsub.f32 1.5, %v2315_v22  ;;  %vm2333_vm4 = vcmp.eq.f32.partialorder %v5505_v16, 0.0 }
 0x470   : > { %v3459_v44 = vpop.eup %3458  ;;  %v5526_v52 = vadd.f32 %v2182_v61, %v2117_v26  ;;  %v2503_v30 = vadd.f32 %v3457_v63, %v2502_v60 }
 0x471   : > { %v3461_v54 = vpop.eup %3460  ;;  %v2325_v4 = vmul.f32 %v3459_v44, %v5505_v16  ;;  %v2317_v46 = vmul.f32 %v3455_v9, %v2316_v34  ;;  %v2322_v9 = vand.u32 2147483648, %v5484_v10  ;;  %vm2534_vm2 = vweird.f32 %v5528_v55 }
 0x472   : > { %3462 = vrsqrt.f32 %v5526_v52  ;;  %v2515_v50 = vmul.f32 %v3461_v54, %v5507_v32  ;;  %v2507_v0 = vsel %vm2506_vm9, %v3457_v63, %v2503_v30  ;;  %vm2520_vm11 = vweird.f32 %v3461_v54  ;;  %v2123_v63 = vpop.f32.mrf.mxu1 }
 0x473   : > { %3464 = vrcp.f32 %v5528_v55  ;;  %v2512_v26 = vsel %vm2509_vm10, %v2511_v48, %v2507_v0  ;;  %v2326_v1 = vmul.f32 %v3459_v44, %v2325_v4  ;;  %v2318_v2 = vmul.f32 %v2317_v46, %v5484_v10  ;;  %vm2521_vm15 = vmor %vm2519_vm12, %vm2520_vm11 }
 0x474   : > { %v2516_v49 = vsub.f32 1.0, %v2515_v50  ;;  %v2513_v25 = vmul.f32 %v2512_v26, %v5418_v8  ;;  %v2526_v32 = vor.u32 1.1754944e-38, %v2525_v45  ;;  %v2208_v48 = vadd.f32 1.0, %v5484_v10 }
 0x475   : > { %v2327_v60 = vmul.f32 0.5, %v2326_v1  ;;  %v2320_v30 = vsel %vm2319_vm13, %v5484_v10, %v2318_v2  ;;  %v2538_v45 = vand.u32 2147483647, %v5528_v55  ;;  %vm2343_vm8 = vcmp.eq.f32.partialorder %v5526_v52, inf }
 0x476   : > { %v2517_v61 = vmul.f32 %v3461_v54, %v2516_v49  ;;  %3320 = vmatmul.msk.f32.gmra.mxu3 %vm2668_vm5, %v2513_v25  ;;  %3336 = vmatmul.msk.f32.gmra.mxu1 %vm2668_vm5, %v2513_v25  ;;  %v2323_v50 = vsel %vm2321_vm14, %v2322_v9, %v2320_v30  ;;  %vm2345_vm9 = vcmp.eq.f32.partialorder %v5526_v52, 0.0 }
 0x477   : > { %v2185_v38 = vpop.f32.mrf.mxu2  ;;  %v2328_v34 = vsub.f32 1.5, %v2327_v60  ;;  %v5553_v46 = vmul.f32 %v2323_v50, %v2208_v48  ;;  %v2540_v60 = vand.u32 2147483648, %v5528_v55  ;;  %vm2539_vm7 = vcmp.eq.f32.partialorder %v2538_v45, 8.507059e+37 }
 0x478   : > { %v3463_v8 = vpop.eup %3462  ;;  %v5545_v24 = vadd.f32 %v2185_v38, %v2120_v29  ;;  %v2518_v22 = vadd.f32 %v3461_v54, %v2517_v61  ;;  %v2209_v38 = vadd.f32 1.0, %v5505_v16  ;;  %v2210_v45 = vadd.f32 1.0, %v5526_v52 }
 0x479   : > { %v3465_v4 = vpop.eup %3464  ;;  %v2337_v0 = vmul.f32 %v3463_v8, %v5526_v52  ;;  %v2329_v1 = vmul.f32 %v3459_v44, %v2328_v34  ;;  %vm2549_vm11 = vweird.f32 %v5553_v46 }
 0x47a   : > { %3466 = vrsqrt.f32 %v5545_v24  ;;  %v2522_v26 = vsel %vm2521_vm15, %v3461_v54, %v2518_v22  ;;  %v2530_v29 = vmul.f32 %v3465_v4, %v5528_v55  ;;  %vm2535_vm1 = vweird.f32 %v3465_v4  ;;  %v2126_v50 = vpop.f32.mrf.mxu1 }
 0x47b   : > { %v2527_v49 = vsel %vm2524_vm0, %v2526_v32, %v2522_v26  ;;  %v2338_v25 = vmul.f32 %v3463_v8, %v2337_v0  ;;  %3468 = vrcp.f32 %v5553_v46  ;;  %v2330_v56 = vmul.f32 %v2329_v1, %v5505_v16  ;;  %vm2536_vm6 = vmor %vm2534_vm2, %vm2535_vm1 }
 0x47c   : > { %v2528_v61 = vmul.f32 %v2527_v49, %v5441_v39  ;;  %v2531_v2 = vsub.f32 1.0, %v2530_v29  ;;  %v2334_v39 = vand.u32 2147483648, %v5505_v16  ;;  %v2541_v55 = vor.u32 1.1754944e-38, %v2540_v60 }
 0x47d   : > { %v2339_v9 = vmul.f32 0.5, %v2338_v25  ;;  %v2332_v32 = vsel %vm2331_vm3, %v5505_v16, %v2330_v56  ;;  %vm2355_vm13 = vcmp.eq.f32.partialorder %v5545_v24, inf  ;;  %vm2357_vm15 = vcmp.eq.f32.partialorder %v5545_v24, 0.0 }
 0x47e   : > { %v2532_v54 = vmul.f32 %v3465_v4, %v2531_v2  ;;  %3321 = vmatmul.msk.f32.gmra.mxu3 %vm2668_vm5, %v2528_v61  ;;  %3337 = vmatmul.msk.f32.gmra.mxu1 %vm2668_vm5, %v2528_v61  ;;  %v2335_v0 = vsel %vm2333_vm4, %v2334_v39, %v2332_v32 }
 0x47f   : > { %v2188_v22 = vpop.f32.mrf.mxu2  ;;  %v2340_v48 = vsub.f32 1.5, %v2339_v9  ;;  %v5573_v49 = vmul.f32 %v2335_v0, %v2209_v38  ;;  %v2555_v9 = vand.u32 2147483648, %v5553_v46 }
 0x480   : > { %v3467_v44 = vpop.eup %3466  ;;  %v5567_v30 = vadd.f32 %v2188_v22, %v2123_v63  ;;  %v2533_v34 = vadd.f32 %v3465_v4, %v2532_v54 }
 0x481   : > { %v2349_v26 = vmul.f32 %v3467_v44, %v5545_v24  ;;  %v2341_v1 = vmul.f32 %v3463_v8, %v2340_v48  ;;  %v3469_v63 = vpop.eup %3468  ;;  %v2346_v8 = vand.u32 2147483648, %v5526_v52  ;;  %vm2564_vm1 = vweird.f32 %v5573_v49 }
 0x482   : > { %3470 = vrsqrt.f32 %v5567_v30  ;;  %v2537_v29 = vsel %vm2536_vm6, %v3465_v4, %v2533_v34  ;;  %v2545_v54 = vmul.f32 %v3469_v63, %v5553_v46  ;;  %vm2550_vm10 = vweird.f32 %v3469_v63 }
 0x483   : > { %v2542_v25 = vsel %vm2539_vm7, %v2541_v55, %v2537_v29  ;;  %v2350_v61 = vmul.f32 %v3467_v44, %v2349_v26  ;;  %3472 = vrcp.f32 %v5573_v49  ;;  %v2342_v60 = vmul.f32 %v2341_v1, %v5526_v52  ;;  %vm2551_vm12 = vmor %vm2549_vm11, %vm2550_vm10 }
 0x484   : > { %v2543_v2 = vmul.f32 %v2542_v25, %v5460_v11  ;;  %v2546_v56 = vsub.f32 1.0, %v2545_v54  ;;  %v2553_v11 = vand.u32 2147483647, %v5553_v46  ;;  %v2211_v26 = vadd.f32 1.0, %v5545_v24 }
 0x485   : > { %v2351_v4 = vmul.f32 0.5, %v2350_v61  ;;  %v2344_v22 = vsel %vm2343_vm8, %v5526_v52, %v2342_v60  ;;  %v2358_v46 = vand.u32 2147483648, %v5545_v24  ;;  %vm2367_vm7 = vcmp.eq.f32.partialorder %v5567_v30, inf }
 0x486   : > { %3322 = vmatmul.msk.f32.gmra.mxu3 %vm2668_vm5, %v2543_v2  ;;  %3338 = vmatmul.msk.f32.gmra.mxu1 %vm2668_vm5, %v2543_v2  ;;  %v2547_v32 = vmul.f32 %v3469_v63, %v2546_v56  ;;  %v2347_v48 = vsel %vm2345_vm9, %v2346_v8, %v2344_v22  ;;  %v2129_v2 = vpop.f32.mrf.mxu1  ;;  %vm2554_vm14 = vcmp.eq.f32.partialorder %v2553_v11, 8.507059e+37  ;;  %vm2369_vm8 = vcmp.eq.f32.partialorder %v5567_v30, 0.0 }
 0x487   : > { %v2191_v38 = vpop.f32.mrf.mxu2  ;;  %v2352_v55 = vsub.f32 1.5, %v2351_v4  ;;  %v5590_v0 = vmul.f32 %v2347_v48, %v2210_v45 }
 0x488   : > { %v3471_v39 = vpop.eup %3470  ;;  %v5588_v34 = vadd.f32 %v2191_v38, %v2126_v50  ;;  %v2548_v25 = vadd.f32 %v3469_v63, %v2547_v32  ;;  %v2556_v50 = vor.u32 1.1754944e-38, %v2555_v9  ;;  %v2568_v38 = vand.u32 2147483647, %v5573_v49 }
 0x489   : > { %v2361_v29 = vmul.f32 %v3471_v39, %v5567_v30  ;;  %v3473_v1 = vpop.eup %3472  ;;  %v2353_v61 = vmul.f32 %v3467_v44, %v2352_v55  ;;  %v2570_v9 = vand.u32 2147483648, %v5573_v49  ;;  %vm2579_vm6 = vweird.f32 %v5590_v0 }
 0x48a   : > { %3474 = vrsqrt.f32 %v5588_v34  ;;  %v2560_v54 = vmul.f32 %v3473_v1, %v5573_v49  ;;  %v2552_v45 = vsel %vm2551_vm12, %v3469_v63, %v2548_v25  ;;  %vm2565_vm0 = vweird.f32 %v3473_v1 }
 0x48b   : > { %3476 = vrcp.f32 %v5590_v0  ;;  %v2354_v60 = vmul.f32 %v2353_v61, %v5545_v24  ;;  %v2557_v56 = vsel %vm2554_vm14, %v2556_v50, %v2552_v45  ;;  %v2362_v44 = vmul.f32 %v3471_v39, %v2361_v29  ;;  %vm2566_vm2 = vmor %vm2564_vm1, %vm2565_vm0 }
 0x48c   : > { %v2561_v8 = vsub.f32 1.0, %v2560_v54  ;;  %v2558_v4 = vmul.f32 %v2557_v56, %v5484_v10  ;;  %v2571_v45 = vor.u32 1.1754944e-38, %v2570_v9  ;;  %vm2569_vm3 = vcmp.eq.f32.partialorder %v2568_v38, 8.507059e+37 }
 0x48d   : > { %v2356_v22 = vsel %vm2355_vm13, %v5545_v24, %v2354_v60  ;;  %v2363_v48 = vmul.f32 0.5, %v2362_v44  ;;  %vm2379_vm12 = vcmp.eq.f32.partialorder %v5588_v34, inf  ;;  %vm2381_vm13 = vcmp.eq.f32.partialorder %v5588_v34, 0.0 }
 0x48e   : > { %v2562_v63 = vmul.f32 %v3473_v1, %v2561_v8  ;;  %v2359_v11 = vsel %vm2357_vm15, %v2358_v46, %v2356_v22  ;;  %3323 = vmatmul.msk.f32.gmra.mxu3 %vm2668_vm5, %v2558_v4  ;;  %3339 = vmatmul.msk.f32.gmra.mxu1 %vm2668_vm5, %v2558_v4  ;;  %v2132_v49 = vpop.f32.mrf.mxu1  ;;  %v2583_v4 = vand.u32 2147483647, %v5590_v0  ;;  %v2585_v22 = vand.u32 2147483648, %v5590_v0 }
 0x48f   : > { %v2194_v32 = vpop.f32.mrf.mxu2  ;;  %v5611_v29 = vmul.f32 %v2359_v11, %v2211_v26  ;;  %v2364_v50 = vsub.f32 1.5, %v2363_v48 }
 0x490   : > { %v3475_v55 = vpop.eup %3474  ;;  %v5609_v25 = vadd.f32 %v2194_v32, %v2129_v2  ;;  %v2563_v61 = vadd.f32 %v3473_v1, %v2562_v63  ;;  %vm2584_vm10 = vcmp.eq.f32.partialorder %v2583_v4, 8.507059e+37 }
 0x491   : > { %v3477_v10 = vpop.eup %3476  ;;  %v2373_v54 = vmul.f32 %v3475_v55, %v5588_v34  ;;  %v2365_v8 = vmul.f32 %v3471_v39, %v2364_v50  ;;  %v2370_v39 = vand.u32 2147483648, %v5567_v30  ;;  %vm2594_vm14 = vweird.f32 %v5611_v29 }
 0x492   : > { %3478 = vrsqrt.f32 %v5609_v25  ;;  %v2575_v60 = vmul.f32 %v3477_v10, %v5590_v0  ;;  %v2567_v56 = vsel %vm2566_vm2, %v3473_v1, %v2563_v61  ;;  %vm2580_vm4 = vweird.f32 %v3477_v10 }
 0x493   : > { %3480 = vrcp.f32 %v5611_v29  ;;  %v2572_v2 = vsel %vm2569_vm3, %v2571_v45, %v2567_v56  ;;  %v2374_v46 = vmul.f32 %v3475_v55, %v2373_v54  ;;  %v2366_v9 = vmul.f32 %v2365_v8, %v5567_v30  ;;  %vm2581_vm9 = vmor %vm2579_vm6, %vm2580_vm4 }
 0x494   : > { %v2576_v26 = vsub.f32 1.0, %v2575_v60  ;;  %v2573_v44 = vmul.f32 %v2572_v2, %v5505_v16  ;;  %v2586_v0 = vor.u32 1.1754944e-38, %v2585_v22  ;;  %v2212_v54 = vadd.f32 1.0, %v5567_v30 }
 0x495   : > { %v2375_v63 = vmul.f32 0.5, %v2374_v46  ;;  %v2368_v48 = vsel %vm2367_vm7, %v5567_v30, %v2366_v9  ;;  %v2598_v22 = vand.u32 2147483647, %v5611_v29  ;;  %v2600_v9 = vand.u32 2147483648, %v5611_v29 }
 0x496   : > { %v2577_v32 = vmul.f32 %v3477_v10, %v2576_v26  ;;  %3324 = vmatmul.msk.f32.gmra.mxu3 %vm2668_vm5, %v2573_v44  ;;  %3340 = vmatmul.msk.f32.gmra.mxu1 %vm2668_vm5, %v2573_v44  ;;  %v2371_v45 = vsel %vm2369_vm8, %v2370_v39, %v2368_v48  ;;  %vm2391_vm1 = vcmp.eq.f32.partialorder %v5609_v25, inf  ;;  %vm2393_vm2 = vcmp.eq.f32.partialorder %v5609_v25, 0.0 }
 0x497   : > { %v2197_v1 = vpop.f32.mrf.mxu2  ;;  %v2376_v61 = vsub.f32 1.5, %v2375_v63  ;;  %v5636_v8 = vmul.f32 %v2371_v45, %v2212_v54  ;;  %vm2599_vm0 = vcmp.eq.f32.partialorder %v2598_v22, 8.507059e+37 }
 0x498   : > { %v3479_v16 = vpop.eup %3478  ;;  %v5628_v38 = vadd.f32 %v2197_v1, %v2132_v49  ;;  %v2578_v11 = vadd.f32 %v3477_v10, %v2577_v32  ;;  %v2213_v1 = vadd.f32 1.0, %v5588_v34 }
 0x499   : > { %v3481_v50 = vpop.eup %3480  ;;  %v2385_v60 = vmul.f32 %v3479_v16, %v5609_v25  ;;  %v2377_v46 = vmul.f32 %v3475_v55, %v2376_v61  ;;  %v2601_v61 = vor.u32 1.1754944e-38, %v2600_v9  ;;  %vm2609_vm4 = vweird.f32 %v5636_v8 }
 0x49a   : > { %3482 = vrsqrt.f32 %v5628_v38  ;;  %v2582_v56 = vsel %vm2581_vm9, %v3477_v10, %v2578_v11  ;;  %v2590_v2 = vmul.f32 %v3481_v50, %v5611_v29  ;;  %vm2595_vm11 = vweird.f32 %v3481_v50 }
 0x49b   : > { %v2587_v26 = vsel %vm2584_vm10, %v2586_v0, %v2582_v56  ;;  %v2386_v44 = vmul.f32 %v3479_v16, %v2385_v60  ;;  %3484 = vrcp.f32 %v5636_v8  ;;  %v2378_v10 = vmul.f32 %v2377_v46, %v5588_v34  ;;  %vm2596_vm15 = vmor %vm2594_vm14, %vm2595_vm11 }
 0x49c   : > { %v2588_v49 = vmul.f32 %v2587_v26, %v5526_v52  ;;  %v2591_v32 = vsub.f32 1.0, %v2590_v2  ;;  %v2382_v52 = vand.u32 2147483648, %v5588_v34  ;;  %v2214_v29 = vadd.f32 1.0, %v5609_v25 }
 0x49d   : > { %v2387_v4 = vmul.f32 0.5, %v2386_v44  ;;  %v2380_v11 = vsel %vm2379_vm12, %v5588_v34, %v2378_v10  ;;  %vm2403_vm8 = vcmp.eq.f32.partialorder %v5628_v38, inf  ;;  %vm2405_vm9 = vcmp.eq.f32.partialorder %v5628_v38, 0.0 }
 0x49e   : > { %v2592_v63 = vmul.f32 %v3481_v50, %v2591_v32  ;;  %3325 = vmatmul.msk.f32.gmra.mxu3 %vm2668_vm5, %v2588_v49  ;;  %3341 = vmatmul.msk.f32.gmra.mxu1 %vm2668_vm5, %v2588_v49  ;;  %v2383_v0 = vsel %vm2381_vm13, %v2382_v52, %v2380_v11 }
 0x49f   : > { %v2388_v48 = vsub.f32 1.5, %v2387_v4  ;;  %v2421_v60 = vmul.f32 %v2383_v0, %v2213_v1 }
 0x4a0   : > { %v3483_v55 = vpop.eup %3482  ;;  %v2593_v39 = vadd.f32 %v3481_v50, %v2592_v63  ;;  %v2615_v63 = vand.u32 2147483648, %v5636_v8 }
 0x4a1   : > { %v2397_v54 = vmul.f32 %v3483_v55, %v5628_v38  ;;  %v2389_v56 = vmul.f32 %v3479_v16, %v2388_v48  ;;  %v3485_v2 = vpop.eup %3484  ;;  %3486 = vrcp.f32 %v2421_v60  ;;  %v2613_v16 = vand.u32 2147483647, %v5636_v8 }
 0x4a2   : > { %v2597_v45 = vsel %vm2596_vm15, %v3481_v50, %v2593_v39  ;;  %v2605_v49 = vmul.f32 %v3485_v2, %v5636_v8  ;;  %v2394_v50 = vand.u32 2147483648, %v5609_v25  ;;  %vm2610_vm3 = vweird.f32 %v3485_v2 }
 0x4a3   : > { %v2602_v26 = vsel %vm2599_vm0, %v2601_v61, %v2597_v45  ;;  %v2398_v46 = vmul.f32 %v3483_v55, %v2397_v54  ;;  %v2390_v32 = vmul.f32 %v2389_v56, %v5609_v25  ;;  %vm2611_vm6 = vmor %vm2609_vm4, %vm2610_vm3  ;;  %v2616_v61 = vor.u32 1.1754944e-38, %v2615_v63 }
 0x4a4   : > { %v2603_v44 = vmul.f32 %v2602_v26, %v5545_v24  ;;  %v2606_v9 = vsub.f32 1.0, %v2605_v49  ;;  %vm2614_vm7 = vcmp.eq.f32.partialorder %v2613_v16, 8.507059e+37  ;;  %v2215_v45 = vadd.f32 1.0, %v5628_v38 }
 0x4a5   : > { %v2399_v22 = vmul.f32 0.5, %v2398_v46  ;;  %v2392_v10 = vsel %vm2391_vm1, %v5609_v25, %v2390_v32  ;;  %v2630_v8 = vand.u32 2147483648, %v2421_v60  ;;  %vm2624_vm11 = vweird.f32 %v2421_v60 }
 0x4a6   : > { %3326 = vmatmul.msk.f32.gmra.mxu3 %vm2668_vm5, %v2603_v44  ;;  %3342 = vmatmul.msk.f32.gmra.mxu1 %vm2668_vm5, %v2603_v44  ;;  %v2607_v24 = vmul.f32 %v3485_v2, %v2606_v9  ;;  %v2395_v4 = vsel %vm2393_vm2, %v2394_v50, %v2392_v10  ;;  %v2406_v44 = vand.u32 2147483648, %v5628_v38 }
 0x4a7   : > { %v2400_v1 = vsub.f32 1.5, %v2399_v22  ;;  %v2422_v52 = vmul.f32 %v2395_v4, %v2214_v29  ;;  %v3487_v39 = vpop.eup %3486  ;;  %v2631_v16 = vor.u32 1.1754944e-38, %v2630_v8 }
 0x4a8   : > { %v2608_v11 = vadd.f32 %v3485_v2, %v2607_v24  ;;  %v2620_v0 = vmul.f32 %v3487_v39, %v2421_v60  ;;  %vm2625_vm10 = vweird.f32 %v3487_v39 }
 0x4a9   : > { %v2401_v48 = vmul.f32 %v3483_v55, %v2400_v1  ;;  %3488 = vrcp.f32 %v2422_v52  ;;  %vm2626_vm12 = vmor %vm2624_vm11, %vm2625_vm10  ;;  %v2645_v1 = vand.u32 2147483648, %v2422_v52  ;;  %vm2639_vm15 = vweird.f32 %v2422_v52 }
 0x4aa   : > { %v2612_v54 = vsel %vm2611_vm6, %v3485_v2, %v2608_v11  ;;  %v2621_v46 = vsub.f32 1.0, %v2620_v0  ;;  %v2628_v2 = vand.u32 2147483647, %v2421_v60 }
 0x4ab   : > { %v2402_v56 = vmul.f32 %v2401_v48, %v5628_v38  ;;  %v2617_v26 = vsel %vm2614_vm7, %v2616_v61, %v2612_v54  ;;  %v2643_v48 = vand.u32 2147483647, %v2422_v52  ;;  %v2646_v0 = vor.u32 1.1754944e-38, %v2645_v1 }
 0x4ac   : > { %v2618_v49 = vmul.f32 %v2617_v26, %v5567_v30  ;;  %v2622_v29 = vmul.f32 %v3487_v39, %v2621_v46  ;;  %vm2629_vm13 = vcmp.eq.f32.partialorder %v2628_v2, 8.507059e+37 }
 0x4ad   : > { %v2404_v55 = vsel %vm2403_vm8, %v5628_v38, %v2402_v56  ;;  %vm2644_vm1 = vcmp.eq.f32.partialorder %v2643_v48, 8.507059e+37 }
 0x4ae   : > { %v2407_v32 = vsel %vm2405_vm9, %v2406_v44, %v2404_v55  ;;  %3327 = vmatmul.msk.f32.gmra.mxu3 %vm2668_vm5, %v2618_v49  ;;  %3343 = vmatmul.msk.f32.gmra.mxu1 %vm2668_vm5, %v2618_v49  ;;  %v2623_v22 = vadd.f32 %v3487_v39, %v2622_v29 }
 0x4af   : > { %v2423_v9 = vmul.f32 %v2407_v32, %v2215_v45  ;;  %v3489_v50 = vpop.eup %3488 }
 0x4b0   : > { %v2635_v30 = vmul.f32 %v3489_v50, %v2422_v52  ;;  %v2627_v63 = vsel %vm2626_vm12, %v3487_v39, %v2623_v22  ;;  %vm2640_vm14 = vweird.f32 %v3489_v50 }
 0x4b1   : > { %3490 = vrcp.f32 %v2423_v9  ;;  %v2632_v10 = vsel %vm2629_vm13, %v2631_v16, %v2627_v63  ;;  %vm2641_vm0 = vmor %vm2639_vm15, %vm2640_vm14  ;;  %v2660_v26 = vand.u32 2147483648, %v2423_v9  ;;  %v2658_v44 = vand.u32 2147483647, %v2423_v9 }
 0x4b2   : > { %v2636_v24 = vsub.f32 1.0, %v2635_v30  ;;  %v2633_v4 = vmul.f32 %v2632_v10, %v5588_v34  ;;  %vm2654_vm3 = vweird.f32 %v2423_v9 }
 0x4b3   : > { %v2661_v52 = vor.u32 1.1754944e-38, %v2660_v26  ;;  %vm2659_vm6 = vcmp.eq.f32.partialorder %v2658_v44, 8.507059e+37 }
 0x4b4   : > { %v2637_v11 = vmul.f32 %v3489_v50, %v2636_v24 }
 0x4b6   : > { %3328 = vmatmul.msk.f32.gmra.mxu3 %vm2668_vm5, %v2633_v4  ;;  %3344 = vmatmul.msk.f32.gmra.mxu1 %vm2668_vm5, %v2633_v4  ;;  %v2638_v60 = vadd.f32 %v3489_v50, %v2637_v11 }
 0x4b7   : > { %v3491_v61 = vpop.eup %3490 }
 0x4b8   : > { %v2650_v54 = vmul.f32 %v3491_v61, %v2423_v9  ;;  %v2642_v39 = vsel %vm2641_vm0, %v3489_v50, %v2638_v60  ;;  %vm2655_vm2 = vweird.f32 %v3491_v61 }
 0x4b9   : > { %v2647_v45 = vsel %vm2644_vm1, %v2646_v0, %v2642_v39  ;;  %vm2656_vm4 = vmor %vm2654_vm3, %vm2655_vm2 }
 0x4ba   : > { %v2651_v56 = vsub.f32 1.0, %v2650_v54  ;;  %v2648_v34 = vmul.f32 %v2647_v45, %v5609_v25 }
 0x4bc   : > { %v2652_v46 = vmul.f32 %v3491_v61, %v2651_v56 }
 0x4be   : > { %v2653_v49 = vadd.f32 %v3491_v61, %v2652_v46  ;;  %3329 = vmatmul.msk.f32.gmra.mxu3 %vm2668_vm5, %v2648_v34  ;;  %3345 = vmatmul.msk.f32.gmra.mxu1 %vm2668_vm5, %v2648_v34 }
 0x4c0   : > { %v2657_v8 = vsel %vm2656_vm4, %v3491_v61, %v2653_v49 }
 0x4c1   : > { %v2662_v55 = vsel %vm2659_vm6, %v2661_v52, %v2657_v8 }
 0x4c2   : > { %v2663_v29 = vmul.f32 %v2662_v55, %v5628_v38 }
 0x4c6   : > { %3330 = vmatmul.msk.f32.gmra.mxu3 %vm2668_vm5, %v2663_v29  ;;  %3346 = vmatmul.msk.f32.gmra.mxu1 %vm2668_vm5, %v2663_v29 }
 0x4c9   : > { %v2799_v25 = vpop.f32.mrf.mxu1 }
 0x4ca   : > { %v2848_v2 = vmul.f32 %v2799_v25, %v5250_v53 }
 0x4cc   : > { %2880 = vst [vmem:[%s5687_s7 + $0x8] sm:$0xff] %v2848_v2 }
 0x4cf   : > { %v2734_v32 = vpop.f32.mrf.mxu3 }
 0x4d0   : > { %v2847_v38 = vmul.f32 %v2734_v32, %v5234_v37 }
 0x4d2   : > { %2879 = vst [vmem:[%s5687_s7] sm:$0xff] %v2847_v38 }
 0x4d3   : > { %v2802_v9 = vpop.f32.mrf.mxu1 }
 0x4d4   : > { %v2850_v50 = vmul.f32 %v2802_v9, %v5258_v21 }
 0x4d6   : > { %2882 = vst [vmem:[%s5687_s7 + $0x18] sm:$0xff] %v2850_v50 }
 0x4d9   : > { %v2737_v53 = vpop.f32.mrf.mxu3 }
 0x4da   : > { %v2849_v22 = vmul.f32 %v2737_v53, %v5238_v19 }
 0x4db   : > { %v2805_v16 = vpop.f32.mrf.mxu1 }
 0x4dc   : > { %2881 = vst [vmem:[%s5687_s7 + $0x10] sm:$0xff] %v2849_v22  ;;  %v2852_v30 = vmul.f32 %v2805_v16, %v5266_v33 }
 0x4de   : > { %2884 = vst [vmem:[%s5687_s7 + $0x28] sm:$0xff] %v2852_v30 }
 0x4e1   : > { %v2740_v63 = vpop.f32.mrf.mxu3 }
 0x4e2   : > { %v2851_v37 = vmul.f32 %v2740_v63, %v5242_v42 }
 0x4e3   : > { %v2808_v10 = vpop.f32.mrf.mxu1 }
 0x4e4   : > { %2883 = vst [vmem:[%s5687_s7 + $0x20] sm:$0xff] %v2851_v37  ;;  %v2854_v21 = vmul.f32 %v2808_v10, %v5277_v51 }
 0x4e6   : > { %2886 = vst [vmem:[%s5687_s7 + $0x38] sm:$0xff] %v2854_v21 }
 0x4e9   : > { %v2743_v24 = vpop.f32.mrf.mxu3 }
 0x4ea   : > { %v2853_v19 = vmul.f32 %v2743_v24, %v5246_v6 }
 0x4eb   : > { %v2811_v4 = vpop.f32.mrf.mxu1 }
 0x4ec   : > { %2885 = vst [vmem:[%s5687_s7 + $0x30] sm:$0xff] %v2853_v19  ;;  %v2856_v33 = vmul.f32 %v2811_v4, %v5288_v5 }
 0x4ee   : > { %2888 = vst [vmem:[%s5687_s7 + $0x48] sm:$0xff] %v2856_v33 }
 0x4f1   : > { %v2746_v1 = vpop.f32.mrf.mxu3 }
 0x4f2   : > { %v2855_v42 = vmul.f32 %v2746_v1, %v5254_v20 }
 0x4f3   : > { %v2814_v11 = vpop.f32.mrf.mxu1 }
 0x4f4   : > { %2887 = vst [vmem:[%s5687_s7 + $0x40] sm:$0xff] %v2855_v42  ;;  %v2858_v51 = vmul.f32 %v2814_v11, %v5296_v13 }
 0x4f6   : > { %2890 = vst [vmem:[%s5687_s7 + $0x58] sm:$0xff] %v2858_v51 }
 0x4f9   : > { %v2749_v48 = vpop.f32.mrf.mxu3 }
 0x4fa   : > { %v2857_v6 = vmul.f32 %v2749_v48, %v5262_v62 }
 0x4fb   : > { %v2817_v61 = vpop.f32.mrf.mxu1 }
 0x4fc   : > { %2889 = vst [vmem:[%s5687_s7 + $0x50] sm:$0xff] %v2857_v6  ;;  %v2860_v5 = vmul.f32 %v2817_v61, %v5304_v23 }
 0x4fe   : > { %2892 = vst [vmem:[%s5687_s7 + $0x68] sm:$0xff] %v2860_v5 }
 0x501   : > { %v2752_v60 = vpop.f32.mrf.mxu3 }
 0x502   : > { %v2859_v20 = vmul.f32 %v2752_v60, %v5273_v28 }
 0x503   : > { %v2820_v0 = vpop.f32.mrf.mxu1 }
 0x504   : > { %2891 = vst [vmem:[%s5687_s7 + $0x60] sm:$0xff] %v2859_v20  ;;  %v2862_v13 = vmul.f32 %v2820_v0, %v5312_v41 }
 0x506   : > { %2894 = vst [vmem:[%s5687_s7 + $0x78] sm:$0xff] %v2862_v13 }
 0x509   : > { %v2755_v54 = vpop.f32.mrf.mxu3 }
 0x50a   : > { %v2861_v62 = vmul.f32 %v2755_v54, %v5284_v15 }
 0x50b   : > { %v2823_v39 = vpop.f32.mrf.mxu1 }
 0x50c   : > { %2893 = vst [vmem:[%s5687_s7 + $0x70] sm:$0xff] %v2861_v62  ;;  %v2864_v23 = vmul.f32 %v2823_v39, %v5320_v47 }
 0x50e   : > { %2896 = vst [vmem:[%s5687_s7 + $0x88] sm:$0xff] %v2864_v23 }
 0x511   : > { %v2758_v45 = vpop.f32.mrf.mxu3 }
 0x512   : > { %v2863_v28 = vmul.f32 %v2758_v45, %v5292_v59 }
 0x513   : > { %v2826_v56 = vpop.f32.mrf.mxu1 }
 0x514   : > { %2895 = vst [vmem:[%s5687_s7 + $0x80] sm:$0xff] %v2863_v28  ;;  %v2866_v41 = vmul.f32 %v2826_v56, %v5328_v57 }
 0x516   : > { %2898 = vst [vmem:[%s5687_s7 + $0x98] sm:$0xff] %v2866_v41 }
 0x519   : > { %v2761_v34 = vpop.f32.mrf.mxu3 }
 0x51a   : > { %v2865_v15 = vmul.f32 %v2761_v34, %v5300_v17 }
 0x51b   : > { %v2829_v26 = vpop.f32.mrf.mxu1 }
 0x51c   : > { %2897 = vst [vmem:[%s5687_s7 + $0x90] sm:$0xff] %v2865_v15  ;;  %v2868_v47 = vmul.f32 %v2829_v26, %v5336_v3 }
 0x51e   : > { %2900 = vst [vmem:[%s5687_s7 + $0xa8] sm:$0xff] %v2868_v47 }
 0x521   : > { %v2764_v46 = vpop.f32.mrf.mxu3 }
 0x522   : > { %v2867_v59 = vmul.f32 %v2764_v46, %v5308_v35 }
 0x523   : > { %v2832_v44 = vpop.f32.mrf.mxu1 }
 0x524   : > { %2899 = vst [vmem:[%s5687_s7 + $0xa0] sm:$0xff] %v2867_v59  ;;  %v2870_v57 = vmul.f32 %v2832_v44, %v5344_v7 }
 0x526   : > { %2902 = vst [vmem:[%s5687_s7 + $0xb8] sm:$0xff] %v2870_v57 }
 0x529   : > { %v2767_v49 = vpop.f32.mrf.mxu3 }
 0x52a   : > { %v2869_v17 = vmul.f32 %v2767_v49, %v5316_v14 }
 0x52b   : > { %v2835_v52 = vpop.f32.mrf.mxu1 }
 0x52c   : > { %2901 = vst [vmem:[%s5687_s7 + $0xb0] sm:$0xff] %v2869_v17  ;;  %v2872_v3 = vmul.f32 %v2835_v52, %v5355_v12 }
 0x52e   : > { %2904 = vst [vmem:[%s5687_s7 + $0xc8] sm:$0xff] %v2872_v3 }
 0x531   : > { %v2770_v8 = vpop.f32.mrf.mxu3 }
 0x532   : > { %v2871_v35 = vmul.f32 %v2770_v8, %v5324_v18 }
 0x533   : > { %v2838_v55 = vpop.f32.mrf.mxu1 }
 0x534   : > { %2903 = vst [vmem:[%s5687_s7 + $0xc0] sm:$0xff] %v2871_v35  ;;  %v2874_v7 = vmul.f32 %v2838_v55, %v5359_v40 }
 0x536   : > { %2906 = vst [vmem:[%s5687_s7 + $0xd8] sm:$0xff] %v2874_v7 }
 0x539   : > { %v2773_v29 = vpop.f32.mrf.mxu3 }
 0x53a   : > { %v2873_v14 = vmul.f32 %v2773_v29, %v5332_v36 }
 0x53b   : > { %v2841_v25 = vpop.f32.mrf.mxu1 }
 0x53c   : > { %2905 = vst [vmem:[%s5687_s7 + $0xd0] sm:$0xff] %v2873_v14  ;;  %v2876_v2 = vmul.f32 %v2841_v25, %v5363_v58 }
 0x53e   : > { %2908 = vst [vmem:[%s5687_s7 + $0xe8] sm:$0xff] %v2876_v2 }
 0x541   : > { %v2776_v18 = vpop.f32.mrf.mxu3 }
 0x542   : > { %v2875_v12 = vmul.f32 %v2776_v18, %v5340_v27 }
 0x543   : > { %v2844_v32 = vpop.f32.mrf.mxu1 }
 0x544   : > { %2907 = vst [vmem:[%s5687_s7 + $0xe0] sm:$0xff] %v2875_v12  ;;  %v2878_v36 = vmul.f32 %v2844_v32, %v5367_v43 }
 0x546   : > { %2910 = vst [vmem:[%s5687_s7 + $0xf8] sm:$0xff] %v2878_v36 }
 0x549   : > { %v2779_v40 = vpop.f32.mrf.mxu3 }
 0x54a   : > { %v2877_v58 = vmul.f32 %v2779_v40, %v5351_v31 }
 0x54c   : > { %2909 = vst [vmem:[%s5687_s7 + $0xf0] sm:$0xff] %v2877_v58 }
 0x54d   : > { %3519 = shalt.err (!%p3516_p3)
}
 0x54e   : > { %s3556_s30 = smov 256   ;;  %s3557_s6 = smov 16  }
 0x54f   : > { %3386 = dma.vmem_to_hbm [thread:$0]  (%p3626_p5), %s2925_s11, 4096, %s2927_s12, %s2912_s22, %s3556_s30, %s3556_s30, %s3557_s6  }
 0x550 PF: > { %p3392_p4 = scmp.ge.s32.totalorder %s3554_s21, 2  ;;  %s2941_s7 = sand.u32 1, %s3542_s18  }
 0x551   : > { %s2942_s8 = scalar_lea.sflag [#allocation3], %s2941_s7 }
 0x552   : > { %p3389_p7 = pnand %p3392_p4, %p3630_p6 }
 0x554   : > { %p3390_p8 = pneg %p3389_p7 }
 0x556   : > { %3537 = dma.done.wait (%p3390_p8), %s2942_s8, 4096  }
 0x557   : > { %3539 = vsyncadd (%p3390_p8), %s2942_s8, 4294963200  ;;  %p15_p9 = scmp.ge.s32.totalorder %s3613_s24, 4   ;;  %s5906_s18 = smov %s3546_s19 }
 0x558   : > { %s5907_s19 = smov %s3550_s20  ;;  %s5908_s20 = smov %s3624_s27 }
 0x559   : > { %s5909_s21 = smov %s3613_s24  ;;  %17 = sbr.rel (!%p15_p9) target bundleno = 3 (0x3), region = 85 }
 0x55e   :  { %2948 = vsyncpa [#allocation3], 1 }
 0x55f   :  { %2950 = vsyncpa [#allocation3 + $0x1], 1 }

</bundles_post_ra>
